<compile_context>
chip_gen: v6e
topology: v6e:2x2x1
jax: 0.10.0
libtpu: 0.0.40
codegen_flags: <defaults>
</compile_context>

<pallas_src>
import functools
import re

import jax
import jax.numpy as jnp
import numpy as np
from jax.experimental import pallas as pl
from jax.experimental.pallas import tpu as pltpu

ATT_SIZE = 196   # hardcoded in the PyTorch forward()
ATT_PAD = 208    # padded slot count: multiple of 8 (f32) and 16 (bf16 packing)


# ----------------------------------------------------------------------------
# Hardware probes (generation-dependent tiling / VMEM budget).
# ----------------------------------------------------------------------------
def _chip_generation():
    """Best-effort TPU generation from the device kind string (fallback: 6)."""
    try:
        kind = jax.devices()[0].device_kind.lower()
        m = re.search(r"(\d+)", kind)
        if m:
            return int(m.group(1))
    except Exception:
        pass
    return 6


def _vmem_capacity_bytes():
    """Physical per-TensorCore VMEM; falls back to 128 MiB if the query fails."""
    try:
        return int(pltpu.get_tpu_info().vmem_capacity_bytes)
    except Exception:
        return 128 * 1024 * 1024


def _weight_spec_kwargs():
    """Single-buffer kwargs for grid-invariant weight blocks, if supported."""
    try:
        kwargs = {"pipeline_mode": pl.Buffered(1)}
        pl.BlockSpec((8, 128), lambda s: (0, 0), **kwargs)  # probe constructor
        return kwargs
    except Exception:
        return {}


# ----------------------------------------------------------------------------
# Kernel
# ----------------------------------------------------------------------------
def ada_attention_kernel(
    h_ref, sent_ref, att_ref,
    w_ctx_ref, b_ctx_ref,      # ctx2att
    w_sl_ref, b_sl_ref,        # sentinel_linear (Linear part; ReLU in-kernel)
    w_se_ref, b_se_ref,        # sentinel_embed
    w_ho_ref, b_ho_ref,        # ho_linear (Linear part; Tanh in-kernel)
    w_he_ref, b_he_ref,        # ho_embed
    w_al_ref, b_al_ref,        # alpha_net (weight passed as a (1, H) row)
    w_a2h_ref, b_a2h_ref,      # att2h
    out_ref,
    *, hA_dtype,
):
    f32 = jnp.float32
    BB, NP, R = att_ref.shape
    H = w_ctx_ref.shape[1]
    mdt = w_ctx_ref.dtype            # MXU operand dtype (bf16 or f32)

    att3 = att_ref[...]              # (BB, NP, R)  possibly bf16
    att2 = att3.reshape(BB * NP, R)  # clean merge: NP is a multiple of the sublane tile
    h = h_ref[...]                   # (BB, R) f32
    sent = sent_ref[...]             # (BB, R) f32

    # p_att_feats = ctx2att(att_feats): the big MXU matmul over BB*NP rows.
    p_att = jnp.dot(att2, w_ctx_ref[...], preferred_element_type=f32) + b_ctx_ref[...]  # (BB*NP, H)

    # sentinel path: Linear -> ReLU (Dropout = id) -> embed
    sent_lin = jnp.maximum(
        jnp.dot(sent.astype(mdt), w_sl_ref[...], preferred_element_type=f32) + b_sl_ref[...],
        0.0)                                                                             # (BB, E)
    sent_emb = jnp.dot(sent_lin.astype(mdt), w_se_ref[...],
                       preferred_element_type=f32) + b_se_ref[...]                       # (BB, H)

    # hidden-state path: Linear -> Tanh (Dropout = id) -> embed
    h_lin = jnp.tanh(
        jnp.dot(h.astype(mdt), w_ho_ref[...], preferred_element_type=f32) + b_ho_ref[...])  # (BB, E)
    h_emb = jnp.dot(h_lin.astype(mdt), w_he_ref[...],
                    preferred_element_type=f32) + b_he_ref[...]                             # (BB, H)

    # hA = tanh(img_all_embed + expanded_h). On v6e/v7x hA_dtype=bf16 halves the
    # EUP / load-store cost of the kernel's largest intermediate; f32 on v5e.
    # TODO(synk): on v7x, chunk this stage over NP (e.g. 2x104) if VMEM pressure
    # ever limits bb at production R=H sizes.
    hA_a = jnp.tanh((p_att.reshape(BB, NP, H) + h_emb[:, None, :]).astype(hA_dtype))  # (BB, NP, H)
    hA_s = jnp.tanh((sent_emb + h_emb).astype(hA_dtype))                              # (BB, H)

    # alpha_net logits as a VPU broadcast-multiply + lane-axis reduce (an N=1 MXU
    # matmul would cost a full set of vmatmul pushes for one useful output lane).
    w_al_row = w_al_ref[...].astype(f32)                                               # (1, H)
    logit_a = jnp.sum(hA_a.astype(f32) * w_al_row[None, :, :], axis=-1) + b_al_ref[...]  # (BB, NP)
    logit_s = jnp.sum(hA_s.astype(f32) * w_al_row, axis=-1, keepdims=True) + b_al_ref[...]  # (BB, 1)

    # Mask padded attention slots, then one fused, numerically stable softmax over
    # the NP attention slots + the sentinel slot.
    slot = jax.lax.broadcasted_iota(jnp.int32, (BB, NP), 1)
    logit_a = jnp.where(slot < ATT_SIZE, logit_a, -1e30)

    m = jnp.maximum(jnp.max(logit_a, axis=-1, keepdims=True), logit_s)   # (BB, 1)
    e_a = jnp.exp(logit_a - m)                                           # (BB, NP)
    e_s = jnp.exp(logit_s - m)                                           # (BB, 1)
    inv = 1.0 / (e_s + jnp.sum(e_a, axis=-1, keepdims=True))             # (BB, 1)
    alpha_a = e_a * inv                                                  # (BB, NP)
    alpha_s = e_s * inv                                                  # (BB, 1)

    # cHat = alpha @ img_all: attention part as a batched MXU contraction over the
    # NP slots (padded rows of att3 are zero); sentinel part is a VPU multiply.
    # TODO(synk): A/B against a VPU broadcast-multiply + sublane-sum if the bundle
    # dump shows the MXU as the binding slot at production sizes.
    c_att = jnp.einsum("bqn,bnr->bqr",
                       alpha_a[:, None, :].astype(att3.dtype), att3,
                       preferred_element_type=f32).reshape(BB, R)
    c_hat = alpha_s * sent_lin + c_att                                   # (BB, E)

    # atten_out = cHat + h_linear ; out = tanh(att2h(atten_out))   (Dropout = id)
    # att2h operand follows the weight dtype (bf16 on the fast path); bias/tanh f32.
    atten_out = c_hat + h_lin
    out = jnp.tanh(
        jnp.dot(atten_out.astype(w_a2h_ref.dtype), w_a2h_ref[...],
                preferred_element_type=f32) + b_a2h_ref[...])            # (BB, R)
    out_ref[...] = out.astype(out_ref.dtype)


# ----------------------------------------------------------------------------
# Parameters
# ----------------------------------------------------------------------------
def init_params(key, rnn_size, input_encoding_size, att_hid_size):
    """Deterministic synthetic parameters; weights stored as (in, out)."""
    R, E, H = rnn_size, input_encoding_size, att_hid_size

    def lin(key, n_in, n_out):
        kw, kb = jax.random.split(key)
        s = 1.0 / np.sqrt(n_in)
        w = jax.random.uniform(kw, (n_in, n_out), jnp.float32, -s, s)
        b = jax.random.uniform(kb, (1, n_out), jnp.float32, -s, s)
        return w, b

    keys = jax.random.split(key, 7)
    p = {}
    p["w_ctx"], p["b_ctx"] = lin(keys[0], R, H)   # ctx2att
    p["w_sl"], p["b_sl"] = lin(keys[1], R, E)     # sentinel_linear
    p["w_se"], p["b_se"] = lin(keys[2], E, H)     # sentinel_embed
    p["w_ho"], p["b_ho"] = lin(keys[3], R, E)     # ho_linear
    p["w_he"], p["b_he"] = lin(keys[4], E, H)     # ho_embed
    p["w_al"], p["b_al"] = lin(keys[5], H, 1)     # alpha_net
    p["w_a2h"], p["b_a2h"] = lin(keys[6], R, R)   # att2h
    return p


# ----------------------------------------------------------------------------
# Wrapper
# ----------------------------------------------------------------------------
def prepare_att_feats(att_feats, rnn_size, *, use_bf16=True):
    """Reshape to (B, 196, R), pad 196 -> 208 with zero rows and cast once.

    att_feats is constant across caption decode steps, so hoist this out of the
    per-step ada_attention() call: it avoids re-reading / re-writing the full
    (dominant) tensor through HBM every step.
    """
    B = att_feats.shape[0]
    att = att_feats.reshape(B, ATT_SIZE, rnn_size)
    att = jnp.pad(att, ((0, 0), (0, ATT_PAD - ATT_SIZE), (0, 0)))
    return att.astype(jnp.bfloat16 if use_bf16 else jnp.float32)


def ada_attention(h, sentinel, att_feats, params, rnn_size, *, block_b=None, use_bf16=True):
    B = h.shape[0]
    R = rnn_size
    E = params["w_sl"].shape[1]
    H = params["w_ctx"].shape[1]
    # The PyTorch forward silently requires input_encoding_size == rnn_size
    # (img_all concat, cHat + h_linear, att2h input). Fail loudly here.
    assert E == R, f"AdaAttention requires input_encoding_size ({E}) == rnn_size ({R})"

    # --- per-generation tuning ------------------------------------------------
    gen = _chip_generation()
    vmem_phys = _vmem_capacity_bytes()
    if gen >= 7:
        vmem_phys = min(vmem_phys, 64 * 1024 * 1024)   # v7x: 64 MiB per TensorCore
    # ~75% of physical VMEM leaves headroom for the compiler's internal scratch
    # (p_att / hA intermediates) on top of the pipelined buffers.
    vmem_limit = (vmem_phys * 3) // 4
    two_tc = gen >= 7                                   # v7x has 2 TensorCores
    if block_b is None:
        block_b = 8 if vmem_phys <= 64 * 1024 * 1024 else 16

    mdt = jnp.bfloat16 if use_bf16 else jnp.float32
    # hA (tanh) intermediate in bf16 only where the VPU/EUP are bf16-capable (v6e+).
    hA_dtype = jnp.bfloat16 if (use_bf16 and gen >= 6) else jnp.float32

    # --- att_feats: use pre-prepared tensor if given, else prepare here --------
    if att_feats.ndim == 3 and att_feats.shape[1] == ATT_PAD:
        att_p = att_feats.astype(mdt)          # already padded/cast outside the call
    else:
        att_p = prepare_att_feats(att_feats, R, use_bf16=use_bf16)

    # --- batch tiling -----------------------------------------------------------
    if B <= block_b:
        bb, num_steps = B, 1
    else:
        bb = ((block_b + 7) // 8) * 8          # keep the sublane block dim 8-aligned
        num_steps = -(-B // bb)
        if two_tc and num_steps % 2:           # even grid only matters for v7x megacore
            num_steps += 1
    B_pad = bb * num_steps

    h_p, sent_p = h, sentinel
    if B_pad != B:
        h_p = jnp.pad(h, ((0, B_pad - B), (0, 0)))
        sent_p = jnp.pad(sentinel, ((0, B_pad - B), (0, 0)))
        att_p = jnp.pad(att_p, ((0, B_pad - B), (0, 0), (0, 0)))

    # bf16 operands for the MXU matmuls (also halves the dominant att_feats DMA);
    # biases, softmax/tanh accumulation and alpha_net stay f32.
    w_ctx = params["w_ctx"].astype(mdt)
    w_sl = params["w_sl"].astype(mdt)
    w_se = params["w_se"].astype(mdt)
    w_ho = params["w_ho"].astype(mdt)
    w_he = params["w_he"].astype(mdt)
    w_a2h = params["w_a2h"].astype(mdt)
    w_al_t = params["w_al"].reshape(1, H)      # lane-major row for the VPU alpha path
    # TODO(synk): optional v7x-only fp8 quantization of att_feats / w_ctx for ctx2att.

    weight_order = [
        w_ctx, params["b_ctx"],
        w_sl, params["b_sl"],
        w_se, params["b_se"],
        w_ho, params["b_ho"],
        w_he, params["b_he"],
        w_al_t, params["b_al"],
        w_a2h, params["b_a2h"],
    ]

    kernel = functools.partial(ada_attention_kernel, hA_dtype=hA_dtype)

    def build_specs(weight_kwargs):
        def const_spec(arr):
            # Grid-invariant block: never re-DMA'd between steps; single-buffered
            # when supported (halves the resident weight footprint).
            nd = arr.ndim
            return pl.BlockSpec(arr.shape, lambda s, _nd=nd: (0,) * _nd, **weight_kwargs)

        return [
            pl.BlockSpec((bb, R), lambda s: (s, 0)),               # h
            pl.BlockSpec((bb, R), lambda s: (s, 0)),               # sentinel
            pl.BlockSpec((bb, ATT_PAD, R), lambda s: (s, 0, 0)),   # att_feats (padded)
        ] + [const_spec(w) for w in weight_order]

    def run(weight_kwargs):
        return pl.pallas_call(
            kernel,
            out_shape=jax.ShapeDtypeStruct((B_pad, R), jnp.float32),
            grid_spec=pltpu.PrefetchScalarGridSpec(
                num_scalar_prefetch=0,
                grid=(num_steps,),
                in_specs=build_specs(weight_kwargs),
                out_specs=pl.BlockSpec((bb, R), lambda s: (s, 0)),
            ),
            compiler_params=pltpu.CompilerParams(
                dimension_semantics=("parallel",),
                vmem_limit_bytes=int(vmem_limit)),
        )(h_p, sent_p, att_p, *weight_order)

    wk = _weight_spec_kwargs()
    if wk:
        try:
            out = run(wk)
        except Exception:
            out = run({})   # fall back to default double-buffered weight blocks
    else:
        out = run({})
    return out[:B]


# ----------------------------------------------------------------------------
# Pure-JAX reference (matches the PyTorch forward in eval mode)
# ----------------------------------------------------------------------------
def ada_attention_reference(h, sentinel, att_feats, p, rnn_size):
    B = att_feats.shape[0]
    att_feats = att_feats.reshape(B, ATT_SIZE, rnn_size)
    p_att = att_feats @ p["w_ctx"] + p["b_ctx"]                     # (B, N, H)
    sent_lin = jnp.maximum(sentinel @ p["w_sl"] + p["b_sl"], 0.0)   # (B, E)
    sent_emb = sent_lin @ p["w_se"] + p["b_se"]                     # (B, H)
    h_lin = jnp.tanh(h @ p["w_ho"] + p["b_ho"])                     # (B, E)
    h_emb = h_lin @ p["w_he"] + p["b_he"]                           # (B, H)

    img_all = jnp.concatenate([sent_lin[:, None, :], att_feats], axis=1)     # (B, N+1, E)
    img_all_embed = jnp.concatenate([sent_emb[:, None, :], p_att], axis=1)   # (B, N+1, H)
    hA = jnp.tanh(img_all_embed + h_emb[:, None, :])
    alpha = (hA @ p["w_al"] + p["b_al"])[..., 0]                    # (B, N+1)
    alpha = jax.nn.softmax(alpha, axis=-1)
    c_hat = jnp.einsum("bn,bne->be", alpha, img_all)                # (B, E)
    atten_out = c_hat + h_lin
    return jnp.tanh(atten_out @ p["w_a2h"] + p["b_a2h"])            # (B, R)


if __name__ == "__main__":
    # Small, self-consistent sizes (forward requires rnn == input_encoding == att_hid).
    B = 2
    RNN_SIZE = 64
    INPUT_ENCODING_SIZE = 64
    ATT_HID_SIZE = 64

    key = jax.random.PRNGKey(0)
    k_par, k_h, k_s, k_a = jax.random.split(key, 4)
    params = init_params(k_par, RNN_SIZE, INPUT_ENCODING_SIZE, ATT_HID_SIZE)

    h = jax.random.normal(k_h, (B, RNN_SIZE), jnp.float32)
    sentinel = jax.random.normal(k_s, (B, RNN_SIZE), jnp.float32)
    att_feats = jax.random.normal(k_a, (B, ATT_SIZE, RNN_SIZE), jnp.float32)

    ref = ada_attention_reference(h, sentinel, att_feats, params, RNN_SIZE)

    # f32 path: strict correctness check (raw att_feats, prepared internally).
    out_f32 = ada_attention(h, sentinel, att_feats, params, RNN_SIZE, use_bf16=False)
    out_f32 = jax.block_until_ready(out_f32)
    np.testing.assert_allclose(np.asarray(out_f32), np.asarray(ref), rtol=1e-4, atol=1e-4)

    # bf16 fast path: att_feats padded/cast ONCE outside the per-step call (hoist this
    # across caption decode timesteps in real use); looser tolerance vs the f32 ref
    # (bf16 MXU operands + bf16 hA/att2h stages, f32 accumulation throughout).
    att_prep = prepare_att_feats(att_feats, RNN_SIZE, use_bf16=True)
    out_bf16 = ada_attention(h, sentinel, att_prep, params, RNN_SIZE, use_bf16=True)
    out_bf16 = jax.block_until_ready(out_bf16)
    np.testing.assert_allclose(np.asarray(out_bf16), np.asarray(ref), rtol=3e-2, atol=3e-2)

    print("KERNEL_OK")
</pallas_src>

<mosaic_0001>
module attributes {stable_mosaic.version = 11 : i64} {
  func.func @ada_attention_kernel(%arg0: i32, %arg1: memref<2x64xf32, #tpu.memory_space<vmem>>, %arg2: memref<2x64xf32, #tpu.memory_space<vmem>>, %arg3: memref<2x208x64xf32, #tpu.memory_space<vmem>>, %arg4: memref<64x64xf32, #tpu.memory_space<vmem>>, %arg5: memref<1x64xf32, #tpu.memory_space<vmem>>, %arg6: memref<64x64xf32, #tpu.memory_space<vmem>>, %arg7: memref<1x64xf32, #tpu.memory_space<vmem>>, %arg8: memref<64x64xf32, #tpu.memory_space<vmem>>, %arg9: memref<1x64xf32, #tpu.memory_space<vmem>>, %arg10: memref<64x64xf32, #tpu.memory_space<vmem>>, %arg11: memref<1x64xf32, #tpu.memory_space<vmem>>, %arg12: memref<64x64xf32, #tpu.memory_space<vmem>>, %arg13: memref<1x64xf32, #tpu.memory_space<vmem>>, %arg14: memref<1x64xf32, #tpu.memory_space<vmem>>, %arg15: memref<1x1xf32, #tpu.memory_space<vmem>>, %arg16: memref<64x64xf32, #tpu.memory_space<vmem>>, %arg17: memref<1x64xf32, #tpu.memory_space<vmem>>, %arg18: memref<2x64xf32, #tpu.memory_space<vmem>>) attributes {dimension_semantics = [#tpu.dimension_semantics<parallel>], iteration_bounds = array<i64: 1>, scalar_prefetch = 0 : i64, scratch_operands = 0 : i64, tpu.core_type = #tpu.core_type<tc>, window_params = [{transform_indices = @transform_0, window_bounds = array<i64: 2, 64>}, {transform_indices = @transform_1, window_bounds = array<i64: 2, 64>}, {transform_indices = @transform_2, window_bounds = array<i64: 2, 208, 64>}, {pipeline_mode = #tpu.pipeline_mode<synchronous>, transform_indices = @transform_3, window_bounds = array<i64: 64, 64>}, {pipeline_mode = #tpu.pipeline_mode<synchronous>, transform_indices = @transform_4, window_bounds = array<i64: 1, 64>}, {pipeline_mode = #tpu.pipeline_mode<synchronous>, transform_indices = @transform_5, window_bounds = array<i64: 64, 64>}, {pipeline_mode = #tpu.pipeline_mode<synchronous>, transform_indices = @transform_6, window_bounds = array<i64: 1, 64>}, {pipeline_mode = #tpu.pipeline_mode<synchronous>, transform_indices = @transform_7, window_bounds = array<i64: 64, 64>}, {pipeline_mode = #tpu.pipeline_mode<synchronous>, transform_indices = @transform_8, window_bounds = array<i64: 1, 64>}, {pipeline_mode = #tpu.pipeline_mode<synchronous>, transform_indices = @transform_9, window_bounds = array<i64: 64, 64>}, {pipeline_mode = #tpu.pipeline_mode<synchronous>, transform_indices = @transform_10, window_bounds = array<i64: 1, 64>}, {pipeline_mode = #tpu.pipeline_mode<synchronous>, transform_indices = @transform_11, window_bounds = array<i64: 64, 64>}, {pipeline_mode = #tpu.pipeline_mode<synchronous>, transform_indices = @transform_12, window_bounds = array<i64: 1, 64>}, {pipeline_mode = #tpu.pipeline_mode<synchronous>, transform_indices = @transform_13, window_bounds = array<i64: 1, 64>}, {pipeline_mode = #tpu.pipeline_mode<synchronous>, transform_indices = @transform_14, window_bounds = array<i64: 1, 1>}, {pipeline_mode = #tpu.pipeline_mode<synchronous>, transform_indices = @transform_15, window_bounds = array<i64: 64, 64>}, {pipeline_mode = #tpu.pipeline_mode<synchronous>, transform_indices = @transform_16, window_bounds = array<i64: 1, 64>}, {transform_indices = @transform_17, window_bounds = array<i64: 2, 64>}]} {
    %c0 = arith.constant 0 : index
    %c0_0 = arith.constant 0 : index
    %c0_1 = arith.constant 0 : index
    %0 = vector.load %arg3[%c0, %c0_0, %c0_1] : memref<2x208x64xf32, #tpu.memory_space<vmem>>, vector<2x208x64xf32>
    %1 = vector.shape_cast %0 : vector<2x208x64xf32> to vector<416x64xf32>
    %c0_2 = arith.constant 0 : index
    %c0_3 = arith.constant 0 : index
    %2 = vector.load %arg1[%c0_2, %c0_3] : memref<2x64xf32, #tpu.memory_space<vmem>>, vector<2x64xf32>
    %c0_4 = arith.constant 0 : index
    %c0_5 = arith.constant 0 : index
    %3 = vector.load %arg2[%c0_4, %c0_5] : memref<2x64xf32, #tpu.memory_space<vmem>>, vector<2x64xf32>
    %c0_6 = arith.constant 0 : index
    %c0_7 = arith.constant 0 : index
    %4 = vector.load %arg4[%c0_6, %c0_7] : memref<64x64xf32, #tpu.memory_space<vmem>>, vector<64x64xf32>
    %cst = arith.constant dense<0.000000e+00> : vector<416x64xf32>
    %5 = tpu.matmul %1, %4, %cst {dimension_numbers = #tpu.dot_dimension_numbers<[1], [0], [0], [1], [0, 0, 1, 1], [], []>} : vector<416x64xf32>, vector<64x64xf32>, vector<416x64xf32> -> vector<416x64xf32>
    %c0_8 = arith.constant 0 : index
    %c0_9 = arith.constant 0 : index
    %6 = vector.load %arg5[%c0_8, %c0_9] : memref<1x64xf32, #tpu.memory_space<vmem>>, vector<1x64xf32>
    %7 = vector.broadcast %6 : vector<1x64xf32> to vector<416x64xf32>
    %8 = arith.addf %5, %7 : vector<416x64xf32>
    %c0_10 = arith.constant 0 : index
    %c0_11 = arith.constant 0 : index
    %9 = vector.load %arg6[%c0_10, %c0_11] : memref<64x64xf32, #tpu.memory_space<vmem>>, vector<64x64xf32>
    %cst_12 = arith.constant dense<0.000000e+00> : vector<2x64xf32>
    %10 = tpu.matmul %3, %9, %cst_12 {dimension_numbers = #tpu.dot_dimension_numbers<[1], [0], [0], [1], [0, 0, 1, 1], [], []>} : vector<2x64xf32>, vector<64x64xf32>, vector<2x64xf32> -> vector<2x64xf32>
    %c0_13 = arith.constant 0 : index
    %c0_14 = arith.constant 0 : index
    %11 = vector.load %arg7[%c0_13, %c0_14] : memref<1x64xf32, #tpu.memory_space<vmem>>, vector<1x64xf32>
    %12 = vector.broadcast %11 : vector<1x64xf32> to vector<2x64xf32>
    %13 = arith.addf %10, %12 : vector<2x64xf32>
    %cst_15 = arith.constant 0.000000e+00 : f32
    %14 = vector.broadcast %cst_15 : f32 to vector<2x64xf32>
    %15 = arith.maximumf %13, %14 : vector<2x64xf32>
    %c0_16 = arith.constant 0 : index
    %c0_17 = arith.constant 0 : index
    %16 = vector.load %arg8[%c0_16, %c0_17] : memref<64x64xf32, #tpu.memory_space<vmem>>, vector<64x64xf32>
    %cst_18 = arith.constant dense<0.000000e+00> : vector<2x64xf32>
    %17 = tpu.matmul %15, %16, %cst_18 {dimension_numbers = #tpu.dot_dimension_numbers<[1], [0], [0], [1], [0, 0, 1, 1], [], []>} : vector<2x64xf32>, vector<64x64xf32>, vector<2x64xf32> -> vector<2x64xf32>
    %c0_19 = arith.constant 0 : index
    %c0_20 = arith.constant 0 : index
    %18 = vector.load %arg9[%c0_19, %c0_20] : memref<1x64xf32, #tpu.memory_space<vmem>>, vector<1x64xf32>
    %19 = vector.broadcast %18 : vector<1x64xf32> to vector<2x64xf32>
    %20 = arith.addf %17, %19 : vector<2x64xf32>
    %c0_21 = arith.constant 0 : index
    %c0_22 = arith.constant 0 : index
    %21 = vector.load %arg10[%c0_21, %c0_22] : memref<64x64xf32, #tpu.memory_space<vmem>>, vector<64x64xf32>
    %cst_23 = arith.constant dense<0.000000e+00> : vector<2x64xf32>
    %22 = tpu.matmul %2, %21, %cst_23 {dimension_numbers = #tpu.dot_dimension_numbers<[1], [0], [0], [1], [0, 0, 1, 1], [], []>} : vector<2x64xf32>, vector<64x64xf32>, vector<2x64xf32> -> vector<2x64xf32>
    %c0_24 = arith.constant 0 : index
    %c0_25 = arith.constant 0 : index
    %23 = vector.load %arg11[%c0_24, %c0_25] : memref<1x64xf32, #tpu.memory_space<vmem>>, vector<1x64xf32>
    %24 = vector.broadcast %23 : vector<1x64xf32> to vector<2x64xf32>
    %25 = arith.addf %22, %24 : vector<2x64xf32>
    %26 = math.tanh %25 : vector<2x64xf32>
    %c0_26 = arith.constant 0 : index
    %c0_27 = arith.constant 0 : index
    %27 = vector.load %arg12[%c0_26, %c0_27] : memref<64x64xf32, #tpu.memory_space<vmem>>, vector<64x64xf32>
    %cst_28 = arith.constant dense<0.000000e+00> : vector<2x64xf32>
    %28 = tpu.matmul %26, %27, %cst_28 {dimension_numbers = #tpu.dot_dimension_numbers<[1], [0], [0], [1], [0, 0, 1, 1], [], []>} : vector<2x64xf32>, vector<64x64xf32>, vector<2x64xf32> -> vector<2x64xf32>
    %c0_29 = arith.constant 0 : index
    %c0_30 = arith.constant 0 : index
    %29 = vector.load %arg13[%c0_29, %c0_30] : memref<1x64xf32, #tpu.memory_space<vmem>>, vector<1x64xf32>
    %30 = vector.broadcast %29 : vector<1x64xf32> to vector<2x64xf32>
    %31 = arith.addf %28, %30 : vector<2x64xf32>
    %32 = vector.shape_cast %8 : vector<416x64xf32> to vector<2x208x64xf32>
    %33 = vector.shape_cast %31 : vector<2x64xf32> to vector<2x1x64xf32>
    %34 = vector.broadcast %33 : vector<2x1x64xf32> to vector<2x208x64xf32>
    %35 = arith.addf %32, %34 : vector<2x208x64xf32>
    %36 = math.tanh %35 : vector<2x208x64xf32>
    %37 = arith.addf %20, %31 : vector<2x64xf32>
    %38 = math.tanh %37 : vector<2x64xf32>
    %c0_31 = arith.constant 0 : index
    %c0_32 = arith.constant 0 : index
    %39 = vector.load %arg14[%c0_31, %c0_32] : memref<1x64xf32, #tpu.memory_space<vmem>>, vector<1x64xf32>
    %40 = vector.shape_cast %39 : vector<1x64xf32> to vector<1x1x64xf32>
    %41 = vector.broadcast %40 : vector<1x1x64xf32> to vector<2x208x64xf32>
    %42 = arith.mulf %36, %41 : vector<2x208x64xf32>
    %cst_33 = arith.constant dense<0.000000e+00> : vector<2x208xf32>
    %43 = vector.multi_reduction <add>, %42, %cst_33 [2] : vector<2x208x64xf32> to vector<2x208xf32>
    %c0_34 = arith.constant 0 : index
    %c0_35 = arith.constant 0 : index
    %44 = vector.load %arg15[%c0_34, %c0_35] : memref<1x1xf32, #tpu.memory_space<vmem>>, vector<1x1xf32>
    %45 = vector.broadcast %44 : vector<1x1xf32> to vector<2x208xf32>
    %46 = arith.addf %43, %45 : vector<2x208xf32>
    %47 = vector.broadcast %39 : vector<1x64xf32> to vector<2x64xf32>
    %48 = arith.mulf %38, %47 : vector<2x64xf32>
    %cst_36 = arith.constant dense<0.000000e+00> : vector<2xf32>
    %49 = vector.multi_reduction <add>, %48, %cst_36 [1] : vector<2x64xf32> to vector<2xf32>
    %50 = vector.shape_cast %49 : vector<2xf32> to vector<2x1xf32>
    %c0_37 = arith.constant 0 : index
    %c0_38 = arith.constant 0 : index
    %51 = vector.load %arg15[%c0_37, %c0_38] : memref<1x1xf32, #tpu.memory_space<vmem>>, vector<1x1xf32>
    %52 = vector.broadcast %51 : vector<1x1xf32> to vector<2x1xf32>
    %53 = arith.addf %50, %52 : vector<2x1xf32>
    %54 = tpu.iota {dimensions = array<i32: 1>} : vector<2x208xi32>
    %c196_i32 = arith.constant 196 : i32
    %55 = vector.broadcast %c196_i32 : i32 to vector<2x208xi32>
    %56 = arith.cmpi slt, %54, %55 : vector<2x208xi32>
    %cst_39 = arith.constant -1.000000e+30 : f32
    %57 = vector.broadcast %cst_39 : f32 to vector<2x208xf32>
    %58 = arith.select %56, %46, %57 : vector<2x208xi1>, vector<2x208xf32>
    %cst_40 = arith.constant dense<0xFF800000> : vector<2xf32>
    %59 = vector.multi_reduction <maximumf>, %58, %cst_40 [1] : vector<2x208xf32> to vector<2xf32>
    %60 = vector.shape_cast %59 : vector<2xf32> to vector<2x1xf32>
    %61 = arith.maximumf %60, %53 : vector<2x1xf32>
    %62 = vector.broadcast %61 : vector<2x1xf32> to vector<2x208xf32>
    %63 = arith.subf %58, %62 : vector<2x208xf32>
    %64 = math.exp %63 : vector<2x208xf32>
    %65 = arith.subf %53, %61 : vector<2x1xf32>
    %66 = math.exp %65 : vector<2x1xf32>
    %cst_41 = arith.constant dense<0.000000e+00> : vector<2xf32>
    %67 = vector.multi_reduction <add>, %64, %cst_41 [1] : vector<2x208xf32> to vector<2xf32>
    %68 = vector.shape_cast %67 : vector<2xf32> to vector<2x1xf32>
    %69 = arith.addf %66, %68 : vector<2x1xf32>
    %cst_42 = arith.constant 1.000000e+00 : f32
    %70 = vector.broadcast %cst_42 : f32 to vector<2x1xf32>
    %71 = arith.divf %70, %69 : vector<2x1xf32>
    %72 = vector.broadcast %71 : vector<2x1xf32> to vector<2x208xf32>
    %73 = arith.mulf %64, %72 : vector<2x208xf32>
    %74 = arith.mulf %66, %71 : vector<2x1xf32>
    %75 = vector.shape_cast %73 : vector<2x208xf32> to vector<2x1x208xf32>
    "tpu.trace_start"() <{level = 10 : i32, message = "bqn,bnr->bqr"}> : () -> ()
    %cst_43 = arith.constant dense<0.000000e+00> : vector<2x1x64xf32>
    %76 = tpu.matmul %75, %0, %cst_43 {dimension_numbers = #tpu.dot_dimension_numbers<[2], [1], [1], [2], [0, 0, 0, 1, 1, 2], [0], [0]>} : vector<2x1x208xf32>, vector<2x208x64xf32>, vector<2x1x64xf32> -> vector<2x1x64xf32>
    "tpu.trace_stop"() : () -> ()
    %77 = vector.shape_cast %76 : vector<2x1x64xf32> to vector<2x64xf32>
    %78 = vector.broadcast %74 : vector<2x1xf32> to vector<2x64xf32>
    %79 = arith.mulf %78, %15 : vector<2x64xf32>
    %80 = arith.addf %79, %77 : vector<2x64xf32>
    %81 = arith.addf %80, %26 : vector<2x64xf32>
    %c0_44 = arith.constant 0 : index
    %c0_45 = arith.constant 0 : index
    %82 = vector.load %arg16[%c0_44, %c0_45] : memref<64x64xf32, #tpu.memory_space<vmem>>, vector<64x64xf32>
    %cst_46 = arith.constant dense<0.000000e+00> : vector<2x64xf32>
    %83 = tpu.matmul %81, %82, %cst_46 {dimension_numbers = #tpu.dot_dimension_numbers<[1], [0], [0], [1], [0, 0, 1, 1], [], []>} : vector<2x64xf32>, vector<64x64xf32>, vector<2x64xf32> -> vector<2x64xf32>
    %c0_47 = arith.constant 0 : index
    %c0_48 = arith.constant 0 : index
    %84 = vector.load %arg17[%c0_47, %c0_48] : memref<1x64xf32, #tpu.memory_space<vmem>>, vector<1x64xf32>
    %85 = vector.broadcast %84 : vector<1x64xf32> to vector<2x64xf32>
    %86 = arith.addf %83, %85 : vector<2x64xf32>
    %87 = math.tanh %86 : vector<2x64xf32>
    %c0_49 = arith.constant 0 : index
    %c0_50 = arith.constant 0 : index
    %88 = vector.load %arg18[%c0_49, %c0_50] : memref<2x64xf32, #tpu.memory_space<vmem>>, vector<2x64xf32>
    tpu.vector_store %arg18[%c0_49, %c0_50], %87 {strides = array<i32>} : memref<2x64xf32, #tpu.memory_space<vmem>>, vector<2x64xf32>,
    return
  }
  func.func @transform_0(%arg0: i32) -> (i32, i32) {
    %c0_i32 = arith.constant 0 : i32
    %c0_i32_0 = arith.constant 0 : i32
    return %arg0, %c0_i32 : i32, i32
  }
  func.func @transform_1(%arg0: i32) -> (i32, i32) {
    %c0_i32 = arith.constant 0 : i32
    %c0_i32_0 = arith.constant 0 : i32
    return %arg0, %c0_i32 : i32, i32
  }
  func.func @transform_2(%arg0: i32) -> (i32, i32, i32) {
    %c0_i32 = arith.constant 0 : i32
    %c0_i32_0 = arith.constant 0 : i32
    %c0_i32_1 = arith.constant 0 : i32
    return %arg0, %c0_i32, %c0_i32_0 : i32, i32, i32
  }
  func.func @transform_3(%arg0: i32) -> (i32, i32) {
    %c0_i32 = arith.constant 0 : i32
    %c0_i32_0 = arith.constant 0 : i32
    %c0_i32_1 = arith.constant 0 : i32
    return %c0_i32, %c0_i32_0 : i32, i32
  }
  func.func @transform_4(%arg0: i32) -> (i32, i32) {
    %c0_i32 = arith.constant 0 : i32
    %c0_i32_0 = arith.constant 0 : i32
    %c0_i32_1 = arith.constant 0 : i32
    return %c0_i32, %c0_i32_0 : i32, i32
  }
  func.func @transform_5(%arg0: i32) -> (i32, i32) {
    %c0_i32 = arith.constant 0 : i32
    %c0_i32_0 = arith.constant 0 : i32
    %c0_i32_1 = arith.constant 0 : i32
    return %c0_i32, %c0_i32_0 : i32, i32
  }
  func.func @transform_6(%arg0: i32) -> (i32, i32) {
    %c0_i32 = arith.constant 0 : i32
    %c0_i32_0 = arith.constant 0 : i32
    %c0_i32_1 = arith.constant 0 : i32
    return %c0_i32, %c0_i32_0 : i32, i32
  }
  func.func @transform_7(%arg0: i32) -> (i32, i32) {
    %c0_i32 = arith.constant 0 : i32
    %c0_i32_0 = arith.constant 0 : i32
    %c0_i32_1 = arith.constant 0 : i32
    return %c0_i32, %c0_i32_0 : i32, i32
  }
  func.func @transform_8(%arg0: i32) -> (i32, i32) {
    %c0_i32 = arith.constant 0 : i32
    %c0_i32_0 = arith.constant 0 : i32
    %c0_i32_1 = arith.constant 0 : i32
    return %c0_i32, %c0_i32_0 : i32, i32
  }
  func.func @transform_9(%arg0: i32) -> (i32, i32) {
    %c0_i32 = arith.constant 0 : i32
    %c0_i32_0 = arith.constant 0 : i32
    %c0_i32_1 = arith.constant 0 : i32
    return %c0_i32, %c0_i32_0 : i32, i32
  }
  func.func @transform_10(%arg0: i32) -> (i32, i32) {
    %c0_i32 = arith.constant 0 : i32
    %c0_i32_0 = arith.constant 0 : i32
    %c0_i32_1 = arith.constant 0 : i32
    return %c0_i32, %c0_i32_0 : i32, i32
  }
  func.func @transform_11(%arg0: i32) -> (i32, i32) {
    %c0_i32 = arith.constant 0 : i32
    %c0_i32_0 = arith.constant 0 : i32
    %c0_i32_1 = arith.constant 0 : i32
    return %c0_i32, %c0_i32_0 : i32, i32
  }
  func.func @transform_12(%arg0: i32) -> (i32, i32) {
    %c0_i32 = arith.constant 0 : i32
    %c0_i32_0 = arith.constant 0 : i32
    %c0_i32_1 = arith.constant 0 : i32
    return %c0_i32, %c0_i32_0 : i32, i32
  }
  func.func @transform_13(%arg0: i32) -> (i32, i32) {
    %c0_i32 = arith.constant 0 : i32
    %c0_i32_0 = arith.constant 0 : i32
    %c0_i32_1 = arith.constant 0 : i32
    return %c0_i32, %c0_i32_0 : i32, i32
  }
  func.func @transform_14(%arg0: i32) -> (i32, i32) {
    %c0_i32 = arith.constant 0 : i32
    %c0_i32_0 = arith.constant 0 : i32
    %c0_i32_1 = arith.constant 0 : i32
    return %c0_i32, %c0_i32_0 : i32, i32
  }
  func.func @transform_15(%arg0: i32) -> (i32, i32) {
    %c0_i32 = arith.constant 0 : i32
    %c0_i32_0 = arith.constant 0 : i32
    %c0_i32_1 = arith.constant 0 : i32
    return %c0_i32, %c0_i32_0 : i32, i32
  }
  func.func @transform_16(%arg0: i32) -> (i32, i32) {
    %c0_i32 = arith.constant 0 : i32
    %c0_i32_0 = arith.constant 0 : i32
    %c0_i32_1 = arith.constant 0 : i32
    return %c0_i32, %c0_i32_0 : i32, i32
  }
  func.func @transform_17(%arg0: i32) -> (i32, i32) {
    %c0_i32 = arith.constant 0 : i32
    %c0_i32_0 = arith.constant 0 : i32
    return %arg0, %c0_i32 : i32, i32
  }
}

module attributes {stable_mosaic.version = 11 : i64} {
  func.func @ada_attention_kernel(%arg0: i32, %arg1: memref<2x64xf32, #tpu.memory_space<vmem>>, %arg2: memref<2x64xf32, #tpu.memory_space<vmem>>, %arg3: memref<2x208x64xf32, #tpu.memory_space<vmem>>, %arg4: memref<64x64xf32, #tpu.memory_space<vmem>>, %arg5: memref<1x64xf32, #tpu.memory_space<vmem>>, %arg6: memref<64x64xf32, #tpu.memory_space<vmem>>, %arg7: memref<1x64xf32, #tpu.memory_space<vmem>>, %arg8: memref<64x64xf32, #tpu.memory_space<vmem>>, %arg9: memref<1x64xf32, #tpu.memory_space<vmem>>, %arg10: memref<64x64xf32, #tpu.memory_space<vmem>>, %arg11: memref<1x64xf32, #tpu.memory_space<vmem>>, %arg12: memref<64x64xf32, #tpu.memory_space<vmem>>, %arg13: memref<1x64xf32, #tpu.memory_space<vmem>>, %arg14: memref<1x64xf32, #tpu.memory_space<vmem>>, %arg15: memref<1x1xf32, #tpu.memory_space<vmem>>, %arg16: memref<64x64xf32, #tpu.memory_space<vmem>>, %arg17: memref<1x64xf32, #tpu.memory_space<vmem>>, %arg18: memref<2x64xf32, #tpu.memory_space<vmem>>) attributes {dimension_semantics = [#tpu.dimension_semantics<parallel>], iteration_bounds = array<i64: 1>, scalar_prefetch = 0 : i64, scratch_operands = 0 : i64, tpu.core_type = #tpu.core_type<tc>, window_params = [{transform_indices = @transform_0, window_bounds = array<i64: 2, 64>}, {transform_indices = @transform_1, window_bounds = array<i64: 2, 64>}, {transform_indices = @transform_2, window_bounds = array<i64: 2, 208, 64>}, {pipeline_mode = #tpu.pipeline_mode<synchronous>, transform_indices = @transform_3, window_bounds = array<i64: 64, 64>}, {pipeline_mode = #tpu.pipeline_mode<synchronous>, transform_indices = @transform_4, window_bounds = array<i64: 1, 64>}, {pipeline_mode = #tpu.pipeline_mode<synchronous>, transform_indices = @transform_5, window_bounds = array<i64: 64, 64>}, {pipeline_mode = #tpu.pipeline_mode<synchronous>, transform_indices = @transform_6, window_bounds = array<i64: 1, 64>}, {pipeline_mode = #tpu.pipeline_mode<synchronous>, transform_indices = @transform_7, window_bounds = array<i64: 64, 64>}, {pipeline_mode = #tpu.pipeline_mode<synchronous>, transform_indices = @transform_8, window_bounds = array<i64: 1, 64>}, {pipeline_mode = #tpu.pipeline_mode<synchronous>, transform_indices = @transform_9, window_bounds = array<i64: 64, 64>}, {pipeline_mode = #tpu.pipeline_mode<synchronous>, transform_indices = @transform_10, window_bounds = array<i64: 1, 64>}, {pipeline_mode = #tpu.pipeline_mode<synchronous>, transform_indices = @transform_11, window_bounds = array<i64: 64, 64>}, {pipeline_mode = #tpu.pipeline_mode<synchronous>, transform_indices = @transform_12, window_bounds = array<i64: 1, 64>}, {pipeline_mode = #tpu.pipeline_mode<synchronous>, transform_indices = @transform_13, window_bounds = array<i64: 1, 64>}, {pipeline_mode = #tpu.pipeline_mode<synchronous>, transform_indices = @transform_14, window_bounds = array<i64: 1, 1>}, {pipeline_mode = #tpu.pipeline_mode<synchronous>, transform_indices = @transform_15, window_bounds = array<i64: 64, 64>}, {pipeline_mode = #tpu.pipeline_mode<synchronous>, transform_indices = @transform_16, window_bounds = array<i64: 1, 64>}, {transform_indices = @transform_17, window_bounds = array<i64: 2, 64>}]} {
    %c0 = arith.constant 0 : index
    %c0_0 = arith.constant 0 : index
    %c0_1 = arith.constant 0 : index
    %0 = vector.load %arg3[%c0, %c0_0, %c0_1] : memref<2x208x64xf32, #tpu.memory_space<vmem>>, vector<2x208x64xf32>
    %1 = vector.shape_cast %0 : vector<2x208x64xf32> to vector<416x64xf32>
    %c0_2 = arith.constant 0 : index
    %c0_3 = arith.constant 0 : index
    %2 = vector.load %arg1[%c0_2, %c0_3] : memref<2x64xf32, #tpu.memory_space<vmem>>, vector<2x64xf32>
    %c0_4 = arith.constant 0 : index
    %c0_5 = arith.constant 0 : index
    %3 = vector.load %arg2[%c0_4, %c0_5] : memref<2x64xf32, #tpu.memory_space<vmem>>, vector<2x64xf32>
    %c0_6 = arith.constant 0 : index
    %c0_7 = arith.constant 0 : index
    %4 = vector.load %arg4[%c0_6, %c0_7] : memref<64x64xf32, #tpu.memory_space<vmem>>, vector<64x64xf32>
    %cst = arith.constant dense<0.000000e+00> : vector<416x64xf32>
    %5 = tpu.matmul %1, %4, %cst {dimension_numbers = #tpu.dot_dimension_numbers<[1], [0], [0], [1], [0, 0, 1, 1], [], []>} : vector<416x64xf32>, vector<64x64xf32>, vector<416x64xf32> -> vector<416x64xf32>
    %c0_8 = arith.constant 0 : index
    %c0_9 = arith.constant 0 : index
    %6 = vector.load %arg5[%c0_8, %c0_9] : memref<1x64xf32, #tpu.memory_space<vmem>>, vector<1x64xf32>
    %7 = vector.broadcast %6 : vector<1x64xf32> to vector<416x64xf32>
    %8 = arith.addf %5, %7 : vector<416x64xf32>
    %c0_10 = arith.constant 0 : index
    %c0_11 = arith.constant 0 : index
    %9 = vector.load %arg6[%c0_10, %c0_11] : memref<64x64xf32, #tpu.memory_space<vmem>>, vector<64x64xf32>
    %cst_12 = arith.constant dense<0.000000e+00> : vector<2x64xf32>
    %10 = tpu.matmul %3, %9, %cst_12 {dimension_numbers = #tpu.dot_dimension_numbers<[1], [0], [0], [1], [0, 0, 1, 1], [], []>} : vector<2x64xf32>, vector<64x64xf32>, vector<2x64xf32> -> vector<2x64xf32>
    %c0_13 = arith.constant 0 : index
    %c0_14 = arith.constant 0 : index
    %11 = vector.load %arg7[%c0_13, %c0_14] : memref<1x64xf32, #tpu.memory_space<vmem>>, vector<1x64xf32>
    %12 = vector.broadcast %11 : vector<1x64xf32> to vector<2x64xf32>
    %13 = arith.addf %10, %12 : vector<2x64xf32>
    %cst_15 = arith.constant 0.000000e+00 : f32
    %14 = vector.broadcast %cst_15 : f32 to vector<2x64xf32>
    %15 = arith.maximumf %13, %14 : vector<2x64xf32>
    %c0_16 = arith.constant 0 : index
    %c0_17 = arith.constant 0 : index
    %16 = vector.load %arg8[%c0_16, %c0_17] : memref<64x64xf32, #tpu.memory_space<vmem>>, vector<64x64xf32>
    %cst_18 = arith.constant dense<0.000000e+00> : vector<2x64xf32>
    %17 = tpu.matmul %15, %16, %cst_18 {dimension_numbers = #tpu.dot_dimension_numbers<[1], [0], [0], [1], [0, 0, 1, 1], [], []>} : vector<2x64xf32>, vector<64x64xf32>, vector<2x64xf32> -> vector<2x64xf32>
    %c0_19 = arith.constant 0 : index
    %c0_20 = arith.constant 0 : index
    %18 = vector.load %arg9[%c0_19, %c0_20] : memref<1x64xf32, #tpu.memory_space<vmem>>, vector<1x64xf32>
    %19 = vector.broadcast %18 : vector<1x64xf32> to vector<2x64xf32>
    %20 = arith.addf %17, %19 : vector<2x64xf32>
    %c0_21 = arith.constant 0 : index
    %c0_22 = arith.constant 0 : index
    %21 = vector.load %arg10[%c0_21, %c0_22] : memref<64x64xf32, #tpu.memory_space<vmem>>, vector<64x64xf32>
    %cst_23 = arith.constant dense<0.000000e+00> : vector<2x64xf32>
    %22 = tpu.matmul %2, %21, %cst_23 {dimension_numbers = #tpu.dot_dimension_numbers<[1], [0], [0], [1], [0, 0, 1, 1], [], []>} : vector<2x64xf32>, vector<64x64xf32>, vector<2x64xf32> -> vector<2x64xf32>
    %c0_24 = arith.constant 0 : index
    %c0_25 = arith.constant 0 : index
    %23 = vector.load %arg11[%c0_24, %c0_25] : memref<1x64xf32, #tpu.memory_space<vmem>>, vector<1x64xf32>
    %24 = vector.broadcast %23 : vector<1x64xf32> to vector<2x64xf32>
    %25 = arith.addf %22, %24 : vector<2x64xf32>
    %26 = math.tanh %25 : vector<2x64xf32>
    %c0_26 = arith.constant 0 : index
    %c0_27 = arith.constant 0 : index
    %27 = vector.load %arg12[%c0_26, %c0_27] : memref<64x64xf32, #tpu.memory_space<vmem>>, vector<64x64xf32>
    %cst_28 = arith.constant dense<0.000000e+00> : vector<2x64xf32>
    %28 = tpu.matmul %26, %27, %cst_28 {dimension_numbers = #tpu.dot_dimension_numbers<[1], [0], [0], [1], [0, 0, 1, 1], [], []>} : vector<2x64xf32>, vector<64x64xf32>, vector<2x64xf32> -> vector<2x64xf32>
    %c0_29 = arith.constant 0 : index
    %c0_30 = arith.constant 0 : index
    %29 = vector.load %arg13[%c0_29, %c0_30] : memref<1x64xf32, #tpu.memory_space<vmem>>, vector<1x64xf32>
    %30 = vector.broadcast %29 : vector<1x64xf32> to vector<2x64xf32>
    %31 = arith.addf %28, %30 : vector<2x64xf32>
    %32 = vector.shape_cast %8 : vector<416x64xf32> to vector<2x208x64xf32>
    %33 = vector.shape_cast %31 : vector<2x64xf32> to vector<2x1x64xf32>
    %34 = vector.broadcast %33 : vector<2x1x64xf32> to vector<2x208x64xf32>
    %35 = arith.addf %32, %34 : vector<2x208x64xf32>
    %36 = math.tanh %35 : vector<2x208x64xf32>
    %37 = arith.addf %20, %31 : vector<2x64xf32>
    %38 = math.tanh %37 : vector<2x64xf32>
    %c0_31 = arith.constant 0 : index
    %c0_32 = arith.constant 0 : index
    %39 = vector.load %arg14[%c0_31, %c0_32] : memref<1x64xf32, #tpu.memory_space<vmem>>, vector<1x64xf32>
    %40 = vector.shape_cast %39 : vector<1x64xf32> to vector<1x1x64xf32>
    %41 = vector.broadcast %40 : vector<1x1x64xf32> to vector<2x208x64xf32>
    %42 = arith.mulf %36, %41 : vector<2x208x64xf32>
    %cst_33 = arith.constant dense<0.000000e+00> : vector<2x208xf32>
    %43 = vector.multi_reduction <add>, %42, %cst_33 [2] : vector<2x208x64xf32> to vector<2x208xf32>
    %c0_34 = arith.constant 0 : index
    %c0_35 = arith.constant 0 : index
    %44 = vector.load %arg15[%c0_34, %c0_35] : memref<1x1xf32, #tpu.memory_space<vmem>>, vector<1x1xf32>
    %45 = vector.broadcast %44 : vector<1x1xf32> to vector<2x208xf32>
    %46 = arith.addf %43, %45 : vector<2x208xf32>
    %47 = vector.broadcast %39 : vector<1x64xf32> to vector<2x64xf32>
    %48 = arith.mulf %38, %47 : vector<2x64xf32>
    %cst_36 = arith.constant dense<0.000000e+00> : vector<2xf32>
    %49 = vector.multi_reduction <add>, %48, %cst_36 [1] : vector<2x64xf32> to vector<2xf32>
    %50 = vector.shape_cast %49 : vector<2xf32> to vector<2x1xf32>
    %c0_37 = arith.constant 0 : index
    %c0_38 = arith.constant 0 : index
    %51 = vector.load %arg15[%c0_37, %c0_38] : memref<1x1xf32, #tpu.memory_space<vmem>>, vector<1x1xf32>
    %52 = vector.broadcast %51 : vector<1x1xf32> to vector<2x1xf32>
    %53 = arith.addf %50, %52 : vector<2x1xf32>
    %54 = tpu.iota {dimensions = array<i32: 1>} : vector<2x208xi32>
    %c196_i32 = arith.constant 196 : i32
    %55 = vector.broadcast %c196_i32 : i32 to vector<2x208xi32>
    %56 = arith.cmpi slt, %54, %55 : vector<2x208xi32>
    %cst_39 = arith.constant -1.000000e+30 : f32
    %57 = vector.broadcast %cst_39 : f32 to vector<2x208xf32>
    %58 = arith.select %56, %46, %57 : vector<2x208xi1>, vector<2x208xf32>
    %cst_40 = arith.constant dense<0xFF800000> : vector<2xf32>
    %59 = vector.multi_reduction <maximumf>, %58, %cst_40 [1] : vector<2x208xf32> to vector<2xf32>
    %60 = vector.shape_cast %59 : vector<2xf32> to vector<2x1xf32>
    %61 = arith.maximumf %60, %53 : vector<2x1xf32>
    %62 = vector.broadcast %61 : vector<2x1xf32> to vector<2x208xf32>
    %63 = arith.subf %58, %62 : vector<2x208xf32>
    %64 = math.exp %63 : vector<2x208xf32>
    %65 = arith.subf %53, %61 : vector<2x1xf32>
    %66 = math.exp %65 : vector<2x1xf32>
    %cst_41 = arith.constant dense<0.000000e+00> : vector<2xf32>
    %67 = vector.multi_reduction <add>, %64, %cst_41 [1] : vector<2x208xf32> to vector<2xf32>
    %68 = vector.shape_cast %67 : vector<2xf32> to vector<2x1xf32>
    %69 = arith.addf %66, %68 : vector<2x1xf32>
    %cst_42 = arith.constant 1.000000e+00 : f32
    %70 = vector.broadcast %cst_42 : f32 to vector<2x1xf32>
    %71 = arith.divf %70, %69 : vector<2x1xf32>
    %72 = vector.broadcast %71 : vector<2x1xf32> to vector<2x208xf32>
    %73 = arith.mulf %64, %72 : vector<2x208xf32>
    %74 = arith.mulf %66, %71 : vector<2x1xf32>
    %75 = vector.shape_cast %73 : vector<2x208xf32> to vector<2x1x208xf32>
    "tpu.trace_start"() <{level = 10 : i32, message = "bqn,bnr->bqr"}> : () -> ()
    %cst_43 = arith.constant dense<0.000000e+00> : vector<2x1x64xf32>
    %76 = tpu.matmul %75, %0, %cst_43 {dimension_numbers = #tpu.dot_dimension_numbers<[2], [1], [1], [2], [0, 0, 0, 1, 1, 2], [0], [0]>} : vector<2x1x208xf32>, vector<2x208x64xf32>, vector<2x1x64xf32> -> vector<2x1x64xf32>
    "tpu.trace_stop"() : () -> ()
    %77 = vector.shape_cast %76 : vector<2x1x64xf32> to vector<2x64xf32>
    %78 = vector.broadcast %74 : vector<2x1xf32> to vector<2x64xf32>
    %79 = arith.mulf %78, %15 : vector<2x64xf32>
    %80 = arith.addf %79, %77 : vector<2x64xf32>
    %81 = arith.addf %80, %26 : vector<2x64xf32>
    %c0_44 = arith.constant 0 : index
    %c0_45 = arith.constant 0 : index
    %82 = vector.load %arg16[%c0_44, %c0_45] : memref<64x64xf32, #tpu.memory_space<vmem>>, vector<64x64xf32>
    %cst_46 = arith.constant dense<0.000000e+00> : vector<2x64xf32>
    %83 = tpu.matmul %81, %82, %cst_46 {dimension_numbers = #tpu.dot_dimension_numbers<[1], [0], [0], [1], [0, 0, 1, 1], [], []>} : vector<2x64xf32>, vector<64x64xf32>, vector<2x64xf32> -> vector<2x64xf32>
    %c0_47 = arith.constant 0 : index
    %c0_48 = arith.constant 0 : index
    %84 = vector.load %arg17[%c0_47, %c0_48] : memref<1x64xf32, #tpu.memory_space<vmem>>, vector<1x64xf32>
    %85 = vector.broadcast %84 : vector<1x64xf32> to vector<2x64xf32>
    %86 = arith.addf %83, %85 : vector<2x64xf32>
    %87 = math.tanh %86 : vector<2x64xf32>
    %c0_49 = arith.constant 0 : index
    %c0_50 = arith.constant 0 : index
    %88 = vector.load %arg18[%c0_49, %c0_50] : memref<2x64xf32, #tpu.memory_space<vmem>>, vector<2x64xf32>
    tpu.vector_store %arg18[%c0_49, %c0_50], %87 {strides = array<i32>} : memref<2x64xf32, #tpu.memory_space<vmem>>, vector<2x64xf32>,
    return
  }
  func.func @transform_0(%arg0: i32) -> (i32, i32) {
    %c0_i32 = arith.constant 0 : i32
    %c0_i32_0 = arith.constant 0 : i32
    return %arg0, %c0_i32 : i32, i32
  }
  func.func @transform_1(%arg0: i32) -> (i32, i32) {
    %c0_i32 = arith.constant 0 : i32
    %c0_i32_0 = arith.constant 0 : i32
    return %arg0, %c0_i32 : i32, i32
  }
  func.func @transform_2(%arg0: i32) -> (i32, i32, i32) {
    %c0_i32 = arith.constant 0 : i32
    %c0_i32_0 = arith.constant 0 : i32
    %c0_i32_1 = arith.constant 0 : i32
    return %arg0, %c0_i32, %c0_i32_0 : i32, i32, i32
  }
  func.func @transform_3(%arg0: i32) -> (i32, i32) {
    %c0_i32 = arith.constant 0 : i32
    %c0_i32_0 = arith.constant 0 : i32
    %c0_i32_1 = arith.constant 0 : i32
    return %c0_i32, %c0_i32_0 : i32, i32
  }
  func.func @transform_4(%arg0: i32) -> (i32, i32) {
    %c0_i32 = arith.constant 0 : i32
    %c0_i32_0 = arith.constant 0 : i32
    %c0_i32_1 = arith.constant 0 : i32
    return %c0_i32, %c0_i32_0 : i32, i32
  }
  func.func @transform_5(%arg0: i32) -> (i32, i32) {
    %c0_i32 = arith.constant 0 : i32
    %c0_i32_0 = arith.constant 0 : i32
    %c0_i32_1 = arith.constant 0 : i32
    return %c0_i32, %c0_i32_0 : i32, i32
  }
  func.func @transform_6(%arg0: i32) -> (i32, i32) {
    %c0_i32 = arith.constant 0 : i32
    %c0_i32_0 = arith.constant 0 : i32
    %c0_i32_1 = arith.constant 0 : i32
    return %c0_i32, %c0_i32_0 : i32, i32
  }
  func.func @transform_7(%arg0: i32) -> (i32, i32) {
    %c0_i32 = arith.constant 0 : i32
    %c0_i32_0 = arith.constant 0 : i32
    %c0_i32_1 = arith.constant 0 : i32
    return %c0_i32, %c0_i32_0 : i32, i32
  }
  func.func @transform_8(%arg0: i32) -> (i32, i32) {
    %c0_i32 = arith.constant 0 : i32
    %c0_i32_0 = arith.constant 0 : i32
    %c0_i32_1 = arith.constant 0 : i32
    return %c0_i32, %c0_i32_0 : i32, i32
  }
  func.func @transform_9(%arg0: i32) -> (i32, i32) {
    %c0_i32 = arith.constant 0 : i32
    %c0_i32_0 = arith.constant 0 : i32
    %c0_i32_1 = arith.constant 0 : i32
    return %c0_i32, %c0_i32_0 : i32, i32
  }
  func.func @transform_10(%arg0: i32) -> (i32, i32) {
    %c0_i32 = arith.constant 0 : i32
    %c0_i32_0 = arith.constant 0 : i32
    %c0_i32_1 = arith.constant 0 : i32
    return %c0_i32, %c0_i32_0 : i32, i32
  }
  func.func @transform_11(%arg0: i32) -> (i32, i32) {
    %c0_i32 = arith.constant 0 : i32
    %c0_i32_0 = arith.constant 0 : i32
    %c0_i32_1 = arith.constant 0 : i32
    return %c0_i32, %c0_i32_0 : i32, i32
  }
  func.func @transform_12(%arg0: i32) -> (i32, i32) {
    %c0_i32 = arith.constant 0 : i32
    %c0_i32_0 = arith.constant 0 : i32
    %c0_i32_1 = arith.constant 0 : i32
    return %c0_i32, %c0_i32_0 : i32, i32
  }
  func.func @transform_13(%arg0: i32) -> (i32, i32) {
    %c0_i32 = arith.constant 0 : i32
    %c0_i32_0 = arith.constant 0 : i32
    %c0_i32_1 = arith.constant 0 : i32
    return %c0_i32, %c0_i32_0 : i32, i32
  }
  func.func @transform_14(%arg0: i32) -> (i32, i32) {
    %c0_i32 = arith.constant 0 : i32
    %c0_i32_0 = arith.constant 0 : i32
    %c0_i32_1 = arith.constant 0 : i32
    return %c0_i32, %c0_i32_0 : i32, i32
  }
  func.func @transform_15(%arg0: i32) -> (i32, i32) {
    %c0_i32 = arith.constant 0 : i32
    %c0_i32_0 = arith.constant 0 : i32
    %c0_i32_1 = arith.constant 0 : i32
    return %c0_i32, %c0_i32_0 : i32, i32
  }
  func.func @transform_16(%arg0: i32) -> (i32, i32) {
    %c0_i32 = arith.constant 0 : i32
    %c0_i32_0 = arith.constant 0 : i32
    %c0_i32_1 = arith.constant 0 : i32
    return %c0_i32, %c0_i32_0 : i32, i32
  }
  func.func @transform_17(%arg0: i32) -> (i32, i32) {
    %c0_i32 = arith.constant 0 : i32
    %c0_i32_0 = arith.constant 0 : i32
    return %arg0, %c0_i32 : i32, i32
  }
}

</mosaic_0001>

<bundles_post_ra>
// kernel: tpu_custom_call.1
= control target key start
LH: loop header
LB: loop body
LE: loop exit
PB: predicated region body
PF: predicated region fallthrough
CT: control target
= control target key end

     0   :  { %s4021_s0 = inlined_call_operand.vmem [shape: f32[2,64], index: 0, kind: input, shape index: {}]   ;;  %s4022_s1 = inlined_call_operand.vmem [shape: f32[2,64], index: 1, kind: input, shape index: {}]   ;;  %s4023_s2 = inlined_call_operand.vmem [shape: f32[2,208,64], index: 2, kind: input, shape index: {}]   ;;  %s4024_s3 = inlined_call_operand.vmem [shape: f32[64,64], index: 3, kind: input, shape index: {}]   ;;  %s4025_s4 = inlined_call_operand.vmem [shape: f32[1,64], index: 4, kind: input, shape index: {}]   ;;  %s4026_s5 = inlined_call_operand.vmem [shape: f32[64,64], index: 5, kind: input, shape index: {}]   ;;  %s4027_s6 = inlined_call_operand.vmem [shape: f32[1,64], index: 6, kind: input, shape index: {}]   ;;  %s4028_s7 = inlined_call_operand.vmem [shape: f32[64,64], index: 7, kind: input, shape index: {}]   ;;  %s4029_s8 = inlined_call_operand.vmem [shape: f32[1,64], index: 8, kind: input, shape index: {}]   ;;  %s4030_s9 = inlined_call_operand.vmem [shape: f32[64,64], index: 9, kind: input, shape index: {}]   ;;  %s4031_s10 = inlined_call_operand.vmem [shape: f32[1,64], index: 10, kind: input, shape index: {}]   ;;  %s4032_s11 = inlined_call_operand.vmem [shape: f32[64,64], index: 11, kind: input, shape index: {}]   ;;  %s4033_s12 = inlined_call_operand.vmem [shape: f32[1,64], index: 12, kind: input, shape index: {}]   ;;  %s4034_s13 = inlined_call_operand.vmem [shape: f32[1,64], index: 13, kind: input, shape index: {}]   ;;  %s4035_s14 = inlined_call_operand.<no memory space> [shape: f32[1,1], index: 14, kind: input, shape index: {}]   ;;  %s4036_s15 = inlined_call_operand.vmem [shape: f32[64,64], index: 15, kind: input, shape index: {}]   ;;  %s4037_s16 = inlined_call_operand.vmem [shape: f32[1,64], index: 16, kind: input, shape index: {}]   ;;  %s4038_s17 = inlined_call_operand.hbm [shape: f32[2,64], index: 17, kind: output, shape index: {}]  }
   0x1   :  { %4045 = sst [smem:[#allocation11_spill]] %s4021_s0  ;;  %v22_v0 = vstv %s4035_s14 }
   0x2   :  { %4046 = sst [smem:[#allocation12_spill]] %s4022_s1  ;;  %23 = vst [vmem:[#allocation2] sm:$0x1] %v22_v0 }
   0x3   :  { %v617_v1 = vld [vmem:[%s4026_s5 + $0x38] sm:$0xff]  ;;  %v4040_v2 = vmov 0.0   ;;  %v616_v3 = vld [vmem:[%s4026_s5 + $0x30] sm:$0xff]  ;;  %vm2590_vm0 = vmmov 0   ;;  %v615_v4 = vld [vmem:[%s4026_s5 + $0x28] sm:$0xff] }
   0x4   :  { %2346 = vmatprep.subr.mxu1 %v4040_v2  ;;  %2362 = vmatprep.mubr.msk.f32.mxu1 %vm2590_vm0, %v4040_v2  ;;  %v614_v5 = vld [vmem:[%s4026_s5 + $0x20] sm:$0xff] }
   0x5   :  { %2347 = vmatpush3.msra.mxu1 %v617_v1 }
   0x6   :  { %2348 = vmatprep.subr.mxu1 %v4040_v2 }
   0x7   :  { %2349 = vmatpush3.msra.mxu1 %v616_v3 }
   0x8   :  { %2350 = vmatprep.subr.mxu1 %v4040_v2 }
   0x9   :  { %24 = vsyncpa [#allocation4], 0  ;;  %2351 = vmatpush3.msra.mxu1 %v615_v4  ;;  %v613_v6 = vld [vmem:[%s4026_s5 + $0x18] sm:$0xff]  ;;  %v612_v7 = vld [vmem:[%s4026_s5 + $0x10] sm:$0xff]  ;;  %s4047_s28 = sld [smem:[#allocation12_spill]]  ;;  %vm128_vm1 = vcmask 523264  }
   0xa   :  { %2352 = vmatprep.subr.mxu1 %v4040_v2  ;;  %v611_v8 = vld [vmem:[%s4026_s5 + $0x8] sm:$0xff]  ;;  %v610_v9 = vld [vmem:[%s4026_s5] sm:$0xff]  ;;  %v706_v11 = vld [vmem:[%s4028_s7 + $0x38] sm:$0xff]  ;;  %s4049_s30 = sld [smem:[#allocation11_spill]]  ;;  %vm1381_vm2 = vcmask 517120   ;;  %vm1453_vm3 = vcmask 130112  }
   0xb   :  { %2353 = vmatpush3.msra.mxu1 %v614_v5  ;;  %v705_v12 = vld [vmem:[%s4028_s7 + $0x30] sm:$0xff]  ;;  %v704_v13 = vld [vmem:[%s4028_s7 + $0x28] sm:$0xff]  ;;  %v703_v14 = vld [vmem:[%s4028_s7 + $0x20] sm:$0xff]  ;;  %vm1460_vm4 = vcmask 195712   ;;  %vm1467_vm5 = vcmask 261312   ;;  %vm1474_vm6 = vcmask 326912  }
   0xc   :  { %2354 = vmatprep.subr.mxu1 %v4040_v2  ;;  %v702_v15 = vld [vmem:[%s4028_s7 + $0x18] sm:$0xff]  ;;  %v701_v16 = vld [vmem:[%s4028_s7 + $0x10] sm:$0xff]  ;;  %v700_v17 = vld [vmem:[%s4028_s7 + $0x8] sm:$0xff]  ;;  %vm1481_vm7 = vcmask 392512   ;;  %vm1488_vm8 = vcmask 458112   ;;  %vm1495_vm9 = vcmask 523712  }
   0xd   :  { %2355 = vmatpush3.msra.mxu1 %v613_v6  ;;  %v699_v18 = vld [vmem:[%s4028_s7] sm:$0xff]  ;;  %v120_v19 = vld [vmem:[%s4024_s3 + $0x38] sm:$0xff]  ;;  %v119_v20 = vld [vmem:[%s4024_s3 + $0x30] sm:$0xff]  ;;  %vm1502_vm10 = vcmask 589312   ;;  %vm1509_vm11 = vcmask 654912   ;;  %vm1516_vm12 = vcmask 720512  }
   0xe   :  { %2356 = vmatprep.subr.mxu1 %v4040_v2  ;;  %2252 = vmatprep.subr.mxu0 %v120_v19  ;;  %v118_v21 = vld [vmem:[%s4024_s3 + $0x28] sm:$0xff]  ;;  %v2772_v22 = vld [vmem:[%s4023_s2] sm:$0xff]  ;;  %v116_v24 = vld [vmem:[%s4024_s3 + $0x18] sm:$0xff]  ;;  %vm1523_vm13 = vcmask 786112   ;;  %vm1530_vm14 = vcmask 851712   ;;  %vm1537_vm15 = vcmask 917312  }
   0xf   :  { %2357 = vmatpush3.msra.mxu1 %v612_v7  ;;  %v112_v10 = vld [vmem:[%s4047_s28] sm:$0x3]  ;;  %2253 = vmatpush3.msra.mxu0 %v120_v19  ;;  %v115_v25 = vld [vmem:[%s4024_s3 + $0x10] sm:$0xff]  ;;  %v114_v26 = vld [vmem:[%s4024_s3 + $0x8] sm:$0xff]  ;;  %s2593_s25 = smov [#allocation3]  }
  0x10   :  { %2358 = vmatprep.subr.mxu1 %v4040_v2  ;;  %2254 = vmatprep.subr.mxu0 %v119_v20  ;;  %v117_v23 = vld [vmem:[%s4024_s3 + $0x20] sm:$0xff]  ;;  %v2794_v28 = vld [vmem:[%s4023_s2 + $0x8] sm:$0xff]  ;;  %v2799_v29 = vld [vmem:[%s4023_s2 + $0x10] sm:$0xff] }
  0x11   :  { %2359 = vmatpush3.msra.mxu1 %v611_v8  ;;  %2268 = vmatprep.mubr.msk.f32.mxu0 %vm128_vm1, %v2772_v22  ;;  %v113_v27 = vld [vmem:[%s4024_s3] sm:$0xff]  ;;  %v2809_v30 = vld [vmem:[%s4023_s2 + $0x18] sm:$0xff]  ;;  %v2823_v32 = vld [vmem:[%s4023_s2 + $0x28] sm:$0xff] }
  0x12   :  { %2360 = vmatprep.subr.mxu1 %v4040_v2  ;;  %2255 = vmatpush3.msra.mxu0 %v119_v20  ;;  %v2814_v31 = vld [vmem:[%s4023_s2 + $0x20] sm:$0xff]  ;;  %v2828_v33 = vld [vmem:[%s4023_s2 + $0x30] sm:$0xff]  ;;  %v2837_v34 = vld [vmem:[%s4023_s2 + $0x38] sm:$0xff] }
  0x13   :  { %2361 = vmatpush3.msra.mxu1 %v610_v9  ;;  %2256 = vmatprep.subr.mxu0 %v118_v21  ;;  %v2842_v35 = vld [vmem:[%s4023_s2 + $0x40] sm:$0xff]  ;;  %v2851_v36 = vld [vmem:[%s4023_s2 + $0x48] sm:$0xff]  ;;  %v2856_v37 = vld [vmem:[%s4023_s2 + $0x50] sm:$0xff] }
  0x14   :  { %2363 = vmatmul.mubr.msk.f32.vlgmr.msra.gmra.mxu1 %vm128_vm1, %v112_v10  ;;  %2365 = vmatprep.subr.mxu1 %v4040_v2  ;;  %v2865_v38 = vld [vmem:[%s4023_s2 + $0x58] sm:$0xff]  ;;  %v2870_v39 = vld [vmem:[%s4023_s2 + $0x60] sm:$0xff]  ;;  %v2879_v40 = vld [vmem:[%s4023_s2 + $0x68] sm:$0xff] }
  0x15   :  { %2366 = vmatpush3.msra.mxu1 %v706_v11  ;;  %2381 = vmatprep.mubr.msk.f32.mxu1 %vm2590_vm0, %v4040_v2  ;;  %v2884_v41 = vld [vmem:[%s4023_s2 + $0x70] sm:$0xff]  ;;  %v2893_v42 = vld [vmem:[%s4023_s2 + $0x78] sm:$0xff]  ;;  %v2898_v43 = vld [vmem:[%s4023_s2 + $0x80] sm:$0xff] }
  0x16   :  { %2367 = vmatprep.subr.mxu1 %v4040_v2  ;;  %2257 = vmatpush3.msra.mxu0 %v118_v21  ;;  %v2907_v44 = vld [vmem:[%s4023_s2 + $0x88] sm:$0xff]  ;;  %v2912_v45 = vld [vmem:[%s4023_s2 + $0x90] sm:$0xff]  ;;  %v2921_v46 = vld [vmem:[%s4023_s2 + $0x98] sm:$0xff] }
  0x17   :  { %2368 = vmatpush3.msra.mxu1 %v705_v12  ;;  %2258 = vmatprep.subr.mxu0 %v117_v23  ;;  %v2926_v47 = vld [vmem:[%s4023_s2 + $0xa0] sm:$0xff]  ;;  %v2935_v48 = vld [vmem:[%s4023_s2 + $0xa8] sm:$0xff]  ;;  %v2940_v49 = vld [vmem:[%s4023_s2 + $0xb0] sm:$0xff] }
  0x18   :  { %2369 = vmatprep.subr.mxu1 %v4040_v2  ;;  %2259 = vmatpush3.msra.mxu0 %v117_v23  ;;  %v2949_v50 = vld [vmem:[%s4023_s2 + $0xb8] sm:$0xff]  ;;  %v2954_v51 = vld [vmem:[%s4023_s2 + $0xc0] sm:$0xff]  ;;  %v2963_v52 = vld [vmem:[%s4023_s2 + $0xc8] sm:$0xff] }
  0x19   :  { %2370 = vmatpush3.msra.mxu1 %v704_v13  ;;  %2260 = vmatprep.subr.mxu0 %v116_v24  ;;  %v2968_v53 = vld [vmem:[%s4023_s2 + $0xd0] sm:$0xff]  ;;  %v2977_v54 = vld [vmem:[%s4023_s2 + $0xd8] sm:$0xff]  ;;  %v2982_v55 = vld [vmem:[%s4023_s2 + $0xe0] sm:$0xff] }
  0x1a   :  { %2371 = vmatprep.subr.mxu1 %v4040_v2  ;;  %2261 = vmatpush3.msra.mxu0 %v116_v24  ;;  %v2991_v56 = vld [vmem:[%s4023_s2 + $0xe8] sm:$0xff]  ;;  %v2996_v57 = vld [vmem:[%s4023_s2 + $0xf0] sm:$0xff]  ;;  %v3005_v58 = vld [vmem:[%s4023_s2 + $0xf8] sm:$0xff] }
  0x1b   :  { %2372 = vmatpush3.msra.mxu1 %v703_v14  ;;  %2262 = vmatprep.subr.mxu0 %v115_v25  ;;  %v2133_v59 = vld [vmem:[%s4027_s6] ss:$0 sm:$0xff]  ;;  %v794_v0 = vld [vmem:[%s4030_s9 + $0x38] sm:$0xff]  ;;  %v793_v1 = vld [vmem:[%s4030_s9 + $0x30] sm:$0xff] }
  0x1c   :  { %2373 = vmatprep.subr.mxu1 %v4040_v2  ;;  %2263 = vmatpush3.msra.mxu0 %v115_v25  ;;  %v792_v3 = vld [vmem:[%s4030_s9 + $0x28] sm:$0xff]  ;;  %v791_v4 = vld [vmem:[%s4030_s9 + $0x20] sm:$0xff]  ;;  %v790_v5 = vld [vmem:[%s4030_s9 + $0x18] sm:$0xff] }
  0x1d   :  { %2374 = vmatpush3.msra.mxu1 %v702_v15  ;;  %2264 = vmatprep.subr.mxu0 %v114_v26  ;;  %v789_v6 = vld [vmem:[%s4030_s9 + $0x10] sm:$0xff]  ;;  %v788_v7 = vld [vmem:[%s4030_s9 + $0x8] sm:$0xff]  ;;  %v787_v8 = vld [vmem:[%s4030_s9] sm:$0xff] }
  0x1e   :  { %2375 = vmatprep.subr.mxu1 %v4040_v2  ;;  %2265 = vmatpush3.msra.mxu0 %v114_v26  ;;  %v111_v9 = vld [vmem:[%s4049_s30] sm:$0x3]  ;;  %v3066_v11 = vld [vmem:[%s4023_s2 + $0x108] sm:$0xff]  ;;  %v3073_v12 = vld [vmem:[%s4023_s2 + $0x110] sm:$0xff] }
  0x1f   :  { %2376 = vmatpush3.msra.mxu1 %v701_v16  ;;  %2266 = vmatprep.subr.mxu0 %v113_v27  ;;  %v3061_v10 = vld [vmem:[%s4023_s2 + $0x100] sm:$0xff]  ;;  %v3082_v13 = vld [vmem:[%s4023_s2 + $0x118] sm:$0xff]  ;;  %v96_v15 = vld [vmem:[%s4023_s2 + $0x128] sm:$0xff] }
  0x20   :  { %2377 = vmatprep.subr.mxu1 %v4040_v2  ;;  %2267 = vmatpush3.msra.mxu0 %v113_v27  ;;  %v3087_v14 = vld [vmem:[%s4023_s2 + $0x120] sm:$0xff]  ;;  %v97_v16 = vld [vmem:[%s4023_s2 + $0x130] sm:$0xff]  ;;  %v883_v19 = vld [vmem:[%s4032_s11 + $0x38] sm:$0xff] }
  0x21   :  { %2378 = vmatpush3.msra.mxu1 %v700_v17  ;;  %2269 = vmatmul.mubr.msk.f32.vlgmr.msra.gmra.mxu0 %vm128_vm1, %v2794_v28  ;;  %v98_v17 = vld [vmem:[%s4023_s2 + $0x138] sm:$0xff]  ;;  %v100_v20 = vld [vmem:[%s4023_s2 + $0x148] sm:$0xff]  ;;  %v882_v21 = vld [vmem:[%s4032_s11 + $0x30] sm:$0xff] }
  0x22   :  { %2379 = vmatprep.subr.mxu1 %v4040_v2  ;;  %1893 = vmatprep.subr.mxu0 %v4040_v2  ;;  %v3123_v23 = vld [vmem:[%s4023_s2 + $0x150] sm:$0xff]  ;;  %v881_v24 = vld [vmem:[%s4032_s11 + $0x28] sm:$0xff]  ;;  %v3133_v25 = vld [vmem:[%s4023_s2 + $0x158] sm:$0xff] }
  0x23   :  { %2380 = vmatpush3.msra.mxu1 %v699_v18  ;;  %2271 = vmatprep.mubr.msk.f32.mxu0 %vm128_vm1, %v2799_v29  ;;  %v99_v18 = vld [vmem:[%s4023_s2 + $0x140] sm:$0xff] }
  0x24   :  { %2384 = vmatprep.subr.mxu1 %v4040_v2  ;;  %v880_v26 = vld [vmem:[%s4032_s11 + $0x20] sm:$0xff]  ;;  %1894 = vmatpush1.msra.mxu0 %v100_v20 }
  0x25   :  { %2272 = vmatmul.mubr.msk.f32.gmra.mxu0 %vm128_vm1, %v2809_v30  ;;  %v3142_v27 = vld [vmem:[%s4023_s2 + $0x160] sm:$0xff]  ;;  %1895 = vmatprep.subr.mxu0 %v4040_v2 }
  0x26   :  { %2274 = vmatprep.mubr.msk.f32.mxu0 %vm128_vm1, %v2814_v31  ;;  %1896 = vmatpush1.msra.mxu0 %v99_v18 }
  0x27   :  { %1897 = vmatprep.subr.mxu0 %v4040_v2 }
  0x28   :  { %1898 = vmatpush1.msra.mxu0 %v98_v17 }
  0x29   :  { %2275 = vmatmul.mubr.msk.f32.gmra.mxu0 %vm128_vm1, %v2823_v32  ;;  %1899 = vmatprep.subr.mxu0 %v4040_v2 }
  0x2a   :  { %2277 = vmatprep.mubr.msk.f32.mxu0 %vm128_vm1, %v2828_v33  ;;  %1900 = vmatpush1.msra.mxu0 %v97_v16 }
  0x2b   :  { %1901 = vmatprep.subr.mxu0 %v4040_v2 }
  0x2c   :  { %1902 = vmatpush1.msra.mxu0 %v96_v15 }
  0x2d   :  { %2278 = vmatmul.mubr.msk.f32.gmra.mxu0 %vm128_vm1, %v2837_v34  ;;  %1903 = vmatprep.subr.mxu0 %v4040_v2 }
  0x2e   :  { %2280 = vmatprep.mubr.msk.f32.mxu0 %vm128_vm1, %v2842_v35  ;;  %1904 = vmatpush1.msra.mxu0 %v3087_v14 }
  0x2f   :  { %1905 = vmatprep.subr.mxu0 %v4040_v2 }
  0x30   :  { %1906 = vmatpush1.msra.mxu0 %v3082_v13 }
  0x31   :  { %2281 = vmatmul.mubr.msk.f32.gmra.mxu0 %vm128_vm1, %v2851_v36  ;;  %1907 = vmatprep.subr.mxu0 %v4040_v2 }
  0x32   :  { %2283 = vmatprep.mubr.msk.f32.mxu0 %vm128_vm1, %v2856_v37  ;;  %1908 = vmatpush1.msra.mxu0 %v3073_v12 }
  0x33   :  { %1909 = vmatprep.subr.mxu0 %v4040_v2 }
  0x34   :  { %1910 = vmatpush1.msra.mxu0 %v3066_v11 }
  0x35   :  { %2284 = vmatmul.mubr.msk.f32.gmra.mxu0 %vm128_vm1, %v2865_v38  ;;  %1911 = vmatprep.subr.mxu0 %v4040_v2 }
  0x36   :  { %2286 = vmatprep.mubr.msk.f32.mxu0 %vm128_vm1, %v2870_v39  ;;  %1912 = vmatpush1.msra.mxu0 %v3061_v10 }
  0x37   :  { %1913 = vmatprep.subr.mxu0 %v4040_v2 }
  0x38   :  { %1914 = vmatpush1.msra.mxu0 %v3005_v58 }
  0x39   :  { %2287 = vmatmul.mubr.msk.f32.gmra.mxu0 %vm128_vm1, %v2879_v40  ;;  %1915 = vmatprep.subr.mxu0 %v4040_v2 }
  0x3a   :  { %2289 = vmatprep.mubr.msk.f32.mxu0 %vm128_vm1, %v2884_v41  ;;  %1916 = vmatpush1.msra.mxu0 %v2996_v57 }
  0x3b   :  { %1917 = vmatprep.subr.mxu0 %v4040_v2 }
  0x3c   :  { %1918 = vmatpush1.msra.mxu0 %v2991_v56 }
  0x3d   :  { %2290 = vmatmul.mubr.msk.f32.gmra.mxu0 %vm128_vm1, %v2893_v42  ;;  %1919 = vmatprep.subr.mxu0 %v4040_v2 }
  0x3e   :  { %2292 = vmatprep.mubr.msk.f32.mxu0 %vm128_vm1, %v2898_v43  ;;  %1920 = vmatpush1.msra.mxu0 %v2982_v55 }
  0x3f   :  { %1921 = vmatprep.subr.mxu0 %v4040_v2 }
  0x40   :  { %1922 = vmatpush1.msra.mxu0 %v2977_v54 }
  0x41   :  { %2293 = vmatmul.mubr.msk.f32.gmra.mxu0 %vm128_vm1, %v2907_v44  ;;  %1923 = vmatprep.subr.mxu0 %v4040_v2 }
  0x42   :  { %2295 = vmatprep.mubr.msk.f32.mxu0 %vm128_vm1, %v2912_v45  ;;  %1924 = vmatpush1.msra.mxu0 %v2968_v53 }
  0x43   :  { %1937 = vmatprep.subr.mxu0 %v4040_v2 }
  0x45   :  { %2296 = vmatmul.mubr.msk.f32.gmra.mxu0 %vm128_vm1, %v2921_v46 }
  0x46   :  { %2298 = vmatprep.mubr.msk.f32.mxu0 %vm128_vm1, %v2926_v47 }
  0x49   :  { %2299 = vmatmul.mubr.msk.f32.gmra.mxu0 %vm128_vm1, %v2935_v48 }
  0x4a   :  { %2301 = vmatprep.mubr.msk.f32.mxu0 %vm128_vm1, %v2940_v49 }
  0x4d   :  { %2302 = vmatmul.mubr.msk.f32.gmra.mxu0 %vm128_vm1, %v2949_v50 }
  0x4e   :  { %2304 = vmatprep.mubr.msk.f32.mxu0 %vm128_vm1, %v2954_v51 }
  0x51   :  { %2305 = vmatmul.mubr.msk.f32.gmra.mxu0 %vm128_vm1, %v2963_v52 }
  0x52   :  { %2307 = vmatprep.mubr.msk.f32.mxu0 %vm128_vm1, %v2968_v53  ;;  %v2591_v53 = vmov 0  }
  0x53   :  { %2446 = vset.pattern.permute.xlu0 %v2591_v53  ;;  %2447 = vset.pattern.permute.xlu1 %v2591_v53 }
  0x55   :  { %2308 = vmatmul.mubr.msk.f32.gmra.mxu0 %vm128_vm1, %v2977_v54  ;;  %v2142_v54 = vld [vmem:[#allocation2] ss:$0 sm:$0xff] }
  0x56   :  { %2310 = vmatprep.mubr.msk.f32.mxu0 %vm128_vm1, %v2982_v55  ;;  %1325 = vperm.xlu0 %2446, %v2142_v54  }
  0x59   :  { %2311 = vmatmul.mubr.msk.f32.gmra.mxu0 %vm128_vm1, %v2991_v56 }
  0x5a   :  { %2313 = vmatprep.mubr.msk.f32.mxu0 %vm128_vm1, %v2996_v57  ;;  %v2137_v57 = vld [vmem:[%s4031_s10] ss:$0 sm:$0xff] }
  0x5d   :  { %2314 = vmatmul.mubr.msk.f32.gmra.mxu0 %vm128_vm1, %v3005_v58 }
  0x5e   :  { %2316 = vmatprep.mubr.msk.f32.mxu0 %vm128_vm1, %v3061_v10 }
  0x61   :  { %2317 = vmatmul.mubr.msk.f32.gmra.mxu0 %vm128_vm1, %v3066_v11 }
  0x62   :  { %2319 = vmatprep.mubr.msk.f32.mxu0 %vm128_vm1, %v3073_v12 }
  0x65   :  { %2320 = vmatmul.mubr.msk.f32.gmra.mxu0 %vm128_vm1, %v3082_v13 }
  0x66   :  { %2322 = vmatprep.mubr.msk.f32.mxu0 %vm128_vm1, %v3087_v14 }
  0x69   :  { %2323 = vmatmul.mubr.msk.f32.gmra.mxu0 %vm128_vm1, %v96_v15 }
  0x6a   :  { %2325 = vmatprep.mubr.msk.f32.mxu0 %vm128_vm1, %v97_v16 }
  0x6d   :  { %2326 = vmatmul.mubr.msk.f32.gmra.mxu0 %vm128_vm1, %v98_v17 }
  0x6e   :  { %2328 = vmatprep.mubr.msk.f32.mxu0 %vm128_vm1, %v99_v18 }
  0x71   :  { %2329 = vmatmul.mubr.msk.f32.gmra.mxu0 %vm128_vm1, %v100_v20 }
  0x72   :  { %2331 = vmatprep.mubr.msk.f32.mxu0 %vm128_vm1, %v3123_v23 }
  0x75   :  { %2332 = vmatmul.mubr.msk.f32.gmra.mxu0 %vm128_vm1, %v3133_v25 }
  0x76   :  { %2334 = vmatprep.mubr.msk.f32.mxu0 %vm128_vm1, %v3142_v27 }
  0xd4   :  { %v694_v60 = vpop.f32.mrf.mxu1 }
  0xd5   :  { %v3012_v61 = vadd.f32 %v2133_v59, %v694_v60  ;;  %v879_v59 = vld [vmem:[%s4032_s11 + $0x18] sm:$0xff]  ;;  %v3156_v60 = vld [vmem:[%s4023_s2 + $0x168] sm:$0xff] }
  0xd6   :  { %v2364_v62 = vpop.f32.mrf.mxu1  ;;  %2335 = vmatmul.mubr.msk.f32.gmra.mxu0 %vm128_vm1, %v3156_v60 }
  0xd7   :  { %4048 = vst [vmem:[#allocation6_spill] sm:$0xff] %v3012_v61  ;;  %v4039_v63 = vmax.f32 %v3012_v61, 0.0  ;;  %v878_v62 = vld [vmem:[%s4032_s11 + $0x10] sm:$0xff] }
  0xd9   :  { %2382 = vmatmul.mubr.msk.f32.vlgmr.msra.gmra.mxu1 %vm128_vm1, %v4039_v63 }
  0xda   :  { %2385 = vmatpush3.msra.mxu1 %v794_v0  ;;  %2400 = vmatprep.mubr.msk.f32.mxu1 %vm2590_vm0, %v4040_v2  ;;  %v105_v0 = vld [vmem:[%s4023_s2 + $0x170] sm:$0xff] }
  0xdb   :  { %2386 = vmatprep.subr.mxu1 %v4040_v2  ;;  %2337 = vmatprep.mubr.msk.f32.mxu0 %vm128_vm1, %v105_v0 }
  0xdc   :  { %2387 = vmatpush3.msra.mxu1 %v793_v1  ;;  %v877_v1 = vld [vmem:[%s4032_s11 + $0x8] sm:$0xff] }
  0xdd   :  { %2388 = vmatprep.subr.mxu1 %v4040_v2 }
  0xde   :  { %2389 = vmatpush3.msra.mxu1 %v792_v3  ;;  %v106_v3 = vld [vmem:[%s4023_s2 + $0x178] sm:$0xff] }
  0xdf   :  { %2390 = vmatprep.subr.mxu1 %v4040_v2  ;;  %2338 = vmatmul.mubr.msk.f32.gmra.mxu0 %vm128_vm1, %v106_v3 }
  0xe0   :  { %2391 = vmatpush3.msra.mxu1 %v791_v4  ;;  %v876_v4 = vld [vmem:[%s4032_s11] sm:$0xff] }
  0xe1   :  { %2392 = vmatprep.subr.mxu1 %v4040_v2  ;;  %v3242_v11 = vpop.f32.mrf.mxu0 }
  0xe2   :  { %2393 = vmatpush3.msra.mxu1 %v790_v5  ;;  %v107_v5 = vld [vmem:[%s4023_s2 + $0x180] sm:$0xff] }
  0xe3   :  { %2394 = vmatprep.subr.mxu1 %v4040_v2  ;;  %2340 = vmatprep.mubr.msk.f32.mxu0 %vm128_vm1, %v107_v5  ;;  %v3244_v12 = vpop.f32.mrf.mxu0 }
  0xe4   :  { %2395 = vmatpush3.msra.mxu1 %v789_v6  ;;  %v108_v6 = vld [vmem:[%s4023_s2 + $0x188] sm:$0xff] }
  0xe5   :  { %2396 = vmatprep.subr.mxu1 %v4040_v2  ;;  %2341 = vmatmul.mubr.msk.f32.gmra.mxu0 %vm128_vm1, %v108_v6  ;;  %v3250_v14 = vpop.f32.mrf.mxu0 }
  0xe6   :  { %2397 = vmatpush3.msra.mxu1 %v788_v7  ;;  %v109_v7 = vld [vmem:[%s4023_s2 + $0x190] sm:$0xff] }
  0xe7   :  { %2398 = vmatprep.subr.mxu1 %v4040_v2  ;;  %2343 = vmatprep.mubr.msk.f32.mxu0 %vm128_vm1, %v109_v7  ;;  %v3256_v15 = vpop.f32.mrf.mxu0 }
  0xe8   :  { %2399 = vmatpush3.msra.mxu1 %v787_v8  ;;  %v110_v8 = vld [vmem:[%s4023_s2 + $0x198] sm:$0xff]  ;;  %s2072_s2 = sshll.u32 %s2593_s25, 4  ;;  %s2073_s2 = int_to_ptr.vmem [resolvable:$true] %s2072_s2 }
  0xe9   :  { %2401 = vmatmul.mubr.msk.f32.vlgmr.msra.gmra.mxu1 %vm128_vm1, %v111_v9  ;;  %2403 = vmatprep.subr.mxu1 %v4040_v2  ;;  %v3262_v16 = vpop.f32.mrf.mxu0  ;;  %s2567_s26 = scalar_lea.vmem %s2073_s2, 32  ;;  %p2572_p1 = scmp.lt.s32.totalorder %s2073_s2, %s2073_s2 }
  0xea   :  { %2419 = vmatprep.mubr.msk.f32.mxu1 %vm2590_vm0, %v4040_v2  ;;  %2404 = vmatpush3.msra.mxu1 %v883_v19  ;;  %p2568_p0 = scmp.ne.s32.totalorder %s2073_s2, %s2567_s26  ;;  %p2573_p2 = scmp.lt.s32.totalorder %s2567_s26, %s2567_s26 }
  0xeb   :  { %2405 = vmatprep.subr.mxu1 %v4040_v2  ;;  %2344 = vmatmul.mubr.msk.f32.gmra.mxu0 %vm128_vm1, %v110_v8 }
  0xec   :  { %2406 = vmatpush3.msra.mxu1 %v882_v21  ;;  %1938 = vmatpush2.msra.mxu0 %v110_v8  ;;  %p2574_p3 = por %p2573_p2, %p2572_p1 }
  0xed   :  { %2407 = vmatprep.subr.mxu1 %v4040_v2  ;;  %1939 = vmatprep.subr.mxu0 %v4040_v2 }
  0xee   :  { %2408 = vmatpush3.msra.mxu1 %v881_v24  ;;  %1940 = vmatpush2.msra.mxu0 %v109_v7  ;;  %v4042_v7 = vlaneseq  ;;  %p2575_p4 = pnand %p2574_p3, %p2568_p0 }
  0xef   :  { %2409 = vmatprep.subr.mxu1 %v4040_v2  ;;  %1941 = vmatprep.subr.mxu0 %v4040_v2 }
  0xf0   :  { %2410 = vmatpush3.msra.mxu1 %v880_v26  ;;  %1942 = vmatpush2.msra.mxu0 %v108_v6  ;;  %v3391_v54 = vshrl.u32 %v4042_v7, 7 }
  0xf1   :  { %2411 = vmatprep.subr.mxu1 %v4040_v2  ;;  %1943 = vmatprep.subr.mxu0 %v4040_v2 }
  0xf2   :  { %2412 = vmatpush3.msra.mxu1 %v879_v59  ;;  %1944 = vmatpush2.msra.mxu0 %v107_v5  ;;  %v2592_v5 = vmov 1966171168  }
  0xf3   :  { %2413 = vmatprep.subr.mxu1 %v4040_v2  ;;  %1945 = vmatprep.subr.mxu0 %v4040_v2  ;;  %v966_v6 = vunpack.c.l.s4 %v2592_v5 }
  0xf4   :  { %2414 = vmatpush3.msra.mxu1 %v878_v62  ;;  %1946 = vmatpush2.msra.mxu0 %v106_v3 }
  0xf5   :  { %2415 = vmatprep.subr.mxu1 %v4040_v2  ;;  %1947 = vmatprep.subr.mxu0 %v4040_v2  ;;  %v967_v53 = vunpack.c.0.s8 %v966_v6 }
  0xf6   :  { %2416 = vmatpush3.msra.mxu1 %v877_v1  ;;  %1948 = vmatpush2.msra.mxu0 %v105_v0 }
  0xf7   :  { %2417 = vmatprep.subr.mxu1 %v4040_v2  ;;  %1949 = vmatprep.subr.mxu0 %v4040_v2 }
  0xf8   :  { %2418 = vmatpush3.msra.mxu1 %v876_v4  ;;  %1950 = vmatpush2.msra.mxu0 %v3156_v60 }
  0xf9   :  { %1812 = vmatprep.subr.mxu1 %v4040_v2  ;;  %1951 = vmatprep.subr.mxu0 %v4040_v2 }
  0xfa   :  { %1952 = vmatpush2.msra.mxu0 %v3142_v27 }
  0xfb   :  { %1953 = vmatprep.subr.mxu0 %v4040_v2 }
  0xfc   :  { %1954 = vmatpush2.msra.mxu0 %v3133_v25 }
  0xfd   :  { %1955 = vmatprep.subr.mxu0 %v4040_v2 }
  0xfe   :  { %1956 = vmatpush2.msra.mxu0 %v3123_v23 }
 0x199   :  { %v3237_v55 = vpop.f32.mrf.mxu1 }
 0x19b   :  { %v2383_v56 = vpop.f32.mrf.mxu1 }
 0x1a9   :  { %v871_v58 = vpop.f32.mrf.mxu1 }
 0x1aa   :  { %v872_v9 = vadd.f32 %v2137_v57, %v871_v58  ;;  %v2135_v57 = vld [vmem:[%s4029_s8] ss:$0 sm:$0xff] }
 0x1ab   :  { %v2402_v10 = vpop.f32.mrf.mxu1  ;;  %v2139_v58 = vld [vmem:[%s4033_s12] ss:$0 sm:$0xff]  ;;  %v784_v5 = vadd.f32 %v2135_v57, %v3237_v55 }
 0x1ac   :  { %2448 = vtanh.f32 %v872_v9  ;;  %v3402_v9 = vsub.s32 %v967_v53, %v3391_v54 }
 0x1b9   :  { %v3246_v13 = vpop.eup %2448 }
 0x1ba   :  { %4050 = vst [vmem:[#allocation7_spill] sm:$0xff] %v3246_v13  ;;  %2420 = vmatmul.mubr.msk.f32.vlgmr.msra.gmra.mxu1 %vm128_vm1, %v3246_v13  ;;  %v3407_v13 = vsub.s32 0, %v3391_v54 }
 0x1bb   :  { %1813 = vmatpush1.msra.mxu1 %v2893_v42 }
 0x1bc   :  { %1814 = vmatprep.subr.mxu1 %v4040_v2 }
 0x1bd   :  { %1815 = vmatpush1.msra.mxu1 %v2884_v41  ;;  %v3268_v41 = vpop.f32.mrf.mxu0 }
 0x1be   :  { %1816 = vmatprep.subr.mxu1 %v4040_v2 }
 0x1bf   :  { %1817 = vmatpush1.msra.mxu1 %v2879_v40 }
 0x1c0   :  { %1818 = vmatprep.subr.mxu1 %v4040_v2 }
 0x1c1   :  { %1819 = vmatpush1.msra.mxu1 %v2870_v39  ;;  %v3274_v39 = vpop.f32.mrf.mxu0 }
 0x1c2   :  { %1820 = vmatprep.subr.mxu1 %v4040_v2 }
 0x1c3   :  { %1821 = vmatpush1.msra.mxu1 %v2865_v38 }
 0x1c4   :  { %1822 = vmatprep.subr.mxu1 %v4040_v2 }
 0x1c5   :  { %1823 = vmatpush1.msra.mxu1 %v2856_v37  ;;  %v3280_v37 = vpop.f32.mrf.mxu0 }
 0x1c6   :  { %1824 = vmatprep.subr.mxu1 %v4040_v2 }
 0x1c7   :  { %1825 = vmatpush1.msra.mxu1 %v2851_v36 }
 0x1c8   :  { %1826 = vmatprep.subr.mxu1 %v4040_v2 }
 0x1c9   :  { %1827 = vmatpush1.msra.mxu1 %v2842_v35  ;;  %v3286_v35 = vpop.f32.mrf.mxu0 }
 0x1ca   :  { %1828 = vmatprep.subr.mxu1 %v4040_v2 }
 0x1cb   :  { %1829 = vmatpush1.msra.mxu1 %v2837_v34 }
 0x1cc   :  { %1830 = vmatprep.subr.mxu1 %v4040_v2 }
 0x1cd   :  { %1831 = vmatpush1.msra.mxu1 %v2828_v33  ;;  %v3292_v33 = vpop.f32.mrf.mxu0 }
 0x1ce   :  { %1832 = vmatprep.subr.mxu1 %v4040_v2 }
 0x1cf   :  { %1833 = vmatpush1.msra.mxu1 %v2823_v32 }
 0x1d0   :  { %1834 = vmatprep.subr.mxu1 %v4040_v2 }
 0x1d1   :  { %1835 = vmatpush1.msra.mxu1 %v2814_v31  ;;  %v3298_v31 = vpop.f32.mrf.mxu0 }
 0x1d2   :  { %1836 = vmatprep.subr.mxu1 %v4040_v2 }
 0x1d3   :  { %1837 = vmatpush1.msra.mxu1 %v2809_v30 }
 0x1d4   :  { %1838 = vmatprep.subr.mxu1 %v4040_v2 }
 0x1d5   :  { %1839 = vmatpush1.msra.mxu1 %v2799_v29  ;;  %v3304_v29 = vpop.f32.mrf.mxu0 }
 0x1d6   :  { %1840 = vmatprep.subr.mxu1 %v4040_v2 }
 0x1d7   :  { %1841 = vmatpush1.msra.mxu1 %v2794_v28 }
 0x1d8   :  { %1842 = vmatprep.subr.mxu1 %v4040_v2 }
 0x1d9   :  { %1843 = vmatpush1.msra.mxu1 %v2772_v22  ;;  %v3310_v22 = vpop.f32.mrf.mxu0 }
 0x1da   :  { %1856 = vmatprep.subr.mxu1 %v4040_v2 }
 0x1db   :  { %1857 = vmatpush2.msra.mxu1 %v2963_v52  ;;  %v3316_v28 = vpop.f32.mrf.mxu0 }
 0x1dc   :  { %1858 = vmatprep.subr.mxu1 %v4040_v2 }
 0x1dd   :  { %1859 = vmatpush2.msra.mxu1 %v2954_v51  ;;  %v3322_v30 = vpop.f32.mrf.mxu0 }
 0x1de   :  { %1860 = vmatprep.subr.mxu1 %v4040_v2 }
 0x1df   :  { %1861 = vmatpush2.msra.mxu1 %v2949_v50  ;;  %v3328_v32 = vpop.f32.mrf.mxu0 }
 0x1e0   :  { %1862 = vmatprep.subr.mxu1 %v4040_v2 }
 0x1e1   :  { %1863 = vmatpush2.msra.mxu1 %v2940_v49  ;;  %v3330_v34 = vpop.f32.mrf.mxu0 }
 0x1e2   :  { %1864 = vmatprep.subr.mxu1 %v4040_v2 }
 0x1e3   :  { %1865 = vmatpush2.msra.mxu1 %v2935_v48  ;;  %v431_v36 = vpop.f32.mrf.mxu0 }
 0x1e4   :  { %1866 = vmatprep.subr.mxu1 %v4040_v2 }
 0x1e5   :  { %1867 = vmatpush2.msra.mxu1 %v2926_v47  ;;  %v3332_v38 = vpop.f32.mrf.mxu0 }
 0x1e6   :  { %1868 = vmatprep.subr.mxu1 %v4040_v2 }
 0x1e7   :  { %1869 = vmatpush2.msra.mxu1 %v2921_v46  ;;  %v441_v40 = vpop.f32.mrf.mxu0 }
 0x1e8   :  { %1870 = vmatprep.subr.mxu1 %v4040_v2 }
 0x1e9   :  { %1871 = vmatpush2.msra.mxu1 %v2912_v45  ;;  %v3334_v42 = vpop.f32.mrf.mxu0 }
 0x1ea   :  { %1872 = vmatprep.subr.mxu1 %v4040_v2 }
 0x1eb   :  { %1873 = vmatpush2.msra.mxu1 %v2907_v44  ;;  %v3336_v45 = vpop.f32.mrf.mxu0 }
 0x1ec   :  { %1874 = vmatprep.subr.mxu1 %v4040_v2 }
 0x1ed   :  { %1875 = vmatpush2.msra.mxu1 %v2898_v43  ;;  %v3338_v46 = vpop.f32.mrf.mxu0 }
 0x1ee   :  { %2422 = vmatprep.subr.mxu1 %v4040_v2 }
 0x1ef   :  { %v3340_v44 = vpop.f32.mrf.mxu0 }
 0x1f1   :  { %v3342_v47 = vpop.f32.mrf.mxu0 }
 0x1f3   :  { %v3344_v43 = vpop.f32.mrf.mxu0 }
 0x1f5   :  { %v3346_v48 = vpop.f32.mrf.mxu0 }
 0x1f7   :  { %v3348_v49 = vpop.f32.mrf.mxu0 }
 0x1f9   :  { %v3350_v50 = vpop.f32.mrf.mxu0 }
 0x1fb   :  { %v3352_v51 = vpop.f32.mrf.mxu0 }
 0x1fd   :  { %v3354_v52 = vpop.f32.mrf.mxu0 }
 0x1ff   :  { %v3356_v17 = vpop.f32.mrf.mxu0 }
 0x201   :  { %v3358_v18 = vpop.f32.mrf.mxu0 }
 0x203   :  { %v3360_v19 = vpop.f32.mrf.mxu0 }
 0x205   :  { %v3362_v20 = vpop.f32.mrf.mxu0 }
 0x207   :  { %v3364_v21 = vpop.f32.mrf.mxu0 }
 0x209   :  { %v3366_v23 = vpop.f32.mrf.mxu0 }
 0x20b   :  { %v3368_v24 = vpop.f32.mrf.mxu0 }
 0x20d   :  { %v3370_v25 = vpop.f32.mrf.mxu0 }
 0x20f   :  { %v3372_v26 = vpop.f32.mrf.mxu0 }
 0x211   :  { %v3374_v27 = vpop.f32.mrf.mxu0 }
 0x213   :  { %v3376_v59 = vpop.f32.mrf.mxu0 }
 0x215   :  { %v3378_v60 = vpop.f32.mrf.mxu0 }
 0x217   :  { %v3380_v62 = vpop.f32.mrf.mxu0 }
 0x219   :  { %v3382_v0 = vpop.f32.mrf.mxu0 }
 0x21a   :  { %4051 = vst [vmem:[#allocation8_spill] sm:$0xff] %v3382_v0 }
 0x21b   :  { %v3384_v1 = vpop.f32.mrf.mxu0 }
 0x21d   :  { %v3386_v3 = vpop.f32.mrf.mxu0 }
 0x21e   :  { %4052 = vst [vmem:[#allocation9_spill] sm:$0xff] %v3386_v3  ;;  %v3412_v3 = vld [vmem:[%s4025_s4] ss:$0 sm:$0xff] }
 0x21f   :  { %v3388_v4 = vpop.f32.mrf.mxu0  ;;  %v432_v55 = vadd.f32 %v3412_v3, %v431_v36  ;;  %v352_v36 = vadd.f32 %v3412_v3, %v3244_v12  ;;  %v362_v12 = vadd.f32 %v3412_v3, %v3256_v15  ;;  %v3453_v15 = vld [vmem:[%s4034_s13] ss:$0 sm:$0xff] }
 0x220   :  { %4053 = vst [vmem:[#allocation10_spill] sm:$0xff] %v3388_v4 }
 0x221   :  { %v2342_v8 = vpop.f32.mrf.mxu0 }
 0x223   :  { %v3393_v56 = vpop.f32.mrf.mxu0 }
 0x225   :  { %v2345_v63 = vpop.f32.mrf.mxu0 }
 0x227   :  { %v601_v0 = vpop.f32.mrf.mxu0 }
 0x27a   :  { %v960_v10 = vpop.f32.mrf.mxu1 }
 0x27b   :  { %v961_v6 = vadd.f32 %v2139_v58, %v960_v10  ;;  %v597_v58 = vadd.f32 %v2342_v8, %v3412_v3  ;;  %v607_v10 = vadd.f32 %v2345_v63, %v3412_v3  ;;  %v447_v8 = vadd.f32 %v3332_v38, %v3412_v3 }
 0x27c   :  { %v2421_v2 = vpop.f32.mrf.mxu1  ;;  %v397_v38 = vadd.f32 %v3286_v35, %v3412_v3 }
 0x27d   :  { %v971_v7 = vrot.slane %v961_v6, %v3402_v9  ;;  %v1101_v61 = vadd.f32 %v961_v6, %v784_v5  ;;  %v602_v5 = vadd.f32 %v3412_v3, %v601_v0  ;;  %v357_v0 = vadd.f32 %v3242_v11, %v3412_v3 }
 0x27f   :  { %v972_v4 = vcombine.high %v971_v7, %v971_v7  ;;  %v979_v53 = vrot.slane %v971_v7, %v3402_v9  ;;  %2450 = vtanh.f32 %v1101_v61  ;;  %v442_v61 = vadd.f32 %v3412_v3, %v441_v40 }
 0x281   :  { %v986_v2 = vrot.slane %v972_v4, %v3402_v9  ;;  %v3418_v57 = vrot.slane %v979_v53, %v3407_v13 }
 0x283   :  { %v3424_v6 = vrot.slane %v986_v2, %v3407_v13  ;;  %v1013_v7 = vadd.f32 %v3418_v57, %v432_v55  ;;  %v997_v55 = vadd.f32 %v3418_v57, %v352_v36  ;;  %v1015_v40 = vadd.f32 %v3418_v57, %v442_v61 }
 0x284   :  { %v998_v2 = vadd.f32 %v3418_v57, %v357_v0  ;;  %v999_v11 = vadd.f32 %v3418_v57, %v362_v12  ;;  %v1006_v35 = vadd.f32 %v3418_v57, %v397_v38  ;;  %v367_v61 = vadd.f32 %v3250_v14, %v3412_v3 }
 0x285   :  { %v1046_v4 = vadd.f32 %v3424_v6, %v597_v58  ;;  %v1048_v53 = vadd.f32 %v3424_v6, %v607_v10  ;;  %v1047_v63 = vadd.f32 %v3424_v6, %v602_v5  ;;  %2452 = vtanh.f32 %v1013_v7 }
 0x286   :  { %v1016_v58 = vadd.f32 %v3418_v57, %v447_v8  ;;  %v427_v5 = vadd.f32 %v3322_v30, %v3412_v3  ;;  %v452_v7 = vadd.f32 %v3412_v3, %v3336_v45  ;;  %v537_v36 = vadd.f32 %v3366_v23, %v3412_v3 }
 0x287   :  { %2454 = vtanh.f32 %v1046_v4  ;;  %v547_v30 = vadd.f32 %v3370_v25, %v3412_v3  ;;  %v542_v4 = vadd.f32 %v3412_v3, %v3372_v26  ;;  %v372_v14 = vadd.f32 %v3412_v3, %v3268_v41 }
 0x288   :  { %2456 = vtanh.f32 %v1048_v53  ;;  %v3463_v45 = vadd.f32 %v3418_v57, %v427_v5  ;;  %v1000_v53 = vadd.f32 %v3418_v57, %v367_v61  ;;  %v557_v23 = vadd.f32 %v3374_v27, %v3412_v3 }
 0x289   :  { %2458 = vtanh.f32 %v1047_v63  ;;  %v1017_v25 = vadd.f32 %v3418_v57, %v452_v7  ;;  %v402_v63 = vadd.f32 %v3412_v3, %v3304_v29  ;;  %v457_v26 = vadd.f32 %v3334_v42, %v3412_v3 }
 0x28a   :  { %2460 = vtanh.f32 %v997_v55  ;;  %v1001_v0 = vadd.f32 %v3418_v57, %v372_v14  ;;  %v3485_v41 = vadd.f32 %v3424_v6, %v542_v4  ;;  %v3488_v27 = vadd.f32 %v3424_v6, %v547_v30 }
 0x28b   :  { %2462 = vtanh.f32 %v1015_v40  ;;  %v3482_v40 = vadd.f32 %v3424_v6, %v537_v36  ;;  %v1007_v29 = vadd.f32 %v3418_v57, %v402_v63  ;;  %v3493_v42 = vadd.f32 %v3424_v6, %v557_v23 }
 0x28c   :  { %v2451_v10 = vpop.eup %2450  ;;  %2464 = vtanh.f32 %v998_v2  ;;  %v377_v38 = vadd.f32 %v3262_v16, %v3412_v3  ;;  %v1018_v36 = vadd.f32 %v3418_v57, %v457_v26  ;;  %v382_v4 = vadd.f32 %v3412_v3, %v3280_v37 }
 0x28d   :  { %2466 = vtanh.f32 %v1016_v58  ;;  %v3469_v8 = vmul.f32 %v2451_v10, %v3453_v15  ;;  %v407_v23 = vadd.f32 %v3298_v31, %v3412_v3 }
 0x28e   :  { %2468 = vtanh.f32 %v999_v11  ;;  %v1002_v7 = vadd.f32 %v3418_v57, %v377_v38  ;;  %v437_v38 = vadd.f32 %v3330_v34, %v3412_v3  ;;  %v387_v34 = vadd.f32 %v3274_v39, %v3412_v3 }
 0x28f   :  { %2470 = vtanh.f32 %v1006_v35  ;;  %v1008_v31 = vadd.f32 %v3418_v57, %v407_v23 }
 0x290   :  { %2472 = vtanh.f32 %v1000_v53 }
 0x291   :  { %2474 = vtanh.f32 %v1017_v25  ;;  %v462_v25 = vadd.f32 %v3412_v3, %v3340_v44 }
 0x292   :  { %v2453_v55 = vpop.eup %2452  ;;  %2476 = vtanh.f32 %v1001_v0 }
 0x293   :  { %v1126_v2 = vmul.f32 %v2453_v55, %v3453_v15  ;;  %2478 = vtanh.f32 %v1007_v29 }
 0x294   :  { %v2455_v12 = vpop.eup %2454  ;;  %2480 = vtanh.f32 %v1002_v7 }
 0x295   :  { %v3498_v58 = vmul.f32 %v2455_v12, %v3453_v15  ;;  %v2457_v11 = vpop.eup %2456  ;;  %v1210_v10 = vsel %vm128_vm1, %v1126_v2, 0.0  ;;  %v1003_v12 = vadd.f32 %v3418_v57, %v382_v4  ;;  %2482 = vtanh.f32 %v1018_v36 }
 0x296   :  { %v2459_v5 = vpop.eup %2458  ;;  %1211 = vadd.xlane.f32.xlu1 %v1210_v10  ;;  %v3503_v35 = vmul.f32 %v2457_v11, %v3453_v15 }
 0x297   :  { %v2461_v61 = vpop.eup %2460  ;;  %v3507_v16 = vmul.f32 %v2459_v5, %v3453_v15  ;;  %2484 = vtanh.f32 %v1003_v12  ;;  %v1014_v5 = vadd.f32 %v3418_v57, %v437_v38  ;;  %v422_v12 = vadd.f32 %v3412_v3, %v3328_v32 }
 0x298   :  { %v2463_v30 = vpop.eup %2462  ;;  %v1110_v53 = vmul.f32 %v2461_v61, %v3453_v15  ;;  %2486 = vtanh.f32 %v1008_v31 }
 0x299   :  { %v2465_v14 = vpop.eup %2464  ;;  %v1128_v63 = vmul.f32 %v2463_v30, %v3453_v15  ;;  %v1019_v30 = vadd.f32 %v3418_v57, %v462_v25  ;;  %2488 = vtanh.f32 %v1014_v5  ;;  %v517_v5 = vadd.f32 %v3358_v18, %v3412_v3 }
 0x29a   :  { %v2467_v0 = vpop.eup %2466  ;;  %v1162_v26 = vsel %vm128_vm1, %v1110_v53, 0.0  ;;  %v1111_v55 = vmul.f32 %v2465_v14, %v3453_v15  ;;  %v412_v53 = vadd.f32 %v3412_v3, %v3316_v28  ;;  %v467_v14 = vadd.f32 %v3338_v46, %v3412_v3 }
 0x29b   :  { %v2469_v37 = vpop.eup %2468  ;;  %1163 = vadd.xlane.f32.xlu0 %v1162_v26  ;;  %v1216_v2 = vsel %vm128_vm1, %v1128_v63, 0.0  ;;  %v1129_v29 = vmul.f32 %v2467_v0, %v3453_v15  ;;  %v1004_v0 = vadd.f32 %v3418_v57, %v387_v34  ;;  %2490 = vtanh.f32 %v1019_v30 }
 0x29c   :  { %v2471_v44 = vpop.eup %2470  ;;  %1217 = vadd.xlane.f32.xlu1 %v1216_v2  ;;  %v1165_v11 = vsel %vm128_vm1, %v1111_v55, 0.0  ;;  %v1112_v10 = vmul.f32 %v2469_v37, %v3453_v15  ;;  %v1009_v55 = vadd.f32 %v3418_v57, %v412_v53  ;;  %v392_v46 = vadd.f32 %v3412_v3, %v3292_v33 }
 0x29d   :  { %v2473_v7 = vpop.eup %2472  ;;  %v1219_v61 = vsel %vm128_vm1, %v1129_v29, 0.0  ;;  %v1119_v36 = vmul.f32 %v2471_v44, %v3453_v15  ;;  %v562_v37 = vadd.f32 %v3412_v3, %v3380_v62  ;;  %2492 = vtanh.f32 %v1004_v0 }
 0x29e   :  { %v2475_v4 = vpop.eup %2474  ;;  %v1168_v23 = vsel %vm128_vm1, %v1112_v10, 0.0  ;;  %v1113_v63 = vmul.f32 %v2473_v7, %v3453_v15  ;;  %v1005_v31 = vadd.f32 %v3418_v57, %v392_v46  ;;  %2494 = vtanh.f32 %v1009_v55 }
 0x29f   :  { %1166 = vadd.xlane.f32.xlu0 %v1165_v11  ;;  %v2477_v26 = vpop.eup %2476  ;;  %v1189_v25 = vsel %vm128_vm1, %v1119_v36, 0.0  ;;  %v1130_v39 = vmul.f32 %v2475_v4, %v3453_v15  ;;  %v1020_v11 = vadd.f32 %v3418_v57, %v467_v14  ;;  %v417_v62 = vadd.f32 %v3310_v22, %v3412_v3 }
 0x2a0   :  { %1220 = vadd.xlane.f32.xlu1 %v1219_v61  ;;  %v2479_v28 = vpop.eup %2478  ;;  %v1171_v2 = vsel %vm128_vm1, %v1113_v63, 0.0  ;;  %v1114_v29 = vmul.f32 %v2477_v26, %v3453_v15  ;;  %v472_v10 = vadd.f32 %v3412_v3, %v3344_v43  ;;  %v527_v7 = vadd.f32 %v3362_v20, %v3412_v3 }
 0x2a1   :  { %v2481_v44 = vpop.eup %2480  ;;  %v1222_v38 = vsel %vm128_vm1, %v1130_v39, 0.0  ;;  %v1120_v33 = vmul.f32 %v2479_v28, %v3453_v15  ;;  %v532_v61 = vadd.f32 %v3412_v3, %v3368_v24  ;;  %v1011_v36 = vadd.f32 %v3418_v57, %v422_v12 }
 0x2a2   :  { %v2483_v32 = vpop.eup %2482  ;;  %2496 = vtanh.f32 %v3463_v45  ;;  %v1174_v30 = vsel %vm128_vm1, %v1114_v29, 0.0  ;;  %v1115_v22 = vmul.f32 %v2481_v44, %v3453_v15  ;;  %v1010_v43 = vadd.f32 %v3418_v57, %v417_v62 }
 0x2a3   :  { %1169 = vadd.xlane.f32.xlu0 %v1168_v23  ;;  %2498 = vtanh.f32 %v1005_v31  ;;  %v1192_v18 = vsel %vm128_vm1, %v1120_v33, 0.0  ;;  %v1131_v20 = vmul.f32 %v2483_v32, %v3453_v15  ;;  %v1039_v24 = vadd.f32 %v3424_v6, %v562_v37 }
 0x2a4   :  { %1190 = vadd.xlane.f32.xlu1 %v1189_v25  ;;  %v2485_v4 = vpop.eup %2484  ;;  %2500 = vtanh.f32 %v1020_v11  ;;  %v477_v45 = vadd.f32 %v3342_v47, %v3412_v3  ;;  %v1021_v53 = vadd.f32 %v3418_v57, %v472_v10  ;;  %v1032_v14 = vadd.f32 %v3424_v6, %v527_v7 }
 0x2a5   :  { %v2487_v34 = vpop.eup %2486  ;;  %2502 = vtanh.f32 %v1011_v36  ;;  %v1177_v23 = vsel %vm128_vm1, %v1115_v22, 0.0  ;;  %v1116_v63 = vmul.f32 %v2485_v4, %v3453_v15  ;;  %v1030_v0 = vadd.f32 %v3424_v6, %v517_v5 }
 0x2a6   :  { %2504 = vtanh.f32 %v1010_v43  ;;  %v2489_v26 = vpop.eup %2488  ;;  %v1225_v25 = vsel %vm128_vm1, %v1131_v20, 0.0  ;;  %v1121_v39 = vmul.f32 %v2487_v34, %v3453_v15  ;;  %v1033_v47 = vadd.f32 %v3424_v6, %v532_v61 }
 0x2a7   :  { %1172 = vadd.xlane.f32.xlu0 %v1171_v2  ;;  %2506 = vtanh.f32 %v1039_v24  ;;  %v1022_v28 = vadd.f32 %v3418_v57, %v477_v45  ;;  %v522_v46 = vadd.f32 %v3412_v3, %v3364_v21  ;;  %v482_v12 = vadd.f32 %v3412_v3, %v3348_v49 }
 0x2a8   :  { %1223 = vadd.xlane.f32.xlu1 %v1222_v38  ;;  %v2491_v55 = vpop.eup %2490  ;;  %2508 = vtanh.f32 %v1021_v53  ;;  %v1180_v37 = vsel %vm128_vm1, %v1116_v63, 0.0  ;;  %v1127_v2 = vmul.f32 %v2489_v26, %v3453_v15  ;;  %v1195_v31 = vsel %vm128_vm1, %v1121_v39, 0.0 }
 0x2a9   :  { %2510 = vtanh.f32 %v1032_v14  ;;  %v1132_v44 = vmul.f32 %v2491_v55, %v3453_v15  ;;  %v487_v21 = vadd.f32 %v3346_v48, %v3412_v3  ;;  %v592_v49 = vadd.f32 %v3412_v3, %v3393_v56 }
 0x2aa   :  { %2512 = vtanh.f32 %v1030_v0  ;;  %v2493_v29 = vpop.eup %2492  ;;  %v1031_v38 = vadd.f32 %v3424_v6, %v522_v46  ;;  %v1213_v11 = vsel %vm128_vm1, %v1127_v2, 0.0  ;;  %v1023_v62 = vadd.f32 %v3424_v6, %v482_v12 }
 0x2ab   :  { %1175 = vadd.xlane.f32.xlu0 %v1174_v30  ;;  %2514 = vtanh.f32 %v1033_v47  ;;  %v2495_v57 = vpop.eup %2494  ;;  %v1117_v32 = vmul.f32 %v2493_v29, %v3453_v15  ;;  %v1228_v48 = vsel %vm128_vm1, %v1132_v44, 0.0  ;;  %v492_v7 = vadd.f32 %v3412_v3, %v3352_v51 }
 0x2ac   :  { %1193 = vadd.xlane.f32.xlu1 %v1192_v18  ;;  %2516 = vtanh.f32 %v1022_v28  ;;  %v1122_v5 = vmul.f32 %v2495_v57, %v3453_v15  ;;  %v552_v36 = vadd.f32 %v3412_v3, %v3376_v59  ;;  %v1024_v51 = vadd.f32 %v3424_v6, %v487_v21 }
 0x2ad   :  { %2518 = vtanh.f32 %v3482_v40  ;;  %v1183_v30 = vsel %vm128_vm1, %v1117_v32, 0.0  ;;  %v497_v59 = vadd.f32 %v3350_v50, %v3412_v3  ;;  %v1025_v53 = vadd.f32 %v3424_v6, %v492_v7 }
 0x2ae   :  { %2520 = vtanh.f32 %v3485_v41  ;;  %v1045_v41 = vadd.f32 %v3424_v6, %v592_v49  ;;  %v1037_v45 = vadd.f32 %v3424_v6, %v552_v36  ;;  %v507_v21 = vadd.f32 %v3354_v52, %v3412_v3 }
 0x2af   :  { %1178 = vadd.xlane.f32.xlu0 %v1177_v23  ;;  %v2497_v33 = vpop.eup %2496  ;;  %2522 = vtanh.f32 %v3488_v27  ;;  %v1198_v27 = vsel %vm128_vm1, %v1122_v5, 0.0  ;;  %v1026_v46 = vadd.f32 %v3424_v6, %v497_v59  ;;  %v512_v52 = vadd.f32 %v3412_v3, %v3360_v19 }
 0x2b0   :  { %1226 = vadd.xlane.f32.xlu1 %v1225_v25  ;;  %v2499_v10 = vpop.eup %2498  ;;  %v3605_v56 = vmul.f32 %v2497_v33, %v3453_v15  ;;  %2524 = vtanh.f32 %v3493_v42  ;;  %v502_v25 = vadd.f32 %v3412_v3, %v3356_v17  ;;  %v1028_v36 = vadd.f32 %v3424_v6, %v507_v21 }
 0x2b1   :  { %v2501_v40 = vpop.eup %2500  ;;  %v1118_v22 = vmul.f32 %v2499_v10, %v3453_v15  ;;  %2526 = vtanh.f32 %v1031_v38  ;;  %v572_v59 = vadd.f32 %v3412_v3, %v3384_v1 }
 0x2b2   :  { %v2503_v61 = vpop.eup %2502  ;;  %v1133_v42 = vmul.f32 %v2501_v40, %v3453_v15  ;;  %2528 = vtanh.f32 %v1023_v62  ;;  %v1027_v10 = vadd.f32 %v3424_v6, %v502_v25 }
 0x2b3   :  { %1181 = vadd.xlane.f32.xlu0 %v1180_v37  ;;  %v2505_v43 = vpop.eup %2504  ;;  %2530 = vtanh.f32 %v1045_v41  ;;  %v1186_v24 = vsel %vm128_vm1, %v1118_v22, 0.0  ;;  %v1124_v34 = vmul.f32 %v2503_v61, %v3453_v15  ;;  %v567_v22 = vadd.f32 %v3378_v60, %v3412_v3 }
 0x2b4   :  { %1196 = vadd.xlane.f32.xlu1 %v1195_v31  ;;  %v2507_v4 = vpop.eup %2506  ;;  %v1231_v23 = vsel %vm128_vm1, %v1133_v42, 0.0  ;;  %v1123_v63 = vmul.f32 %v2505_v43, %v3453_v15  ;;  %2532 = vtanh.f32 %v1024_v51 }
 0x2b5   :  { %v2509_v18 = vpop.eup %2508  ;;  %v1204_v55 = vsel %vm128_vm1, %v1124_v34, 0.0  ;;  %v1152_v28 = vmul.f32 %v2507_v4, %v3453_v15  ;;  %2534 = vtanh.f32 %v1037_v45  ;;  %v1029_v4 = vadd.f32 %v3424_v6, %v512_v52 }
 0x2b6   :  { %v2511_v20 = vpop.eup %2510  ;;  %v1201_v37 = vsel %vm128_vm1, %v1123_v63, 0.0  ;;  %v1134_v2 = vmul.f32 %v2509_v18, %v3453_v15  ;;  %2536 = vtanh.f32 %v1025_v53  ;;  %v1040_v45 = vadd.f32 %v3424_v6, %v567_v22 }
 0x2b7   :  { %1214 = vadd.xlane.f32.xlu0 %v1213_v11  ;;  %v2513_v14 = vpop.eup %2512  ;;  %v3628_v0 = vmul.f32 %v2511_v20, %v3453_v15  ;;  %v1288_v49 = vsel %vm128_vm1, %v1152_v28, 0.0  ;;  %2538 = vtanh.f32 %v1026_v46 }
 0x2b8   :  { %1229 = vadd.xlane.f32.xlu1 %v1228_v48  ;;  %v2515_v50 = vpop.eup %2514  ;;  %v1143_v38 = vmul.f32 %v2513_v14, %v3453_v15  ;;  %v1234_v32 = vsel %vm128_vm1, %v1134_v2, 0.0  ;;  %2540 = vtanh.f32 %v1027_v10  ;;  %v4054_v14 = vld [vmem:[#allocation8_spill] sm:$0xff]  ;;  %v4055_v2 = vld [vmem:[#allocation10_spill] sm:$0xff] }
 0x2b9   :  { %v2517_v26 = vpop.eup %2516  ;;  %v3633_v39 = vmul.f32 %v2515_v50, %v3453_v15  ;;  %2542 = vtanh.f32 %v1028_v36  ;;  %v1267_v22 = vsel %vm128_vm1, %v3628_v0, 0.0 }
 0x2ba   :  { %v2519_v47 = vpop.eup %2518  ;;  %v1135_v62 = vmul.f32 %v2517_v26, %v3453_v15  ;;  %v1261_v40 = vsel %vm128_vm1, %v1143_v38, 0.0  ;;  %2544 = vtanh.f32 %v1029_v4  ;;  %v1041_v26 = vadd.f32 %v3424_v6, %v572_v59  ;;  %v3730_v59 = vpop.permute.xlu0 %1325 }
 0x2bb   :  { %1184 = vadd.xlane.f32.xlu0 %v1183_v30  ;;  %v2521_v12 = vpop.eup %2520  ;;  %v3641_v17 = vmul.f32 %v2519_v47, %v3453_v15  ;;  %2546 = vtanh.f32 %v1040_v45  ;;  %v1207_v47 = vsel %vm128_vm1, %v3605_v56, 0.0 }
 0x2bc   :  { %1199 = vadd.xlane.f32.xlu1 %v1198_v27  ;;  %v2523_v29 = vpop.eup %2522  ;;  %v3644_v31 = vmul.f32 %v2521_v12, %v3453_v15  ;;  %v1237_v41 = vsel %vm128_vm1, %v1135_v62, 0.0  ;;  %2548 = vtanh.f32 %v1041_v26 }
 0x2bd   :  { %v2525_v44 = vpop.eup %2524  ;;  %v3647_v57 = vmul.f32 %v2523_v29, %v3453_v15  ;;  %v582_v29 = vadd.f32 %v3412_v3, %v4055_v2  ;;  %v1273_v4 = vsel %vm128_vm1, %v3641_v17, 0.0  ;;  %v1315_v17 = vsel %vm128_vm1, %v3503_v35, 0.0 }
 0x2be   :  { %v3654_v33 = vmul.f32 %v2525_v44, %v3453_v15  ;;  %v2527_v11 = vpop.eup %2526  ;;  %v1276_v0 = vsel %vm128_vm1, %v3644_v31, 0.0 }
 0x2bf   :  { %1187 = vadd.xlane.f32.xlu0 %v1186_v24  ;;  %v2529_v48 = vpop.eup %2528  ;;  %v1144_v7 = vmul.f32 %v2527_v11, %v3453_v15  ;;  %v1043_v11 = vadd.f32 %v3424_v6, %v582_v29 }
 0x2c0   :  { %1232 = vadd.xlane.f32.xlu1 %v1231_v23  ;;  %v2531_v5 = vpop.eup %2530  ;;  %v1136_v61 = vmul.f32 %v2529_v48, %v3453_v15  ;;  %v577_v23 = vadd.f32 %v4054_v14, %v3412_v3  ;;  %v1285_v31 = vsel %vm128_vm1, %v3654_v33, 0.0  ;;  %v4057_v14 = vlaneseq }
 0x2c1   :  { %v2533_v30 = vpop.eup %2532  ;;  %v1264_v43 = vsel %vm128_vm1, %v1144_v7, 0.0  ;;  %v1158_v19 = vmul.f32 %v2531_v5, %v3453_v15 }
 0x2c2   :  { %v2535_v27 = vpop.eup %2534  ;;  %v1240_v42 = vsel %vm128_vm1, %v1136_v61, 0.0  ;;  %v1137_v51 = vmul.f32 %v2533_v30, %v3453_v15  ;;  %v1042_v46 = vadd.f32 %v3424_v6, %v577_v23  ;;  %v3737_v23 = vand.u32 127, %v4057_v14 }
 0x2c3   :  { %1205 = vadd.xlane.f32.xlu0 %v1204_v55  ;;  %v2537_v18 = vpop.eup %2536  ;;  %v1306_v60 = vsel %vm128_vm1, %v1158_v19, 0.0  ;;  %v1150_v20 = vmul.f32 %v2535_v27, %v3453_v15  ;;  %v1270_v27 = vsel %vm128_vm1, %v3633_v39, 0.0  ;;  %v1279_v39 = vsel %vm128_vm1, %v3647_v57, 0.0 }
 0x2c4   :  { %1202 = vadd.xlane.f32.xlu1 %v1201_v37  ;;  %v1243_v24 = vsel %vm128_vm1, %v1137_v51, 0.0  ;;  %v1138_v34 = vmul.f32 %v2537_v18, %v3453_v15  ;;  %v2539_v53 = vpop.eup %2538  ;;  %v1382_v37 = vsel %vm1381_vm2, %v3469_v8, 0.0  ;;  %2550 = vtanh.f32 %v1042_v46  ;;  %v4056_v8 = vld [vmem:[#allocation9_spill] sm:$0xff] }
 0x2c5   :  { %v1282_v63 = vsel %vm128_vm1, %v1150_v20, 0.0  ;;  %v1139_v50 = vmul.f32 %v2539_v53, %v3453_v15  ;;  %v2541_v25 = vpop.eup %2540  ;;  %v587_v62 = vadd.f32 %v4056_v8, %v3412_v3  ;;  %2552 = vtanh.f32 %v1043_v11 }
 0x2c6   :  { %v1246_v1 = vsel %vm128_vm1, %v1138_v34, 0.0  ;;  %v1140_v28 = vmul.f32 %v2541_v25, %v3453_v15  ;;  %v2543_v12 = vpop.eup %2542  ;;  %v1309_v18 = vsel %vm128_vm1, %v3498_v58, 0.0  ;;  %v1448_v33 = vadd.s32 4294967288, %v3737_v23 }
 0x2c7   :  { %1289 = vadd.xlane.f32.xlu0 %v1288_v49  ;;  %v1249_v55 = vsel %vm128_vm1, %v1139_v50, 0.0  ;;  %v1141_v44 = vmul.f32 %v2543_v12, %v3453_v15  ;;  %v2545_v21 = vpop.eup %2544  ;;  %v1044_v7 = vadd.f32 %v3424_v6, %v587_v62  ;;  %v1462_v50 = vadd.s32 4294967272, %v3737_v23 }
 0x2c8   :  { %1235 = vadd.xlane.f32.xlu1 %v1234_v32  ;;  %v1252_v56 = vsel %vm128_vm1, %v1140_v28, 0.0  ;;  %v1142_v38 = vmul.f32 %v2545_v21, %v3453_v15  ;;  %v2547_v32 = vpop.eup %2546  ;;  %v3746_v25 = vsub.s32 %v3737_v23, %v3391_v54  ;;  %v1511_v12 = vadd.s32 4294967216, %v3737_v23 }
 0x2c9   :  { %v1255_v49 = vsel %vm128_vm1, %v1141_v44, 0.0  ;;  %v1153_v48 = vmul.f32 %v2547_v32, %v3453_v15  ;;  %v2549_v5 = vpop.eup %2548  ;;  %2554 = vtanh.f32 %v1044_v7  ;;  %v1483_v2 = vadd.s32 4294967248, %v3737_v23 }
 0x2ca   :  { %v1258_v10 = vsel %vm128_vm1, %v1142_v38, 0.0  ;;  %v3757_v29 = vsub.s32 %v1448_v33, %v3391_v54  ;;  %v1490_v44 = vadd.s32 4294967240, %v3737_v23  ;;  %v1525_v21 = vadd.s32 4294967200, %v3737_v23 }
 0x2cb   :  { %1262 = vadd.xlane.f32.xlu0 %v1261_v40  ;;  %v1291_v52 = vsel %vm128_vm1, %v1153_v48, 0.0  ;;  %v1154_v40 = vmul.f32 %v2549_v5, %v3453_v15  ;;  %v1497_v11 = vadd.s32 4294967232, %v3737_v23  ;;  %v3784_v7 = vsub.s32 %v1483_v2, %v3391_v54 }
 0x2cc   :  { %1238 = vadd.xlane.f32.xlu1 %v1237_v41 }
 0x2cd   :  { %v1294_v61 = vsel %vm128_vm1, %v1154_v40, 0.0 }
 0x2cf   :  { %1265 = vadd.xlane.f32.xlu0 %v1264_v43 }
 0x2d0   :  { %1241 = vadd.xlane.f32.xlu1 %v1240_v42 }
 0x2d1   :  { %v2551_v41 = vpop.eup %2550 }
 0x2d2   :  { %v1155_v36 = vmul.f32 %v2551_v41, %v3453_v15  ;;  %v2553_v30 = vpop.eup %2552 }
 0x2d3   :  { %1307 = vadd.xlane.f32.xlu0 %v1306_v60  ;;  %v1156_v43 = vmul.f32 %v2553_v30, %v3453_v15 }
 0x2d4   :  { %1244 = vadd.xlane.f32.xlu1 %v1243_v24  ;;  %v1297_v3 = vsel %vm128_vm1, %v1155_v36, 0.0  ;;  %v3791_v36 = vsub.s32 %v1490_v44, %v3391_v54 }
 0x2d5   :  { %v1300_v6 = vsel %vm128_vm1, %v1156_v43, 0.0 }
 0x2d6   :  { %v2555_v19 = vpop.eup %2554 }
 0x2d7   :  { %1283 = vadd.xlane.f32.xlu0 %v1282_v63  ;;  %v1157_v42 = vmul.f32 %v2555_v19, %v3453_v15  ;;  %v1312_v15 = vsel %vm128_vm1, %v3507_v16, 0.0  ;;  %v3800_v19 = vsub.s32 %v1497_v11, %v3391_v54 }
 0x2d8   :  { %1247 = vadd.xlane.f32.xlu1 %v1246_v1  ;;  %v1455_v1 = vadd.s32 4294967280, %v3737_v23 }
 0x2d9   :  { %v1303_v51 = vsel %vm128_vm1, %v1157_v42, 0.0 }
 0x2da   :  { %v3751_v46 = vsub.s32 %v1455_v1, %v3391_v54 }
 0x2db   :  { %1208 = vadd.xlane.f32.xlu0 %v1207_v47  ;;  %v1504_v47 = vadd.s32 4294967224, %v3737_v23 }
 0x2dc   :  { %1250 = vadd.xlane.f32.xlu1 %v1249_v55  ;;  %v1469_v55 = vadd.s32 4294967264, %v3737_v23 }
 0x2dd   :  { %v3769_v62 = vsub.s32 %v1504_v47, %v3391_v54 }
 0x2df   :  { %1383 = vadd.xlane.f32.xlu0 %v1382_v37  ;;  %v1476_v37 = vadd.s32 4294967256, %v3737_v23 }
 0x2e0   :  { %1253 = vadd.xlane.f32.xlu1 %v1252_v56  ;;  %v1518_v56 = vadd.s32 4294967208, %v3737_v23 }
 0x2e1   :  { %v3781_v40 = vsub.s32 %v1476_v37, %v3391_v54 }
 0x2e4   :  { %1256 = vadd.xlane.f32.xlu1 %v1255_v49  ;;  %v3763_v49 = vsub.s32 %v1462_v50, %v3391_v54 }
 0x2e8   :  { %1259 = vadd.xlane.f32.xlu1 %v1258_v10  ;;  %v3772_v10 = vsub.s32 %v1469_v55, %v3391_v54 }
 0x2ec   :  { %1292 = vadd.xlane.f32.xlu1 %v1291_v52  ;;  %v3778_v52 = vsub.s32 %v1511_v12, %v3391_v54 }
 0x2f0   :  { %1295 = vadd.xlane.f32.xlu1 %v1294_v61  ;;  %v3788_v61 = vsub.s32 %v1518_v56, %v3391_v54 }
 0x2f4   :  { %1298 = vadd.xlane.f32.xlu1 %v1297_v3  ;;  %v3794_v3 = vsub.s32 %v1525_v21, %v3391_v54 }
 0x2f8   :  { %1268 = vadd.xlane.f32.xlu1 %v1267_v22 }
 0x2fc   :  { %1301 = vadd.xlane.f32.xlu1 %v1300_v6 }
 0x300   :  { %1271 = vadd.xlane.f32.xlu1 %v1270_v27 }
 0x304   :  { %1304 = vadd.xlane.f32.xlu1 %v1303_v51 }
 0x308   :  { %1274 = vadd.xlane.f32.xlu1 %v1273_v4 }
 0x30c   :  { %1277 = vadd.xlane.f32.xlu1 %v1276_v0 }
 0x310   :  { %1310 = vadd.xlane.f32.xlu1 %v1309_v18 }
 0x314   :  { %1280 = vadd.xlane.f32.xlu1 %v1279_v39 }
 0x318   :  { %1313 = vadd.xlane.f32.xlu1 %v1312_v15 }
 0x31c   :  { %1316 = vadd.xlane.f32.xlu1 %v1315_v17 }
 0x31f   :  { %v1212_v60 = vpop.xlane.xlu1 %1211 }
 0x320   :  { %1286 = vadd.xlane.f32.xlu1 %v1285_v31  ;;  %v1344_v32 = vadd.f32 %v3730_v59, %v1212_v60 }
 0x322   :  { %v1556_v27 = vrot.slane %v1344_v32, %v3746_v25 }
 0x324   :  { %v1164_v58 = vpop.xlane.xlu0 %1163 }
 0x325   :  { %v1218_v20 = vpop.xlane.xlu1 %1217  ;;  %v1328_v5 = vadd.f32 %v3730_v59, %v1164_v58 }
 0x326   :  { %v1346_v30 = vadd.f32 %v3730_v59, %v1218_v20 }
 0x327   :  { %v1447_v18 = vrot.slane %v1328_v5, %v3746_v25 }
 0x328   :  { %v1167_v24 = vpop.xlane.xlu0 %1166 }
 0x329   :  { %v1221_v57 = vpop.xlane.xlu1 %1220  ;;  %v1329_v8 = vadd.f32 %v3730_v59, %v1167_v24  ;;  %v1565_v24 = vrot.slane %v1346_v30, %v3751_v46 }
 0x32a   :  { %v1347_v22 = vadd.f32 %v3730_v59, %v1221_v57 }
 0x32b   :  { %v1452_v42 = vrot.slane %v1329_v8, %v3757_v29 }
 0x32c   :  { %v1170_v34 = vpop.xlane.xlu0 %1169  ;;  %v1570_v57 = vrot.slane %v1347_v22, %v3763_v49 }
 0x32d   :  { %v3734_v45 = vpop.xlane.xlu1 %1190  ;;  %v1330_v41 = vadd.f32 %v3730_v59, %v1170_v34  ;;  %v1454_v14 = vsel %vm1453_vm3, %v1452_v42, %v1447_v18 }
 0x32e   :  { %v1337_v44 = vadd.f32 %v3730_v59, %v3734_v45 }
 0x32f   :  { %v1459_v31 = vrot.slane %v1330_v41, %v3751_v46 }
 0x330   :  { %v1173_v16 = vpop.xlane.xlu0 %1172 }
 0x331   :  { %v1224_v53 = vpop.xlane.xlu1 %1223  ;;  %v1331_v43 = vadd.f32 %v3730_v59, %v1173_v16  ;;  %v1461_v12 = vsel %vm1460_vm4, %v1459_v31, %v1454_v14 }
 0x332   :  { %v1348_v39 = vadd.f32 %v3730_v59, %v1224_v53  ;;  %v1532_v53 = vadd.s32 4294967192, %v3737_v23 }
 0x333   :  { %v1466_v34 = vrot.slane %v1331_v43, %v3763_v49 }
 0x334   :  { %v1176_v35 = vpop.xlane.xlu0 %1175 }
 0x335   :  { %v3739_v63 = vpop.xlane.xlu1 %1193  ;;  %v1332_v51 = vadd.f32 %v3730_v59, %v1176_v35  ;;  %v1468_v21 = vsel %vm1467_vm5, %v1466_v34, %v1461_v12 }
 0x336   :  { %v1338_v5 = vadd.f32 %v3730_v59, %v3739_v63 }
 0x337   :  { %v1473_v35 = vrot.slane %v1332_v51, %v3772_v10 }
 0x338   :  { %v1179_v26 = vpop.xlane.xlu0 %1178 }
 0x339   :  { %v1227_v28 = vpop.xlane.xlu1 %1226  ;;  %v1333_v15 = vadd.f32 %v3730_v59, %v1179_v26  ;;  %v1575_v26 = vrot.slane %v1348_v39, %v3772_v10  ;;  %v1475_v8 = vsel %vm1474_vm6, %v1473_v35, %v1468_v21  ;;  %v3852_v39 = vsub.s32 %v1532_v53, %v3391_v54 }
 0x33a   :  { %v1349_v60 = vadd.f32 %v3730_v59, %v1227_v28 }
 0x33b   :  { %v1480_v47 = vrot.slane %v1333_v15, %v3781_v40 }
 0x33c   :  { %v1182_v38 = vpop.xlane.xlu0 %1181  ;;  %v1580_v37 = vrot.slane %v1349_v60, %v3781_v40 }
 0x33d   :  { %v3774_v48 = vpop.xlane.xlu1 %1196  ;;  %v1334_v58 = vadd.f32 %v3730_v59, %v1182_v38  ;;  %v1482_v43 = vsel %vm1481_vm7, %v1480_v47, %v1475_v8 }
 0x33e   :  { %v1339_v45 = vadd.f32 %v3730_v59, %v3774_v48  ;;  %v1515_v48 = vrot.slane %v1338_v5, %v3778_v52 }
 0x33f   :  { %v1487_v2 = vrot.slane %v1334_v58, %v3784_v7 }
 0x340   :  { %v1215_v6 = vpop.xlane.xlu0 %1214  ;;  %v1522_v31 = vrot.slane %v1339_v45, %v3788_v61 }
 0x341   :  { %v1345_v4 = vadd.f32 %v3730_v59, %v1215_v6  ;;  %v1230_v0 = vpop.xlane.xlu1 %1229  ;;  %v1489_v42 = vsel %vm1488_vm8, %v1487_v2, %v1482_v43 }
 0x342   :  { %v1350_v17 = vadd.f32 %v3730_v59, %v1230_v0 }
 0x343   :  { %v1560_v20 = vrot.slane %v1345_v4, %v3757_v29  ;;  %v1508_v4 = vrot.slane %v1337_v44, %v3769_v62 }
 0x344   :  { %v1185_v16 = vpop.xlane.xlu0 %1184  ;;  %v1585_v28 = vrot.slane %v1350_v17, %v3784_v7 }
 0x345   :  { %v1561_v1 = vsel %vm1453_vm3, %v1560_v20, %v1556_v27  ;;  %v1335_v33 = vadd.f32 %v3730_v59, %v1185_v16  ;;  %v1200_v50 = vpop.xlane.xlu1 %1199 }
 0x346   :  { %v1566_v55 = vsel %vm1460_vm4, %v1565_v24, %v1561_v1  ;;  %v1340_v51 = vadd.f32 %v3730_v59, %v1200_v50 }
 0x347   :  { %v1571_v56 = vsel %vm1467_vm5, %v1570_v57, %v1566_v55  ;;  %v1494_v11 = vrot.slane %v1335_v33, %v3791_v36 }
 0x348   :  { %v1576_v38 = vsel %vm1474_vm6, %v1575_v26, %v1571_v56  ;;  %v1188_v32 = vpop.xlane.xlu0 %1187  ;;  %v1529_v24 = vrot.slane %v1340_v51, %v3794_v3 }
 0x349   :  { %v1581_v41 = vsel %vm1481_vm7, %v1580_v37, %v1576_v38  ;;  %v1336_v30 = vadd.f32 %v3730_v59, %v1188_v32  ;;  %v1233_v22 = vpop.xlane.xlu1 %1232  ;;  %v1496_v0 = vsel %vm1495_vm9, %v1494_v11, %v1489_v42 }
 0x34a   :  { %v1586_v6 = vsel %vm1488_vm8, %v1585_v28, %v1581_v41  ;;  %v1351_v27 = vadd.f32 %v3730_v59, %v1233_v22 }
 0x34b   :  { %v1501_v63 = vrot.slane %v1336_v30, %v3800_v19 }
 0x34c   :  { %v1590_v18 = vrot.slane %v1351_v27, %v3791_v36  ;;  %v3876_v5 = vpop.xlane.xlu0 %1205 }
 0x34d   :  { %v1503_v15 = vsel %vm1502_vm10, %v1501_v63, %v1496_v0  ;;  %v1203_v17 = vpop.xlane.xlu1 %1202 }
 0x34e   :  { %v1510_v60 = vsel %vm1509_vm11, %v1508_v4, %v1503_v15  ;;  %v1591_v58 = vsel %vm1495_vm9, %v1590_v18, %v1586_v6  ;;  %v1341_v20 = vadd.f32 %v3730_v59, %v1203_v17 }
 0x34f   :  { %v1517_v57 = vsel %vm1516_vm12, %v1515_v48, %v1510_v60 }
 0x350   :  { %v1524_v34 = vsel %vm1523_vm13, %v1522_v31, %v1517_v57  ;;  %v1536_v16 = vrot.slane %v1341_v20, %v3852_v39  ;;  %v1290_v30 = vpop.xlane.xlu0 %1289 }
 0x351   :  { %v1531_v53 = vsel %vm1530_vm14, %v1529_v24, %v1524_v34  ;;  %v1236_v14 = vpop.xlane.xlu1 %1235 }
 0x352   :  { %v3866_v35 = vsel %vm1537_vm15, %v1536_v16, %v1531_v53  ;;  %v1352_v1 = vadd.f32 %v3730_v59, %v1236_v14  ;;  %v1539_v16 = vadd.s32 4294967184, %v3737_v23 }
 0x354   :  { %v1595_v33 = vrot.slane %v1352_v1, %v3800_v19  ;;  %v1263_v45 = vpop.xlane.xlu0 %1262 }
 0x355   :  { %v1239_v50 = vpop.xlane.xlu1 %1238 }
 0x356   :  { %v1596_v26 = vsel %vm1502_vm10, %v1595_v33, %v1591_v58  ;;  %v1353_v47 = vadd.f32 %v3730_v59, %v1239_v50  ;;  %v1370_v50 = vadd.f32 %v3730_v59, %v1290_v30 }
 0x358   :  { %v1600_v55 = vrot.slane %v1353_v47, %v3769_v62  ;;  %v1266_v27 = vpop.xlane.xlu0 %1265 }
 0x359   :  { %v1242_v28 = vpop.xlane.xlu1 %1241 }
 0x35a   :  { %v3874_v12 = vsel %vm1509_vm11, %v1600_v55, %v1596_v26  ;;  %v1354_v4 = vadd.f32 %v3730_v59, %v1242_v28  ;;  %v1361_v28 = vadd.f32 %v3730_v59, %v1263_v45 }
 0x35c   :  { %v1605_v58 = vrot.slane %v1354_v4, %v3746_v25  ;;  %v1308_v20 = vpop.xlane.xlu0 %1307  ;;  %v1362_v4 = vadd.f32 %v3730_v59, %v1266_v27 }
 0x35d   :  { %v1245_v37 = vpop.xlane.xlu1 %1244 }
 0x35e   :  { %v1355_v42 = vadd.f32 %v3730_v59, %v1245_v37 }
 0x360   :  { %v1609_v48 = vrot.slane %v1355_v42, %v3757_v29  ;;  %v1684_v42 = vrot.slane %v1370_v50, %v3746_v25 }
 0x361   :  { %v1248_v2 = vpop.xlane.xlu1 %1247 }
 0x362   :  { %v1356_v63 = vadd.f32 %v3730_v59, %v1248_v2  ;;  %v1610_v53 = vsel %vm1453_vm3, %v1609_v48, %v1605_v58 }
 0x364   :  { %v1614_v31 = vrot.slane %v1356_v63, %v3751_v46 }
 0x365   :  { %v1251_v56 = vpop.xlane.xlu1 %1250 }
 0x366   :  { %v1357_v0 = vadd.f32 %v3730_v59, %v1251_v56  ;;  %v1615_v26 = vsel %vm1460_vm4, %v1614_v31, %v1610_v53 }
 0x368   :  { %v1619_v24 = vrot.slane %v1357_v0, %v3763_v49 }
 0x369   :  { %v1254_v44 = vpop.xlane.xlu1 %1253 }
 0x36a   :  { %v1358_v18 = vadd.f32 %v3730_v59, %v1254_v44  ;;  %v1620_v37 = vsel %vm1467_vm5, %v1619_v24, %v1615_v26 }
 0x36c   :  { %v1624_v57 = vrot.slane %v1358_v18, %v3772_v10 }
 0x36d   :  { %v1257_v21 = vpop.xlane.xlu1 %1256 }
 0x36e   :  { %v1359_v15 = vadd.f32 %v3730_v59, %v1257_v21  ;;  %v1625_v56 = vsel %vm1474_vm6, %v1624_v57, %v1620_v37 }
 0x370   :  { %v1629_v14 = vrot.slane %v1359_v15, %v3781_v40 }
 0x371   :  { %v1260_v38 = vpop.xlane.xlu1 %1259 }
 0x372   :  { %v1360_v60 = vadd.f32 %v3730_v59, %v1260_v38  ;;  %v3906_v38 = vsub.s32 %v1539_v16, %v3391_v54 }
 0x374   :  { %v1634_v47 = vrot.slane %v1360_v60, %v3784_v7 }
 0x375   :  { %v1293_v11 = vpop.xlane.xlu1 %1292 }
 0x376   :  { %v1371_v34 = vadd.f32 %v3730_v59, %v1293_v11  ;;  %v1284_v11 = vpop.xlane.xlu0 %1283 }
 0x378   :  { %v1688_v44 = vrot.slane %v1371_v34, %v3757_v29 }
 0x379   :  { %v1296_v32 = vpop.xlane.xlu1 %1295 }
 0x37a   :  { %v1372_v1 = vadd.f32 %v3730_v59, %v1296_v32  ;;  %v1546_v32 = vadd.s32 4294967176, %v3737_v23  ;;  %v1689_v48 = vsel %vm1453_vm3, %v1688_v44, %v1684_v42  ;;  %vm1730_vm3 = vcmask 1041409  }
 0x37c   :  { %v1693_v30 = vrot.slane %v1372_v1, %v3751_v46  ;;  %v1549_v24 = vsub.s32 %v1546_v32, %v3391_v54 }
 0x37d   :  { %v1299_v8 = vpop.xlane.xlu1 %1298 }
 0x37e   :  { %v1373_v55 = vadd.f32 %v3730_v59, %v1299_v8  ;;  %v1630_v8 = vsel %vm1481_vm7, %v1629_v14, %v1625_v56  ;;  %v1694_v31 = vsel %vm1460_vm4, %v1693_v30, %v1689_v48  ;;  %v1389_v14 = vadd.s32 128, %v3737_v23  ;;  %v2566_v48 = vld [vmem:[#allocation2] ss:$0 sm:$0xff] }
 0x37f   :  { %v1342_v23 = vadd.f32 %v3730_v59, %v3876_v5 }
 0x380   :  { %v1698_v63 = vrot.slane %v1373_v55, %v3763_v49  ;;  %v1376_v49 = vadd.f32 %v3730_v59, %v1308_v20  ;;  %v1209_v20 = vpop.xlane.xlu0 %1208  ;;  %vm1391_vm4 = vcmp.lt.s32.totalorder %v1389_v14, 196 }
 0x381   :  { %v1269_v41 = vpop.xlane.xlu1 %1268  ;;  %v1343_v55 = vadd.f32 %v3730_v59, %v1209_v20 }
 0x382   :  { %v1363_v29 = vadd.f32 %v3730_v59, %v1269_v41  ;;  %v1713_v1 = vrot.slane %v1376_v49, %v3784_v7  ;;  %v1368_v7 = vadd.f32 %v3730_v59, %v1284_v11 }
 0x383   :  { %v1550_v5 = vrot.slane %v1343_v55, %v1549_v24 }
 0x384   :  { %v1674_v30 = vrot.slane %v1368_v7, %v3906_v38 }
 0x385   :  { %v1302_v22 = vpop.xlane.xlu1 %1301 }
 0x386   :  { %v1374_v2 = vadd.f32 %v3730_v59, %v1302_v22  ;;  %v1635_v22 = vsel %vm1488_vm8, %v1634_v47, %v1630_v8  ;;  %v1543_v8 = vrot.slane %v1342_v23, %v3906_v38 }
 0x388   :  { %v1703_v0 = vrot.slane %v1374_v2, %v3772_v10  ;;  %v1699_v10 = vsel %vm1467_vm5, %v1698_v63, %v1694_v31  ;;  %vm1544_vm5 = vcmask 982912  }
 0x389   :  { %v1272_v43 = vpop.xlane.xlu1 %1271  ;;  %v1545_v42 = vsel %vm1544_vm5, %v1543_v8, %v3866_v35 }
 0x38a   :  { %v1364_v18 = vadd.f32 %v3730_v59, %v1272_v43  ;;  %v1649_v43 = vrot.slane %v1363_v29, %v3769_v62  ;;  %v1704_v57 = vsel %vm1474_vm6, %v1703_v0, %v1699_v10  ;;  %vm1551_vm6 = vcmask 1048512  }
 0x38b   :  { %v1552_v29 = vsel %vm1551_vm6, %v1550_v5, %v1545_v42  ;;  %v4061_v42 = vld [vmem:[#allocation7_spill] sm:$0xff] }
 0x38c   :  { %v1654_v34 = vrot.slane %v1364_v18, %v3778_v52  ;;  %v1384_v18 = vpop.xlane.xlu0 %1383 }
 0x38d   :  { %v1305_v6 = vpop.xlane.xlu1 %1304 }
 0x38e   :  { %v1375_v21 = vadd.f32 %v3730_v59, %v1305_v6  ;;  %v1639_v6 = vrot.slane %v1361_v28, %v3791_v36 }
 0x390   :  { %v1708_v46 = vrot.slane %v1375_v21, %v3781_v40  ;;  %v1640_v41 = vsel %vm1495_vm9, %v1639_v6, %v1635_v22 }
 0x391   :  { %v1275_v51 = vpop.xlane.xlu1 %1274 }
 0x392   :  { %v1365_v25 = vadd.f32 %v3730_v59, %v1275_v51  ;;  %v1644_v51 = vrot.slane %v1362_v4, %v3800_v19 }
 0x394   :  { %v1659_v16 = vrot.slane %v1365_v25, %v3788_v61 }
 0x395   :  { %v1278_v17 = vpop.xlane.xlu1 %1277 }
 0x396   :  { %v1366_v27 = vadd.f32 %v3730_v59, %v1278_v17  ;;  %v1709_v17 = vsel %vm1481_vm7, %v1708_v46, %v1704_v57  ;;  %vm1737_vm7 = vcmask 1041408  }
 0x398   :  { %v1664_v50 = vrot.slane %v1366_v27, %v3794_v3  ;;  %v1714_v3 = vsel %vm1488_vm8, %v1713_v1, %v1709_v17  ;;  %vm1739_vm8 = vcmask 648192  }
 0x399   :  { %v1311_v33 = vpop.xlane.xlu1 %1310 }
 0x39a   :  { %v1377_v15 = vadd.f32 %v3730_v59, %v1311_v33  ;;  %v1645_v33 = vsel %vm1502_vm10, %v1644_v51, %v1640_v41 }
 0x39b   :  { %v1650_v52 = vsel %vm1509_vm11, %v1649_v43, %v1645_v33 }
 0x39c   :  { %v1718_v53 = vrot.slane %v1377_v15, %v3791_v36  ;;  %v1655_v36 = vsel %vm1516_vm12, %v1654_v34, %v1650_v52 }
 0x39d   :  { %v1281_v45 = vpop.xlane.xlu1 %1280 }
 0x39e   :  { %v1367_v58 = vadd.f32 %v3730_v59, %v1281_v45  ;;  %v1719_v37 = vsel %vm1495_vm9, %v1718_v53, %v1714_v3  ;;  %vm1809_vm9 = vcmask 654336   ;;  %v1979_v3 = vld [vmem:[%s4036_s15 + $0x18] sm:$0xff] }
 0x3a0   :  { %v1669_v28 = vrot.slane %v1367_v58, %v3852_v39 }
 0x3a1   :  { %v1314_v60 = vpop.xlane.xlu1 %1313 }
 0x3a2   :  { %v1378_v40 = vadd.f32 %v3730_v59, %v1314_v60 }
 0x3a4   :  { %v1723_v26 = vrot.slane %v1378_v40, %v3800_v19  ;;  %v1660_v19 = vsel %vm1523_vm13, %v1659_v16, %v1655_v36  ;;  %v1981_v36 = vld [vmem:[%s4036_s15 + $0x28] sm:$0xff] }
 0x3a5   :  { %v1317_v47 = vpop.xlane.xlu1 %1316  ;;  %v1665_v39 = vsel %vm1530_vm14, %v1664_v50, %v1660_v19  ;;  %v1806_v50 = vsub.s32 1, %v3391_v54  ;;  %v1982_v54 = vld [vmem:[%s4036_s15 + $0x30] sm:$0xff] }
 0x3a6   :  { %v1379_v61 = vadd.f32 %v3730_v59, %v1317_v47  ;;  %v1724_v56 = vsel %vm1502_vm10, %v1723_v26, %v1719_v37  ;;  %v1670_v21 = vsel %vm1537_vm15, %v1669_v28, %v1665_v39  ;;  %v1978_v19 = vld [vmem:[%s4036_s15 + $0x10] sm:$0xff]  ;;  %v1977_v37 = vld [vmem:[%s4036_s15 + $0x8] sm:$0xff] }
 0x3a7   :  { %v1675_v22 = vsel %vm1544_vm5, %v1674_v30, %v1670_v21 }
 0x3a8   :  { %v1728_v2 = vrot.slane %v1379_v61, %v3769_v62  ;;  %v1983_v61 = vld [vmem:[%s4036_s15 + $0x38] sm:$0xff] }
 0x3a9   :  { %v1287_v44 = vpop.xlane.xlu1 %1286 }
 0x3aa   :  { %v1369_v11 = vadd.f32 %v3730_v59, %v1287_v44  ;;  %v1729_v32 = vsel %vm1509_vm11, %v1728_v2, %v1724_v56  ;;  %v1976_v2 = vld [vmem:[%s4036_s15] sm:$0xff] }
 0x3ab   :  { %v1732_v62 = vsel %vm1730_vm3, %v1729_v32, %v3874_v12  ;;  %v1386_v12 = vadd.f32 %v2566_v48, %v1384_v18 }
 0x3ac   :  { %v1679_v45 = vrot.slane %v1369_v11, %v1549_v24  ;;  %v1736_v63 = vsel %vm1391_vm4, %v1732_v62, -1e+30  ;;  %v4059_v11 = vld [vmem:[#allocation6_spill] sm:$0xff] }
 0x3ad   :  { %v1740_v0 = vsel %vm1739_vm8, %v1736_v63, -inf  ;;  %v4060_v32 = vmax.f32 %v4059_v11, 0.0 }
 0x3ae   :  { %v1680_v6 = vsel %vm1551_vm6, %v1679_v45, %v1675_v22 }
 0x3af   :  { %v1731_v59 = vsel %vm1730_vm3, %v1680_v6, %v1552_v29 }
 0x3b0   :  { %v1738_v4 = vsel %vm1737_vm7, %v1731_v59, -inf }
 0x3b1   :  { %v1741_v38 = vmax.f32 %v1738_v4, %v1740_v0 }
 0x3b3   :  { %1742 = vmax.xlane.f32.xlu1 %v1741_v38 }
 0x43c   :  { %v1743_v46 = vpop.xlane.xlu1 %1742 }
 0x43d   :  { %v1744_v25 = vmax.f32 %v1743_v46, %v1386_v12 }
 0x43f   :  { %v1756_v15 = vsub.f32 %v1386_v12, %v1744_v25  ;;  %1747 = vperm.xlu0 %2446, %v1744_v25  }
 0x441   :  { %v1757_v51 = vmul.f32 1.442695, %v1756_v15 }
 0x4ba   :  { %v1748_v35 = vpop.permute.xlu0 %1747 }
 0x4bb   :  { %v1750_v49 = vsub.f32 %v1731_v59, %v1748_v35  ;;  %v1751_v41 = vsub.f32 %v1736_v63, %v1748_v35  ;;  %v2145_v63 = vld [vmem:[%s4037_s16] ss:$0 sm:$0xff] }
 0x4bd   :  { %v1752_v31 = vmul.f32 1.442695, %v1750_v49  ;;  %v1754_v27 = vmul.f32 1.442695, %v1751_v41 }
 0x4bf   :  { %2556 = vpow2.f32 %v1752_v31 }
 0x4c0   :  { %2558 = vpow2.f32 %v1754_v27 }
 0x4c1   :  { %2560 = vpow2.f32 %v1757_v51 }
 0x4cc   :  { %v2557_v60 = vpop.eup %2556 }
 0x4cd   :  { %v2559_v10 = vpop.eup %2558  ;;  %v1759_v43 = vsel %vm1737_vm7, %v2557_v60, 0.0 }
 0x4ce   :  { %v1760_v58 = vsel %vm1739_vm8, %v2559_v10, 0.0  ;;  %v2561_v24 = vpop.eup %2560 }
 0x4cf   :  { %v1761_v40 = vadd.f32 %v1760_v58, %v1759_v43 }
 0x4d1   :  { %1762 = vadd.xlane.f32.xlu1 %v1761_v40 }
 0x55a   :  { %v1763_v20 = vpop.xlane.xlu1 %1762 }
 0x55b   :  { %v1764_v57 = vadd.f32 %v2561_v24, %v1763_v20 }
 0x55d   :  { %2562 = vrcp.f32 %v1764_v57 }
 0x56a   :  { %v2563_v34 = vpop.eup %2562 }
 0x56b   :  { %1769 = vperm.xlu1 %2447, %v2563_v34   ;;  %v1774_v17 = vmul.f32 %v2563_v34, %v2561_v24 }
 0x56d   :  { %1965 = vperm.xlu0 %2446, %v1774_v17  }
 0x5e6   :  { %v1770_v16 = vpop.permute.xlu1 %1769 }
 0x5e7   :  { %v1772_v53 = vmul.f32 %v2557_v60, %v1770_v16  ;;  %v1773_v14 = vmul.f32 %v2559_v10, %v1770_v16 }
 0x5e8   :  { %v1966_v56 = vpop.permute.xlu0 %1965 }
 0x5e9   :  { %v1777_v1 = vcombine.low %v1772_v53, %v1773_v14  ;;  %v1968_v8 = vmul.f32 %v1966_v56, %v4060_v32 }
 0x5eb   :  { %v1784_v33 = vrot.slane %v1777_v1, %v3402_v9 }
 0x5ed   :  { %v1785_v26 = vcombine.high %v1784_v33, %v1784_v33  ;;  %v1792_v47 = vrot.slane %v1784_v33, %v3402_v9 }
 0x5ef   :  { %v1799_v55 = vrot.slane %v1785_v26, %v3402_v9  ;;  %v1807_v52 = vrot.slane %v1792_v47, %v1806_v50  ;;  %v1803_v28 = vrot.slane %v1792_v47, %v3407_v13  ;;  %v4058_v9 = vmov 0.0  }
 0x5f1   :  { %v1885_v23 = vrot.slane %v1799_v55, %v3407_v13  ;;  %2143 = vmatprep.mubr.msk.f32.mxu1 %vm1809_vm9, %v1807_v52  ;;  %v1889_v7 = vrot.slane %v1799_v55, %v1806_v50  ;;  %v1980_v13 = vld [vmem:[%s4036_s15 + $0x20] sm:$0xff] }
 0x5f2   :  { %1877 = vmatmul.mubr.f32.vlgmr.msra.gmra.mxu1 %v1803_v28 }
 0x5f3   :  { %2144 = vmatprep.mubr.msk.f32.mxu0 %vm1809_vm9, %v1889_v7  ;;  %2423 = vmatpush3.msra.mxu1 %v1983_v61 }
 0x5f4   :  { %1958 = vmatmul.mubr.f32.vlgmr.msra.gmra.mxu0 %v1885_v23  ;;  %2424 = vmatprep.subr.mxu1 %v4058_v9 }
 0x5f5   :  { %2425 = vmatpush3.msra.mxu1 %v1982_v54  ;;  %2438 = vmatprep.mubr.msk.f32.mxu1 %vm2590_vm0, %v4058_v9 }
 0x5f6   :  { %2426 = vmatprep.subr.mxu1 %v4058_v9 }
 0x5f7   :  { %2427 = vmatpush3.msra.mxu1 %v1981_v36 }
 0x5f8   :  { %2428 = vmatprep.subr.mxu1 %v4058_v9 }
 0x5f9   :  { %2429 = vmatpush3.msra.mxu1 %v1980_v13 }
 0x5fa   :  { %2430 = vmatprep.subr.mxu1 %v4058_v9 }
 0x5fb   :  { %2431 = vmatpush3.msra.mxu1 %v1979_v3 }
 0x5fc   :  { %2432 = vmatprep.subr.mxu1 %v4058_v9 }
 0x5fd   :  { %2433 = vmatpush3.msra.mxu1 %v1978_v19 }
 0x5fe   :  { %2434 = vmatprep.subr.mxu1 %v4058_v9 }
 0x5ff   :  { %2435 = vmatpush3.msra.mxu1 %v1977_v37 }
 0x600   :  { %2436 = vmatprep.subr.mxu1 %v4058_v9 }
 0x601   :  { %2437 = vmatpush3.msra.mxu1 %v1976_v2 }
 0x6b2   :  { %v1878_v39 = vpop.f32.mrf.mxu1 }
 0x6b4   :  { %v1880_v44 = vpop.f32.mrf.mxu1  ;;  %v1959_v5 = vpop.f32.mrf.mxu0 }
 0x6b5   :  { %v1971_v21 = vrot.slane %v1959_v5, 7 }
 0x6b6   :  { %v1961_v30 = vpop.f32.mrf.mxu0 }
 0x6b7   :  { %v1972_v62 = vsel %vm1730_vm3, %v1971_v21, %v1878_v39 }
 0x6b8   :  { %v1974_v45 = vadd.f32 %v1972_v62, %v1968_v8 }
 0x6ba   :  { %v1975_v22 = vadd.f32 %v4061_v42, %v1974_v45 }
 0x6bc   :  { %2439 = vmatmul.mubr.msk.f32.vlgmr.msra.gmra.mxu1 %vm128_vm1, %v1975_v22 }
 0x77c   :  { %v2060_v29 = vpop.f32.mrf.mxu1 }
 0x77d   :  { %v2061_v6 = vadd.f32 %v2145_v63, %v2060_v29 }
 0x77e   :  { %v2440_v59 = vpop.f32.mrf.mxu1 }
 0x77f   :  { %2564 = vtanh.f32 %v2061_v6 }
 0x78c   :  { %v2565_v4 = vpop.eup %2564 }
 0x78d   :  { %2065 = vst.msk [vmem:[#allocation3] sm:$0x3] %vm1381_vm2, %v2565_v4 }
 0x78e   :  { %2578 = shalt.err (!%p2575_p4)
}
 0x78f   :  { %2075 = dma.vmem_to_hbm [thread:$0]  %s2073_s2, 32, %s4038_s17, [#allocation4]  }
 0x790   :  { %2587 = dma.done.wait [#allocation4], 32  }
 0x791   :  { %2588 = vsyncadd [#allocation4], 4294967264 }
 0x792   :  { %2079 = vsyncpa [#allocation4], 1 }

// kernel: tpu_custom_call.1
= control target key start
LH: loop header
LB: loop body
LE: loop exit
PB: predicated region body
PF: predicated region fallthrough
CT: control target
= control target key end

     0   :  { %s4021_s0 = inlined_call_operand.vmem [shape: f32[2,64], index: 0, kind: input, shape index: {}]   ;;  %s4022_s1 = inlined_call_operand.vmem [shape: f32[2,64], index: 1, kind: input, shape index: {}]   ;;  %s4023_s2 = inlined_call_operand.vmem [shape: f32[2,208,64], index: 2, kind: input, shape index: {}]   ;;  %s4024_s3 = inlined_call_operand.vmem [shape: f32[64,64], index: 3, kind: input, shape index: {}]   ;;  %s4025_s4 = inlined_call_operand.vmem [shape: f32[1,64], index: 4, kind: input, shape index: {}]   ;;  %s4026_s5 = inlined_call_operand.vmem [shape: f32[64,64], index: 5, kind: input, shape index: {}]   ;;  %s4027_s6 = inlined_call_operand.vmem [shape: f32[1,64], index: 6, kind: input, shape index: {}]   ;;  %s4028_s7 = inlined_call_operand.vmem [shape: f32[64,64], index: 7, kind: input, shape index: {}]   ;;  %s4029_s8 = inlined_call_operand.vmem [shape: f32[1,64], index: 8, kind: input, shape index: {}]   ;;  %s4030_s9 = inlined_call_operand.vmem [shape: f32[64,64], index: 9, kind: input, shape index: {}]   ;;  %s4031_s10 = inlined_call_operand.vmem [shape: f32[1,64], index: 10, kind: input, shape index: {}]   ;;  %s4032_s11 = inlined_call_operand.vmem [shape: f32[64,64], index: 11, kind: input, shape index: {}]   ;;  %s4033_s12 = inlined_call_operand.vmem [shape: f32[1,64], index: 12, kind: input, shape index: {}]   ;;  %s4034_s13 = inlined_call_operand.vmem [shape: f32[1,64], index: 13, kind: input, shape index: {}]   ;;  %s4035_s14 = inlined_call_operand.<no memory space> [shape: f32[1,1], index: 14, kind: input, shape index: {}]   ;;  %s4036_s15 = inlined_call_operand.vmem [shape: f32[64,64], index: 15, kind: input, shape index: {}]   ;;  %s4037_s16 = inlined_call_operand.vmem [shape: f32[1,64], index: 16, kind: input, shape index: {}]   ;;  %s4038_s17 = inlined_call_operand.hbm [shape: f32[2,64], index: 17, kind: output, shape index: {}]  }
   0x1   :  { %4045 = sst [smem:[#allocation11_spill]] %s4021_s0  ;;  %v22_v0 = vstv %s4035_s14 }
   0x2   :  { %4046 = sst [smem:[#allocation12_spill]] %s4022_s1  ;;  %23 = vst [vmem:[#allocation2] sm:$0x1] %v22_v0 }
   0x3   :  { %v617_v1 = vld [vmem:[%s4026_s5 + $0x38] sm:$0xff]  ;;  %v4040_v2 = vmov 0.0   ;;  %v616_v3 = vld [vmem:[%s4026_s5 + $0x30] sm:$0xff]  ;;  %vm2590_vm0 = vmmov 0   ;;  %v615_v4 = vld [vmem:[%s4026_s5 + $0x28] sm:$0xff] }
   0x4   :  { %2346 = vmatprep.subr.mxu1 %v4040_v2  ;;  %2362 = vmatprep.mubr.msk.f32.mxu1 %vm2590_vm0, %v4040_v2  ;;  %v614_v5 = vld [vmem:[%s4026_s5 + $0x20] sm:$0xff] }
   0x5   :  { %2347 = vmatpush3.msra.mxu1 %v617_v1 }
   0x6   :  { %2348 = vmatprep.subr.mxu1 %v4040_v2 }
   0x7   :  { %2349 = vmatpush3.msra.mxu1 %v616_v3 }
   0x8   :  { %2350 = vmatprep.subr.mxu1 %v4040_v2 }
   0x9   :  { %24 = vsyncpa [#allocation4], 0  ;;  %2351 = vmatpush3.msra.mxu1 %v615_v4  ;;  %v613_v6 = vld [vmem:[%s4026_s5 + $0x18] sm:$0xff]  ;;  %v612_v7 = vld [vmem:[%s4026_s5 + $0x10] sm:$0xff]  ;;  %s4047_s28 = sld [smem:[#allocation12_spill]]  ;;  %vm128_vm1 = vcmask 523264  }
   0xa   :  { %2352 = vmatprep.subr.mxu1 %v4040_v2  ;;  %v611_v8 = vld [vmem:[%s4026_s5 + $0x8] sm:$0xff]  ;;  %v610_v9 = vld [vmem:[%s4026_s5] sm:$0xff]  ;;  %v706_v11 = vld [vmem:[%s4028_s7 + $0x38] sm:$0xff]  ;;  %s4049_s30 = sld [smem:[#allocation11_spill]]  ;;  %vm1381_vm2 = vcmask 517120   ;;  %vm1453_vm3 = vcmask 130112  }
   0xb   :  { %2353 = vmatpush3.msra.mxu1 %v614_v5  ;;  %v705_v12 = vld [vmem:[%s4028_s7 + $0x30] sm:$0xff]  ;;  %v704_v13 = vld [vmem:[%s4028_s7 + $0x28] sm:$0xff]  ;;  %v703_v14 = vld [vmem:[%s4028_s7 + $0x20] sm:$0xff]  ;;  %vm1460_vm4 = vcmask 195712   ;;  %vm1467_vm5 = vcmask 261312   ;;  %vm1474_vm6 = vcmask 326912  }
   0xc   :  { %2354 = vmatprep.subr.mxu1 %v4040_v2  ;;  %v702_v15 = vld [vmem:[%s4028_s7 + $0x18] sm:$0xff]  ;;  %v701_v16 = vld [vmem:[%s4028_s7 + $0x10] sm:$0xff]  ;;  %v700_v17 = vld [vmem:[%s4028_s7 + $0x8] sm:$0xff]  ;;  %vm1481_vm7 = vcmask 392512   ;;  %vm1488_vm8 = vcmask 458112   ;;  %vm1495_vm9 = vcmask 523712  }
   0xd   :  { %2355 = vmatpush3.msra.mxu1 %v613_v6  ;;  %v699_v18 = vld [vmem:[%s4028_s7] sm:$0xff]  ;;  %v120_v19 = vld [vmem:[%s4024_s3 + $0x38] sm:$0xff]  ;;  %v119_v20 = vld [vmem:[%s4024_s3 + $0x30] sm:$0xff]  ;;  %vm1502_vm10 = vcmask 589312   ;;  %vm1509_vm11 = vcmask 654912   ;;  %vm1516_vm12 = vcmask 720512  }
   0xe   :  { %2356 = vmatprep.subr.mxu1 %v4040_v2  ;;  %2252 = vmatprep.subr.mxu0 %v120_v19  ;;  %v118_v21 = vld [vmem:[%s4024_s3 + $0x28] sm:$0xff]  ;;  %v2772_v22 = vld [vmem:[%s4023_s2] sm:$0xff]  ;;  %v116_v24 = vld [vmem:[%s4024_s3 + $0x18] sm:$0xff]  ;;  %vm1523_vm13 = vcmask 786112   ;;  %vm1530_vm14 = vcmask 851712   ;;  %vm1537_vm15 = vcmask 917312  }
   0xf   :  { %2357 = vmatpush3.msra.mxu1 %v612_v7  ;;  %v112_v10 = vld [vmem:[%s4047_s28] sm:$0x3]  ;;  %2253 = vmatpush3.msra.mxu0 %v120_v19  ;;  %v115_v25 = vld [vmem:[%s4024_s3 + $0x10] sm:$0xff]  ;;  %v114_v26 = vld [vmem:[%s4024_s3 + $0x8] sm:$0xff]  ;;  %s2593_s25 = smov [#allocation3]  }
  0x10   :  { %2358 = vmatprep.subr.mxu1 %v4040_v2  ;;  %2254 = vmatprep.subr.mxu0 %v119_v20  ;;  %v117_v23 = vld [vmem:[%s4024_s3 + $0x20] sm:$0xff]  ;;  %v2794_v28 = vld [vmem:[%s4023_s2 + $0x8] sm:$0xff]  ;;  %v2799_v29 = vld [vmem:[%s4023_s2 + $0x10] sm:$0xff] }
  0x11   :  { %2359 = vmatpush3.msra.mxu1 %v611_v8  ;;  %2268 = vmatprep.mubr.msk.f32.mxu0 %vm128_vm1, %v2772_v22  ;;  %v113_v27 = vld [vmem:[%s4024_s3] sm:$0xff]  ;;  %v2809_v30 = vld [vmem:[%s4023_s2 + $0x18] sm:$0xff]  ;;  %v2823_v32 = vld [vmem:[%s4023_s2 + $0x28] sm:$0xff] }
  0x12   :  { %2360 = vmatprep.subr.mxu1 %v4040_v2  ;;  %2255 = vmatpush3.msra.mxu0 %v119_v20  ;;  %v2814_v31 = vld [vmem:[%s4023_s2 + $0x20] sm:$0xff]  ;;  %v2828_v33 = vld [vmem:[%s4023_s2 + $0x30] sm:$0xff]  ;;  %v2837_v34 = vld [vmem:[%s4023_s2 + $0x38] sm:$0xff] }
  0x13   :  { %2361 = vmatpush3.msra.mxu1 %v610_v9  ;;  %2256 = vmatprep.subr.mxu0 %v118_v21  ;;  %v2842_v35 = vld [vmem:[%s4023_s2 + $0x40] sm:$0xff]  ;;  %v2851_v36 = vld [vmem:[%s4023_s2 + $0x48] sm:$0xff]  ;;  %v2856_v37 = vld [vmem:[%s4023_s2 + $0x50] sm:$0xff] }
  0x14   :  { %2363 = vmatmul.mubr.msk.f32.vlgmr.msra.gmra.mxu1 %vm128_vm1, %v112_v10  ;;  %2365 = vmatprep.subr.mxu1 %v4040_v2  ;;  %v2865_v38 = vld [vmem:[%s4023_s2 + $0x58] sm:$0xff]  ;;  %v2870_v39 = vld [vmem:[%s4023_s2 + $0x60] sm:$0xff]  ;;  %v2879_v40 = vld [vmem:[%s4023_s2 + $0x68] sm:$0xff] }
  0x15   :  { %2366 = vmatpush3.msra.mxu1 %v706_v11  ;;  %2381 = vmatprep.mubr.msk.f32.mxu1 %vm2590_vm0, %v4040_v2  ;;  %v2884_v41 = vld [vmem:[%s4023_s2 + $0x70] sm:$0xff]  ;;  %v2893_v42 = vld [vmem:[%s4023_s2 + $0x78] sm:$0xff]  ;;  %v2898_v43 = vld [vmem:[%s4023_s2 + $0x80] sm:$0xff] }
  0x16   :  { %2367 = vmatprep.subr.mxu1 %v4040_v2  ;;  %2257 = vmatpush3.msra.mxu0 %v118_v21  ;;  %v2907_v44 = vld [vmem:[%s4023_s2 + $0x88] sm:$0xff]  ;;  %v2912_v45 = vld [vmem:[%s4023_s2 + $0x90] sm:$0xff]  ;;  %v2921_v46 = vld [vmem:[%s4023_s2 + $0x98] sm:$0xff] }
  0x17   :  { %2368 = vmatpush3.msra.mxu1 %v705_v12  ;;  %2258 = vmatprep.subr.mxu0 %v117_v23  ;;  %v2926_v47 = vld [vmem:[%s4023_s2 + $0xa0] sm:$0xff]  ;;  %v2935_v48 = vld [vmem:[%s4023_s2 + $0xa8] sm:$0xff]  ;;  %v2940_v49 = vld [vmem:[%s4023_s2 + $0xb0] sm:$0xff] }
  0x18   :  { %2369 = vmatprep.subr.mxu1 %v4040_v2  ;;  %2259 = vmatpush3.msra.mxu0 %v117_v23  ;;  %v2949_v50 = vld [vmem:[%s4023_s2 + $0xb8] sm:$0xff]  ;;  %v2954_v51 = vld [vmem:[%s4023_s2 + $0xc0] sm:$0xff]  ;;  %v2963_v52 = vld [vmem:[%s4023_s2 + $0xc8] sm:$0xff] }
  0x19   :  { %2370 = vmatpush3.msra.mxu1 %v704_v13  ;;  %2260 = vmatprep.subr.mxu0 %v116_v24  ;;  %v2968_v53 = vld [vmem:[%s4023_s2 + $0xd0] sm:$0xff]  ;;  %v2977_v54 = vld [vmem:[%s4023_s2 + $0xd8] sm:$0xff]  ;;  %v2982_v55 = vld [vmem:[%s4023_s2 + $0xe0] sm:$0xff] }
  0x1a   :  { %2371 = vmatprep.subr.mxu1 %v4040_v2  ;;  %2261 = vmatpush3.msra.mxu0 %v116_v24  ;;  %v2991_v56 = vld [vmem:[%s4023_s2 + $0xe8] sm:$0xff]  ;;  %v2996_v57 = vld [vmem:[%s4023_s2 + $0xf0] sm:$0xff]  ;;  %v3005_v58 = vld [vmem:[%s4023_s2 + $0xf8] sm:$0xff] }
  0x1b   :  { %2372 = vmatpush3.msra.mxu1 %v703_v14  ;;  %2262 = vmatprep.subr.mxu0 %v115_v25  ;;  %v2133_v59 = vld [vmem:[%s4027_s6] ss:$0 sm:$0xff]  ;;  %v794_v0 = vld [vmem:[%s4030_s9 + $0x38] sm:$0xff]  ;;  %v793_v1 = vld [vmem:[%s4030_s9 + $0x30] sm:$0xff] }
  0x1c   :  { %2373 = vmatprep.subr.mxu1 %v4040_v2  ;;  %2263 = vmatpush3.msra.mxu0 %v115_v25  ;;  %v792_v3 = vld [vmem:[%s4030_s9 + $0x28] sm:$0xff]  ;;  %v791_v4 = vld [vmem:[%s4030_s9 + $0x20] sm:$0xff]  ;;  %v790_v5 = vld [vmem:[%s4030_s9 + $0x18] sm:$0xff] }
  0x1d   :  { %2374 = vmatpush3.msra.mxu1 %v702_v15  ;;  %2264 = vmatprep.subr.mxu0 %v114_v26  ;;  %v789_v6 = vld [vmem:[%s4030_s9 + $0x10] sm:$0xff]  ;;  %v788_v7 = vld [vmem:[%s4030_s9 + $0x8] sm:$0xff]  ;;  %v787_v8 = vld [vmem:[%s4030_s9] sm:$0xff] }
  0x1e   :  { %2375 = vmatprep.subr.mxu1 %v4040_v2  ;;  %2265 = vmatpush3.msra.mxu0 %v114_v26  ;;  %v111_v9 = vld [vmem:[%s4049_s30] sm:$0x3]  ;;  %v3066_v11 = vld [vmem:[%s4023_s2 + $0x108] sm:$0xff]  ;;  %v3073_v12 = vld [vmem:[%s4023_s2 + $0x110] sm:$0xff] }
  0x1f   :  { %2376 = vmatpush3.msra.mxu1 %v701_v16  ;;  %2266 = vmatprep.subr.mxu0 %v113_v27  ;;  %v3061_v10 = vld [vmem:[%s4023_s2 + $0x100] sm:$0xff]  ;;  %v3082_v13 = vld [vmem:[%s4023_s2 + $0x118] sm:$0xff]  ;;  %v96_v15 = vld [vmem:[%s4023_s2 + $0x128] sm:$0xff] }
  0x20   :  { %2377 = vmatprep.subr.mxu1 %v4040_v2  ;;  %2267 = vmatpush3.msra.mxu0 %v113_v27  ;;  %v3087_v14 = vld [vmem:[%s4023_s2 + $0x120] sm:$0xff]  ;;  %v97_v16 = vld [vmem:[%s4023_s2 + $0x130] sm:$0xff]  ;;  %v883_v19 = vld [vmem:[%s4032_s11 + $0x38] sm:$0xff] }
  0x21   :  { %2378 = vmatpush3.msra.mxu1 %v700_v17  ;;  %2269 = vmatmul.mubr.msk.f32.vlgmr.msra.gmra.mxu0 %vm128_vm1, %v2794_v28  ;;  %v98_v17 = vld [vmem:[%s4023_s2 + $0x138] sm:$0xff]  ;;  %v100_v20 = vld [vmem:[%s4023_s2 + $0x148] sm:$0xff]  ;;  %v882_v21 = vld [vmem:[%s4032_s11 + $0x30] sm:$0xff] }
  0x22   :  { %2379 = vmatprep.subr.mxu1 %v4040_v2  ;;  %1893 = vmatprep.subr.mxu0 %v4040_v2  ;;  %v3123_v23 = vld [vmem:[%s4023_s2 + $0x150] sm:$0xff]  ;;  %v881_v24 = vld [vmem:[%s4032_s11 + $0x28] sm:$0xff]  ;;  %v3133_v25 = vld [vmem:[%s4023_s2 + $0x158] sm:$0xff] }
  0x23   :  { %2380 = vmatpush3.msra.mxu1 %v699_v18  ;;  %2271 = vmatprep.mubr.msk.f32.mxu0 %vm128_vm1, %v2799_v29  ;;  %v99_v18 = vld [vmem:[%s4023_s2 + $0x140] sm:$0xff] }
  0x24   :  { %2384 = vmatprep.subr.mxu1 %v4040_v2  ;;  %v880_v26 = vld [vmem:[%s4032_s11 + $0x20] sm:$0xff]  ;;  %1894 = vmatpush1.msra.mxu0 %v100_v20 }
  0x25   :  { %2272 = vmatmul.mubr.msk.f32.gmra.mxu0 %vm128_vm1, %v2809_v30  ;;  %v3142_v27 = vld [vmem:[%s4023_s2 + $0x160] sm:$0xff]  ;;  %1895 = vmatprep.subr.mxu0 %v4040_v2 }
  0x26   :  { %2274 = vmatprep.mubr.msk.f32.mxu0 %vm128_vm1, %v2814_v31  ;;  %1896 = vmatpush1.msra.mxu0 %v99_v18 }
  0x27   :  { %1897 = vmatprep.subr.mxu0 %v4040_v2 }
  0x28   :  { %1898 = vmatpush1.msra.mxu0 %v98_v17 }
  0x29   :  { %2275 = vmatmul.mubr.msk.f32.gmra.mxu0 %vm128_vm1, %v2823_v32  ;;  %1899 = vmatprep.subr.mxu0 %v4040_v2 }
  0x2a   :  { %2277 = vmatprep.mubr.msk.f32.mxu0 %vm128_vm1, %v2828_v33  ;;  %1900 = vmatpush1.msra.mxu0 %v97_v16 }
  0x2b   :  { %1901 = vmatprep.subr.mxu0 %v4040_v2 }
  0x2c   :  { %1902 = vmatpush1.msra.mxu0 %v96_v15 }
  0x2d   :  { %2278 = vmatmul.mubr.msk.f32.gmra.mxu0 %vm128_vm1, %v2837_v34  ;;  %1903 = vmatprep.subr.mxu0 %v4040_v2 }
  0x2e   :  { %2280 = vmatprep.mubr.msk.f32.mxu0 %vm128_vm1, %v2842_v35  ;;  %1904 = vmatpush1.msra.mxu0 %v3087_v14 }
  0x2f   :  { %1905 = vmatprep.subr.mxu0 %v4040_v2 }
  0x30   :  { %1906 = vmatpush1.msra.mxu0 %v3082_v13 }
  0x31   :  { %2281 = vmatmul.mubr.msk.f32.gmra.mxu0 %vm128_vm1, %v2851_v36  ;;  %1907 = vmatprep.subr.mxu0 %v4040_v2 }
  0x32   :  { %2283 = vmatprep.mubr.msk.f32.mxu0 %vm128_vm1, %v2856_v37  ;;  %1908 = vmatpush1.msra.mxu0 %v3073_v12 }
  0x33   :  { %1909 = vmatprep.subr.mxu0 %v4040_v2 }
  0x34   :  { %1910 = vmatpush1.msra.mxu0 %v3066_v11 }
  0x35   :  { %2284 = vmatmul.mubr.msk.f32.gmra.mxu0 %vm128_vm1, %v2865_v38  ;;  %1911 = vmatprep.subr.mxu0 %v4040_v2 }
  0x36   :  { %2286 = vmatprep.mubr.msk.f32.mxu0 %vm128_vm1, %v2870_v39  ;;  %1912 = vmatpush1.msra.mxu0 %v3061_v10 }
  0x37   :  { %1913 = vmatprep.subr.mxu0 %v4040_v2 }
  0x38   :  { %1914 = vmatpush1.msra.mxu0 %v3005_v58 }
  0x39   :  { %2287 = vmatmul.mubr.msk.f32.gmra.mxu0 %vm128_vm1, %v2879_v40  ;;  %1915 = vmatprep.subr.mxu0 %v4040_v2 }
  0x3a   :  { %2289 = vmatprep.mubr.msk.f32.mxu0 %vm128_vm1, %v2884_v41  ;;  %1916 = vmatpush1.msra.mxu0 %v2996_v57 }
  0x3b   :  { %1917 = vmatprep.subr.mxu0 %v4040_v2 }
  0x3c   :  { %1918 = vmatpush1.msra.mxu0 %v2991_v56 }
  0x3d   :  { %2290 = vmatmul.mubr.msk.f32.gmra.mxu0 %vm128_vm1, %v2893_v42  ;;  %1919 = vmatprep.subr.mxu0 %v4040_v2 }
  0x3e   :  { %2292 = vmatprep.mubr.msk.f32.mxu0 %vm128_vm1, %v2898_v43  ;;  %1920 = vmatpush1.msra.mxu0 %v2982_v55 }
  0x3f   :  { %1921 = vmatprep.subr.mxu0 %v4040_v2 }
  0x40   :  { %1922 = vmatpush1.msra.mxu0 %v2977_v54 }
  0x41   :  { %2293 = vmatmul.mubr.msk.f32.gmra.mxu0 %vm128_vm1, %v2907_v44  ;;  %1923 = vmatprep.subr.mxu0 %v4040_v2 }
  0x42   :  { %2295 = vmatprep.mubr.msk.f32.mxu0 %vm128_vm1, %v2912_v45  ;;  %1924 = vmatpush1.msra.mxu0 %v2968_v53 }
  0x43   :  { %1937 = vmatprep.subr.mxu0 %v4040_v2 }
  0x45   :  { %2296 = vmatmul.mubr.msk.f32.gmra.mxu0 %vm128_vm1, %v2921_v46 }
  0x46   :  { %2298 = vmatprep.mubr.msk.f32.mxu0 %vm128_vm1, %v2926_v47 }
  0x49   :  { %2299 = vmatmul.mubr.msk.f32.gmra.mxu0 %vm128_vm1, %v2935_v48 }
  0x4a   :  { %2301 = vmatprep.mubr.msk.f32.mxu0 %vm128_vm1, %v2940_v49 }
  0x4d   :  { %2302 = vmatmul.mubr.msk.f32.gmra.mxu0 %vm128_vm1, %v2949_v50 }
  0x4e   :  { %2304 = vmatprep.mubr.msk.f32.mxu0 %vm128_vm1, %v2954_v51 }
  0x51   :  { %2305 = vmatmul.mubr.msk.f32.gmra.mxu0 %vm128_vm1, %v2963_v52 }
  0x52   :  { %2307 = vmatprep.mubr.msk.f32.mxu0 %vm128_vm1, %v2968_v53  ;;  %v2591_v53 = vmov 0  }
  0x53   :  { %2446 = vset.pattern.permute.xlu0 %v2591_v53  ;;  %2447 = vset.pattern.permute.xlu1 %v2591_v53 }
  0x55   :  { %2308 = vmatmul.mubr.msk.f32.gmra.mxu0 %vm128_vm1, %v2977_v54  ;;  %v2142_v54 = vld [vmem:[#allocation2] ss:$0 sm:$0xff] }
  0x56   :  { %2310 = vmatprep.mubr.msk.f32.mxu0 %vm128_vm1, %v2982_v55  ;;  %1325 = vperm.xlu0 %2446, %v2142_v54  }
  0x59   :  { %2311 = vmatmul.mubr.msk.f32.gmra.mxu0 %vm128_vm1, %v2991_v56 }
  0x5a   :  { %2313 = vmatprep.mubr.msk.f32.mxu0 %vm128_vm1, %v2996_v57  ;;  %v2137_v57 = vld [vmem:[%s4031_s10] ss:$0 sm:$0xff] }
  0x5d   :  { %2314 = vmatmul.mubr.msk.f32.gmra.mxu0 %vm128_vm1, %v3005_v58 }
  0x5e   :  { %2316 = vmatprep.mubr.msk.f32.mxu0 %vm128_vm1, %v3061_v10 }
  0x61   :  { %2317 = vmatmul.mubr.msk.f32.gmra.mxu0 %vm128_vm1, %v3066_v11 }
  0x62   :  { %2319 = vmatprep.mubr.msk.f32.mxu0 %vm128_vm1, %v3073_v12 }
  0x65   :  { %2320 = vmatmul.mubr.msk.f32.gmra.mxu0 %vm128_vm1, %v3082_v13 }
  0x66   :  { %2322 = vmatprep.mubr.msk.f32.mxu0 %vm128_vm1, %v3087_v14 }
  0x69   :  { %2323 = vmatmul.mubr.msk.f32.gmra.mxu0 %vm128_vm1, %v96_v15 }
  0x6a   :  { %2325 = vmatprep.mubr.msk.f32.mxu0 %vm128_vm1, %v97_v16 }
  0x6d   :  { %2326 = vmatmul.mubr.msk.f32.gmra.mxu0 %vm128_vm1, %v98_v17 }
  0x6e   :  { %2328 = vmatprep.mubr.msk.f32.mxu0 %vm128_vm1, %v99_v18 }
  0x71   :  { %2329 = vmatmul.mubr.msk.f32.gmra.mxu0 %vm128_vm1, %v100_v20 }
  0x72   :  { %2331 = vmatprep.mubr.msk.f32.mxu0 %vm128_vm1, %v3123_v23 }
  0x75   :  { %2332 = vmatmul.mubr.msk.f32.gmra.mxu0 %vm128_vm1, %v3133_v25 }
  0x76   :  { %2334 = vmatprep.mubr.msk.f32.mxu0 %vm128_vm1, %v3142_v27 }
  0xd4   :  { %v694_v60 = vpop.f32.mrf.mxu1 }
  0xd5   :  { %v3012_v61 = vadd.f32 %v2133_v59, %v694_v60  ;;  %v879_v59 = vld [vmem:[%s4032_s11 + $0x18] sm:$0xff]  ;;  %v3156_v60 = vld [vmem:[%s4023_s2 + $0x168] sm:$0xff] }
  0xd6   :  { %v2364_v62 = vpop.f32.mrf.mxu1  ;;  %2335 = vmatmul.mubr.msk.f32.gmra.mxu0 %vm128_vm1, %v3156_v60 }
  0xd7   :  { %4048 = vst [vmem:[#allocation6_spill] sm:$0xff] %v3012_v61  ;;  %v4039_v63 = vmax.f32 %v3012_v61, 0.0  ;;  %v878_v62 = vld [vmem:[%s4032_s11 + $0x10] sm:$0xff] }
  0xd9   :  { %2382 = vmatmul.mubr.msk.f32.vlgmr.msra.gmra.mxu1 %vm128_vm1, %v4039_v63 }
  0xda   :  { %2385 = vmatpush3.msra.mxu1 %v794_v0  ;;  %2400 = vmatprep.mubr.msk.f32.mxu1 %vm2590_vm0, %v4040_v2  ;;  %v105_v0 = vld [vmem:[%s4023_s2 + $0x170] sm:$0xff] }
  0xdb   :  { %2386 = vmatprep.subr.mxu1 %v4040_v2  ;;  %2337 = vmatprep.mubr.msk.f32.mxu0 %vm128_vm1, %v105_v0 }
  0xdc   :  { %2387 = vmatpush3.msra.mxu1 %v793_v1  ;;  %v877_v1 = vld [vmem:[%s4032_s11 + $0x8] sm:$0xff] }
  0xdd   :  { %2388 = vmatprep.subr.mxu1 %v4040_v2 }
  0xde   :  { %2389 = vmatpush3.msra.mxu1 %v792_v3  ;;  %v106_v3 = vld [vmem:[%s4023_s2 + $0x178] sm:$0xff] }
  0xdf   :  { %2390 = vmatprep.subr.mxu1 %v4040_v2  ;;  %2338 = vmatmul.mubr.msk.f32.gmra.mxu0 %vm128_vm1, %v106_v3 }
  0xe0   :  { %2391 = vmatpush3.msra.mxu1 %v791_v4  ;;  %v876_v4 = vld [vmem:[%s4032_s11] sm:$0xff] }
  0xe1   :  { %2392 = vmatprep.subr.mxu1 %v4040_v2  ;;  %v3242_v11 = vpop.f32.mrf.mxu0 }
  0xe2   :  { %2393 = vmatpush3.msra.mxu1 %v790_v5  ;;  %v107_v5 = vld [vmem:[%s4023_s2 + $0x180] sm:$0xff] }
  0xe3   :  { %2394 = vmatprep.subr.mxu1 %v4040_v2  ;;  %2340 = vmatprep.mubr.msk.f32.mxu0 %vm128_vm1, %v107_v5  ;;  %v3244_v12 = vpop.f32.mrf.mxu0 }
  0xe4   :  { %2395 = vmatpush3.msra.mxu1 %v789_v6  ;;  %v108_v6 = vld [vmem:[%s4023_s2 + $0x188] sm:$0xff] }
  0xe5   :  { %2396 = vmatprep.subr.mxu1 %v4040_v2  ;;  %2341 = vmatmul.mubr.msk.f32.gmra.mxu0 %vm128_vm1, %v108_v6  ;;  %v3250_v14 = vpop.f32.mrf.mxu0 }
  0xe6   :  { %2397 = vmatpush3.msra.mxu1 %v788_v7  ;;  %v109_v7 = vld [vmem:[%s4023_s2 + $0x190] sm:$0xff] }
  0xe7   :  { %2398 = vmatprep.subr.mxu1 %v4040_v2  ;;  %2343 = vmatprep.mubr.msk.f32.mxu0 %vm128_vm1, %v109_v7  ;;  %v3256_v15 = vpop.f32.mrf.mxu0 }
  0xe8   :  { %2399 = vmatpush3.msra.mxu1 %v787_v8  ;;  %v110_v8 = vld [vmem:[%s4023_s2 + $0x198] sm:$0xff]  ;;  %s2072_s2 = sshll.u32 %s2593_s25, 4  ;;  %s2073_s2 = int_to_ptr.vmem [resolvable:$true] %s2072_s2 }
  0xe9   :  { %2401 = vmatmul.mubr.msk.f32.vlgmr.msra.gmra.mxu1 %vm128_vm1, %v111_v9  ;;  %2403 = vmatprep.subr.mxu1 %v4040_v2  ;;  %v3262_v16 = vpop.f32.mrf.mxu0  ;;  %s2567_s26 = scalar_lea.vmem %s2073_s2, 32  ;;  %p2572_p1 = scmp.lt.s32.totalorder %s2073_s2, %s2073_s2 }
  0xea   :  { %2419 = vmatprep.mubr.msk.f32.mxu1 %vm2590_vm0, %v4040_v2  ;;  %2404 = vmatpush3.msra.mxu1 %v883_v19  ;;  %p2568_p0 = scmp.ne.s32.totalorder %s2073_s2, %s2567_s26  ;;  %p2573_p2 = scmp.lt.s32.totalorder %s2567_s26, %s2567_s26 }
  0xeb   :  { %2405 = vmatprep.subr.mxu1 %v4040_v2  ;;  %2344 = vmatmul.mubr.msk.f32.gmra.mxu0 %vm128_vm1, %v110_v8 }
  0xec   :  { %2406 = vmatpush3.msra.mxu1 %v882_v21  ;;  %1938 = vmatpush2.msra.mxu0 %v110_v8  ;;  %p2574_p3 = por %p2573_p2, %p2572_p1 }
  0xed   :  { %2407 = vmatprep.subr.mxu1 %v4040_v2  ;;  %1939 = vmatprep.subr.mxu0 %v4040_v2 }
  0xee   :  { %2408 = vmatpush3.msra.mxu1 %v881_v24  ;;  %1940 = vmatpush2.msra.mxu0 %v109_v7  ;;  %v4042_v7 = vlaneseq  ;;  %p2575_p4 = pnand %p2574_p3, %p2568_p0 }
  0xef   :  { %2409 = vmatprep.subr.mxu1 %v4040_v2  ;;  %1941 = vmatprep.subr.mxu0 %v4040_v2 }
  0xf0   :  { %2410 = vmatpush3.msra.mxu1 %v880_v26  ;;  %1942 = vmatpush2.msra.mxu0 %v108_v6  ;;  %v3391_v54 = vshrl.u32 %v4042_v7, 7 }
  0xf1   :  { %2411 = vmatprep.subr.mxu1 %v4040_v2  ;;  %1943 = vmatprep.subr.mxu0 %v4040_v2 }
  0xf2   :  { %2412 = vmatpush3.msra.mxu1 %v879_v59  ;;  %1944 = vmatpush2.msra.mxu0 %v107_v5  ;;  %v2592_v5 = vmov 1966171168  }
  0xf3   :  { %2413 = vmatprep.subr.mxu1 %v4040_v2  ;;  %1945 = vmatprep.subr.mxu0 %v4040_v2  ;;  %v966_v6 = vunpack.c.l.s4 %v2592_v5 }
  0xf4   :  { %2414 = vmatpush3.msra.mxu1 %v878_v62  ;;  %1946 = vmatpush2.msra.mxu0 %v106_v3 }
  0xf5   :  { %2415 = vmatprep.subr.mxu1 %v4040_v2  ;;  %1947 = vmatprep.subr.mxu0 %v4040_v2  ;;  %v967_v53 = vunpack.c.0.s8 %v966_v6 }
  0xf6   :  { %2416 = vmatpush3.msra.mxu1 %v877_v1  ;;  %1948 = vmatpush2.msra.mxu0 %v105_v0 }
  0xf7   :  { %2417 = vmatprep.subr.mxu1 %v4040_v2  ;;  %1949 = vmatprep.subr.mxu0 %v4040_v2 }
  0xf8   :  { %2418 = vmatpush3.msra.mxu1 %v876_v4  ;;  %1950 = vmatpush2.msra.mxu0 %v3156_v60 }
  0xf9   :  { %1812 = vmatprep.subr.mxu1 %v4040_v2  ;;  %1951 = vmatprep.subr.mxu0 %v4040_v2 }
  0xfa   :  { %1952 = vmatpush2.msra.mxu0 %v3142_v27 }
  0xfb   :  { %1953 = vmatprep.subr.mxu0 %v4040_v2 }
  0xfc   :  { %1954 = vmatpush2.msra.mxu0 %v3133_v25 }
  0xfd   :  { %1955 = vmatprep.subr.mxu0 %v4040_v2 }
  0xfe   :  { %1956 = vmatpush2.msra.mxu0 %v3123_v23 }
 0x199   :  { %v3237_v55 = vpop.f32.mrf.mxu1 }
 0x19b   :  { %v2383_v56 = vpop.f32.mrf.mxu1 }
 0x1a9   :  { %v871_v58 = vpop.f32.mrf.mxu1 }
 0x1aa   :  { %v872_v9 = vadd.f32 %v2137_v57, %v871_v58  ;;  %v2135_v57 = vld [vmem:[%s4029_s8] ss:$0 sm:$0xff] }
 0x1ab   :  { %v2402_v10 = vpop.f32.mrf.mxu1  ;;  %v2139_v58 = vld [vmem:[%s4033_s12] ss:$0 sm:$0xff]  ;;  %v784_v5 = vadd.f32 %v2135_v57, %v3237_v55 }
 0x1ac   :  { %2448 = vtanh.f32 %v872_v9  ;;  %v3402_v9 = vsub.s32 %v967_v53, %v3391_v54 }
 0x1b9   :  { %v3246_v13 = vpop.eup %2448 }
 0x1ba   :  { %4050 = vst [vmem:[#allocation7_spill] sm:$0xff] %v3246_v13  ;;  %2420 = vmatmul.mubr.msk.f32.vlgmr.msra.gmra.mxu1 %vm128_vm1, %v3246_v13  ;;  %v3407_v13 = vsub.s32 0, %v3391_v54 }
 0x1bb   :  { %1813 = vmatpush1.msra.mxu1 %v2893_v42 }
 0x1bc   :  { %1814 = vmatprep.subr.mxu1 %v4040_v2 }
 0x1bd   :  { %1815 = vmatpush1.msra.mxu1 %v2884_v41  ;;  %v3268_v41 = vpop.f32.mrf.mxu0 }
 0x1be   :  { %1816 = vmatprep.subr.mxu1 %v4040_v2 }
 0x1bf   :  { %1817 = vmatpush1.msra.mxu1 %v2879_v40 }
 0x1c0   :  { %1818 = vmatprep.subr.mxu1 %v4040_v2 }
 0x1c1   :  { %1819 = vmatpush1.msra.mxu1 %v2870_v39  ;;  %v3274_v39 = vpop.f32.mrf.mxu0 }
 0x1c2   :  { %1820 = vmatprep.subr.mxu1 %v4040_v2 }
 0x1c3   :  { %1821 = vmatpush1.msra.mxu1 %v2865_v38 }
 0x1c4   :  { %1822 = vmatprep.subr.mxu1 %v4040_v2 }
 0x1c5   :  { %1823 = vmatpush1.msra.mxu1 %v2856_v37  ;;  %v3280_v37 = vpop.f32.mrf.mxu0 }
 0x1c6   :  { %1824 = vmatprep.subr.mxu1 %v4040_v2 }
 0x1c7   :  { %1825 = vmatpush1.msra.mxu1 %v2851_v36 }
 0x1c8   :  { %1826 = vmatprep.subr.mxu1 %v4040_v2 }
 0x1c9   :  { %1827 = vmatpush1.msra.mxu1 %v2842_v35  ;;  %v3286_v35 = vpop.f32.mrf.mxu0 }
 0x1ca   :  { %1828 = vmatprep.subr.mxu1 %v4040_v2 }
 0x1cb   :  { %1829 = vmatpush1.msra.mxu1 %v2837_v34 }
 0x1cc   :  { %1830 = vmatprep.subr.mxu1 %v4040_v2 }
 0x1cd   :  { %1831 = vmatpush1.msra.mxu1 %v2828_v33  ;;  %v3292_v33 = vpop.f32.mrf.mxu0 }
 0x1ce   :  { %1832 = vmatprep.subr.mxu1 %v4040_v2 }
 0x1cf   :  { %1833 = vmatpush1.msra.mxu1 %v2823_v32 }
 0x1d0   :  { %1834 = vmatprep.subr.mxu1 %v4040_v2 }
 0x1d1   :  { %1835 = vmatpush1.msra.mxu1 %v2814_v31  ;;  %v3298_v31 = vpop.f32.mrf.mxu0 }
 0x1d2   :  { %1836 = vmatprep.subr.mxu1 %v4040_v2 }
 0x1d3   :  { %1837 = vmatpush1.msra.mxu1 %v2809_v30 }
 0x1d4   :  { %1838 = vmatprep.subr.mxu1 %v4040_v2 }
 0x1d5   :  { %1839 = vmatpush1.msra.mxu1 %v2799_v29  ;;  %v3304_v29 = vpop.f32.mrf.mxu0 }
 0x1d6   :  { %1840 = vmatprep.subr.mxu1 %v4040_v2 }
 0x1d7   :  { %1841 = vmatpush1.msra.mxu1 %v2794_v28 }
 0x1d8   :  { %1842 = vmatprep.subr.mxu1 %v4040_v2 }
 0x1d9   :  { %1843 = vmatpush1.msra.mxu1 %v2772_v22  ;;  %v3310_v22 = vpop.f32.mrf.mxu0 }
 0x1da   :  { %1856 = vmatprep.subr.mxu1 %v4040_v2 }
 0x1db   :  { %1857 = vmatpush2.msra.mxu1 %v2963_v52  ;;  %v3316_v28 = vpop.f32.mrf.mxu0 }
 0x1dc   :  { %1858 = vmatprep.subr.mxu1 %v4040_v2 }
 0x1dd   :  { %1859 = vmatpush2.msra.mxu1 %v2954_v51  ;;  %v3322_v30 = vpop.f32.mrf.mxu0 }
 0x1de   :  { %1860 = vmatprep.subr.mxu1 %v4040_v2 }
 0x1df   :  { %1861 = vmatpush2.msra.mxu1 %v2949_v50  ;;  %v3328_v32 = vpop.f32.mrf.mxu0 }
 0x1e0   :  { %1862 = vmatprep.subr.mxu1 %v4040_v2 }
 0x1e1   :  { %1863 = vmatpush2.msra.mxu1 %v2940_v49  ;;  %v3330_v34 = vpop.f32.mrf.mxu0 }
 0x1e2   :  { %1864 = vmatprep.subr.mxu1 %v4040_v2 }
 0x1e3   :  { %1865 = vmatpush2.msra.mxu1 %v2935_v48  ;;  %v431_v36 = vpop.f32.mrf.mxu0 }
 0x1e4   :  { %1866 = vmatprep.subr.mxu1 %v4040_v2 }
 0x1e5   :  { %1867 = vmatpush2.msra.mxu1 %v2926_v47  ;;  %v3332_v38 = vpop.f32.mrf.mxu0 }
 0x1e6   :  { %1868 = vmatprep.subr.mxu1 %v4040_v2 }
 0x1e7   :  { %1869 = vmatpush2.msra.mxu1 %v2921_v46  ;;  %v441_v40 = vpop.f32.mrf.mxu0 }
 0x1e8   :  { %1870 = vmatprep.subr.mxu1 %v4040_v2 }
 0x1e9   :  { %1871 = vmatpush2.msra.mxu1 %v2912_v45  ;;  %v3334_v42 = vpop.f32.mrf.mxu0 }
 0x1ea   :  { %1872 = vmatprep.subr.mxu1 %v4040_v2 }
 0x1eb   :  { %1873 = vmatpush2.msra.mxu1 %v2907_v44  ;;  %v3336_v45 = vpop.f32.mrf.mxu0 }
 0x1ec   :  { %1874 = vmatprep.subr.mxu1 %v4040_v2 }
 0x1ed   :  { %1875 = vmatpush2.msra.mxu1 %v2898_v43  ;;  %v3338_v46 = vpop.f32.mrf.mxu0 }
 0x1ee   :  { %2422 = vmatprep.subr.mxu1 %v4040_v2 }
 0x1ef   :  { %v3340_v44 = vpop.f32.mrf.mxu0 }
 0x1f1   :  { %v3342_v47 = vpop.f32.mrf.mxu0 }
 0x1f3   :  { %v3344_v43 = vpop.f32.mrf.mxu0 }
 0x1f5   :  { %v3346_v48 = vpop.f32.mrf.mxu0 }
 0x1f7   :  { %v3348_v49 = vpop.f32.mrf.mxu0 }
 0x1f9   :  { %v3350_v50 = vpop.f32.mrf.mxu0 }
 0x1fb   :  { %v3352_v51 = vpop.f32.mrf.mxu0 }
 0x1fd   :  { %v3354_v52 = vpop.f32.mrf.mxu0 }
 0x1ff   :  { %v3356_v17 = vpop.f32.mrf.mxu0 }
 0x201   :  { %v3358_v18 = vpop.f32.mrf.mxu0 }
 0x203   :  { %v3360_v19 = vpop.f32.mrf.mxu0 }
 0x205   :  { %v3362_v20 = vpop.f32.mrf.mxu0 }
 0x207   :  { %v3364_v21 = vpop.f32.mrf.mxu0 }
 0x209   :  { %v3366_v23 = vpop.f32.mrf.mxu0 }
 0x20b   :  { %v3368_v24 = vpop.f32.mrf.mxu0 }
 0x20d   :  { %v3370_v25 = vpop.f32.mrf.mxu0 }
 0x20f   :  { %v3372_v26 = vpop.f32.mrf.mxu0 }
 0x211   :  { %v3374_v27 = vpop.f32.mrf.mxu0 }
 0x213   :  { %v3376_v59 = vpop.f32.mrf.mxu0 }
 0x215   :  { %v3378_v60 = vpop.f32.mrf.mxu0 }
 0x217   :  { %v3380_v62 = vpop.f32.mrf.mxu0 }
 0x219   :  { %v3382_v0 = vpop.f32.mrf.mxu0 }
 0x21a   :  { %4051 = vst [vmem:[#allocation8_spill] sm:$0xff] %v3382_v0 }
 0x21b   :  { %v3384_v1 = vpop.f32.mrf.mxu0 }
 0x21d   :  { %v3386_v3 = vpop.f32.mrf.mxu0 }
 0x21e   :  { %4052 = vst [vmem:[#allocation9_spill] sm:$0xff] %v3386_v3  ;;  %v3412_v3 = vld [vmem:[%s4025_s4] ss:$0 sm:$0xff] }
 0x21f   :  { %v3388_v4 = vpop.f32.mrf.mxu0  ;;  %v432_v55 = vadd.f32 %v3412_v3, %v431_v36  ;;  %v352_v36 = vadd.f32 %v3412_v3, %v3244_v12  ;;  %v362_v12 = vadd.f32 %v3412_v3, %v3256_v15  ;;  %v3453_v15 = vld [vmem:[%s4034_s13] ss:$0 sm:$0xff] }
 0x220   :  { %4053 = vst [vmem:[#allocation10_spill] sm:$0xff] %v3388_v4 }
 0x221   :  { %v2342_v8 = vpop.f32.mrf.mxu0 }
 0x223   :  { %v3393_v56 = vpop.f32.mrf.mxu0 }
 0x225   :  { %v2345_v63 = vpop.f32.mrf.mxu0 }
 0x227   :  { %v601_v0 = vpop.f32.mrf.mxu0 }
 0x27a   :  { %v960_v10 = vpop.f32.mrf.mxu1 }
 0x27b   :  { %v961_v6 = vadd.f32 %v2139_v58, %v960_v10  ;;  %v597_v58 = vadd.f32 %v2342_v8, %v3412_v3  ;;  %v607_v10 = vadd.f32 %v2345_v63, %v3412_v3  ;;  %v447_v8 = vadd.f32 %v3332_v38, %v3412_v3 }
 0x27c   :  { %v2421_v2 = vpop.f32.mrf.mxu1  ;;  %v397_v38 = vadd.f32 %v3286_v35, %v3412_v3 }
 0x27d   :  { %v971_v7 = vrot.slane %v961_v6, %v3402_v9  ;;  %v1101_v61 = vadd.f32 %v961_v6, %v784_v5  ;;  %v602_v5 = vadd.f32 %v3412_v3, %v601_v0  ;;  %v357_v0 = vadd.f32 %v3242_v11, %v3412_v3 }
 0x27f   :  { %v972_v4 = vcombine.high %v971_v7, %v971_v7  ;;  %v979_v53 = vrot.slane %v971_v7, %v3402_v9  ;;  %2450 = vtanh.f32 %v1101_v61  ;;  %v442_v61 = vadd.f32 %v3412_v3, %v441_v40 }
 0x281   :  { %v986_v2 = vrot.slane %v972_v4, %v3402_v9  ;;  %v3418_v57 = vrot.slane %v979_v53, %v3407_v13 }
 0x283   :  { %v3424_v6 = vrot.slane %v986_v2, %v3407_v13  ;;  %v1013_v7 = vadd.f32 %v3418_v57, %v432_v55  ;;  %v997_v55 = vadd.f32 %v3418_v57, %v352_v36  ;;  %v1015_v40 = vadd.f32 %v3418_v57, %v442_v61 }
 0x284   :  { %v998_v2 = vadd.f32 %v3418_v57, %v357_v0  ;;  %v999_v11 = vadd.f32 %v3418_v57, %v362_v12  ;;  %v1006_v35 = vadd.f32 %v3418_v57, %v397_v38  ;;  %v367_v61 = vadd.f32 %v3250_v14, %v3412_v3 }
 0x285   :  { %v1046_v4 = vadd.f32 %v3424_v6, %v597_v58  ;;  %v1048_v53 = vadd.f32 %v3424_v6, %v607_v10  ;;  %v1047_v63 = vadd.f32 %v3424_v6, %v602_v5  ;;  %2452 = vtanh.f32 %v1013_v7 }
 0x286   :  { %v1016_v58 = vadd.f32 %v3418_v57, %v447_v8  ;;  %v427_v5 = vadd.f32 %v3322_v30, %v3412_v3  ;;  %v452_v7 = vadd.f32 %v3412_v3, %v3336_v45  ;;  %v537_v36 = vadd.f32 %v3366_v23, %v3412_v3 }
 0x287   :  { %2454 = vtanh.f32 %v1046_v4  ;;  %v547_v30 = vadd.f32 %v3370_v25, %v3412_v3  ;;  %v542_v4 = vadd.f32 %v3412_v3, %v3372_v26  ;;  %v372_v14 = vadd.f32 %v3412_v3, %v3268_v41 }
 0x288   :  { %2456 = vtanh.f32 %v1048_v53  ;;  %v3463_v45 = vadd.f32 %v3418_v57, %v427_v5  ;;  %v1000_v53 = vadd.f32 %v3418_v57, %v367_v61  ;;  %v557_v23 = vadd.f32 %v3374_v27, %v3412_v3 }
 0x289   :  { %2458 = vtanh.f32 %v1047_v63  ;;  %v1017_v25 = vadd.f32 %v3418_v57, %v452_v7  ;;  %v402_v63 = vadd.f32 %v3412_v3, %v3304_v29  ;;  %v457_v26 = vadd.f32 %v3334_v42, %v3412_v3 }
 0x28a   :  { %2460 = vtanh.f32 %v997_v55  ;;  %v1001_v0 = vadd.f32 %v3418_v57, %v372_v14  ;;  %v3485_v41 = vadd.f32 %v3424_v6, %v542_v4  ;;  %v3488_v27 = vadd.f32 %v3424_v6, %v547_v30 }
 0x28b   :  { %2462 = vtanh.f32 %v1015_v40  ;;  %v3482_v40 = vadd.f32 %v3424_v6, %v537_v36  ;;  %v1007_v29 = vadd.f32 %v3418_v57, %v402_v63  ;;  %v3493_v42 = vadd.f32 %v3424_v6, %v557_v23 }
 0x28c   :  { %v2451_v10 = vpop.eup %2450  ;;  %2464 = vtanh.f32 %v998_v2  ;;  %v377_v38 = vadd.f32 %v3262_v16, %v3412_v3  ;;  %v1018_v36 = vadd.f32 %v3418_v57, %v457_v26  ;;  %v382_v4 = vadd.f32 %v3412_v3, %v3280_v37 }
 0x28d   :  { %2466 = vtanh.f32 %v1016_v58  ;;  %v3469_v8 = vmul.f32 %v2451_v10, %v3453_v15  ;;  %v407_v23 = vadd.f32 %v3298_v31, %v3412_v3 }
 0x28e   :  { %2468 = vtanh.f32 %v999_v11  ;;  %v1002_v7 = vadd.f32 %v3418_v57, %v377_v38  ;;  %v437_v38 = vadd.f32 %v3330_v34, %v3412_v3  ;;  %v387_v34 = vadd.f32 %v3274_v39, %v3412_v3 }
 0x28f   :  { %2470 = vtanh.f32 %v1006_v35  ;;  %v1008_v31 = vadd.f32 %v3418_v57, %v407_v23 }
 0x290   :  { %2472 = vtanh.f32 %v1000_v53 }
 0x291   :  { %2474 = vtanh.f32 %v1017_v25  ;;  %v462_v25 = vadd.f32 %v3412_v3, %v3340_v44 }
 0x292   :  { %v2453_v55 = vpop.eup %2452  ;;  %2476 = vtanh.f32 %v1001_v0 }
 0x293   :  { %v1126_v2 = vmul.f32 %v2453_v55, %v3453_v15  ;;  %2478 = vtanh.f32 %v1007_v29 }
 0x294   :  { %v2455_v12 = vpop.eup %2454  ;;  %2480 = vtanh.f32 %v1002_v7 }
 0x295   :  { %v3498_v58 = vmul.f32 %v2455_v12, %v3453_v15  ;;  %v2457_v11 = vpop.eup %2456  ;;  %v1210_v10 = vsel %vm128_vm1, %v1126_v2, 0.0  ;;  %v1003_v12 = vadd.f32 %v3418_v57, %v382_v4  ;;  %2482 = vtanh.f32 %v1018_v36 }
 0x296   :  { %v2459_v5 = vpop.eup %2458  ;;  %1211 = vadd.xlane.f32.xlu1 %v1210_v10  ;;  %v3503_v35 = vmul.f32 %v2457_v11, %v3453_v15 }
 0x297   :  { %v2461_v61 = vpop.eup %2460  ;;  %v3507_v16 = vmul.f32 %v2459_v5, %v3453_v15  ;;  %2484 = vtanh.f32 %v1003_v12  ;;  %v1014_v5 = vadd.f32 %v3418_v57, %v437_v38  ;;  %v422_v12 = vadd.f32 %v3412_v3, %v3328_v32 }
 0x298   :  { %v2463_v30 = vpop.eup %2462  ;;  %v1110_v53 = vmul.f32 %v2461_v61, %v3453_v15  ;;  %2486 = vtanh.f32 %v1008_v31 }
 0x299   :  { %v2465_v14 = vpop.eup %2464  ;;  %v1128_v63 = vmul.f32 %v2463_v30, %v3453_v15  ;;  %v1019_v30 = vadd.f32 %v3418_v57, %v462_v25  ;;  %2488 = vtanh.f32 %v1014_v5  ;;  %v517_v5 = vadd.f32 %v3358_v18, %v3412_v3 }
 0x29a   :  { %v2467_v0 = vpop.eup %2466  ;;  %v1162_v26 = vsel %vm128_vm1, %v1110_v53, 0.0  ;;  %v1111_v55 = vmul.f32 %v2465_v14, %v3453_v15  ;;  %v412_v53 = vadd.f32 %v3412_v3, %v3316_v28  ;;  %v467_v14 = vadd.f32 %v3338_v46, %v3412_v3 }
 0x29b   :  { %v2469_v37 = vpop.eup %2468  ;;  %1163 = vadd.xlane.f32.xlu0 %v1162_v26  ;;  %v1216_v2 = vsel %vm128_vm1, %v1128_v63, 0.0  ;;  %v1129_v29 = vmul.f32 %v2467_v0, %v3453_v15  ;;  %v1004_v0 = vadd.f32 %v3418_v57, %v387_v34  ;;  %2490 = vtanh.f32 %v1019_v30 }
 0x29c   :  { %v2471_v44 = vpop.eup %2470  ;;  %1217 = vadd.xlane.f32.xlu1 %v1216_v2  ;;  %v1165_v11 = vsel %vm128_vm1, %v1111_v55, 0.0  ;;  %v1112_v10 = vmul.f32 %v2469_v37, %v3453_v15  ;;  %v1009_v55 = vadd.f32 %v3418_v57, %v412_v53  ;;  %v392_v46 = vadd.f32 %v3412_v3, %v3292_v33 }
 0x29d   :  { %v2473_v7 = vpop.eup %2472  ;;  %v1219_v61 = vsel %vm128_vm1, %v1129_v29, 0.0  ;;  %v1119_v36 = vmul.f32 %v2471_v44, %v3453_v15  ;;  %v562_v37 = vadd.f32 %v3412_v3, %v3380_v62  ;;  %2492 = vtanh.f32 %v1004_v0 }
 0x29e   :  { %v2475_v4 = vpop.eup %2474  ;;  %v1168_v23 = vsel %vm128_vm1, %v1112_v10, 0.0  ;;  %v1113_v63 = vmul.f32 %v2473_v7, %v3453_v15  ;;  %v1005_v31 = vadd.f32 %v3418_v57, %v392_v46  ;;  %2494 = vtanh.f32 %v1009_v55 }
 0x29f   :  { %1166 = vadd.xlane.f32.xlu0 %v1165_v11  ;;  %v2477_v26 = vpop.eup %2476  ;;  %v1189_v25 = vsel %vm128_vm1, %v1119_v36, 0.0  ;;  %v1130_v39 = vmul.f32 %v2475_v4, %v3453_v15  ;;  %v1020_v11 = vadd.f32 %v3418_v57, %v467_v14  ;;  %v417_v62 = vadd.f32 %v3310_v22, %v3412_v3 }
 0x2a0   :  { %1220 = vadd.xlane.f32.xlu1 %v1219_v61  ;;  %v2479_v28 = vpop.eup %2478  ;;  %v1171_v2 = vsel %vm128_vm1, %v1113_v63, 0.0  ;;  %v1114_v29 = vmul.f32 %v2477_v26, %v3453_v15  ;;  %v472_v10 = vadd.f32 %v3412_v3, %v3344_v43  ;;  %v527_v7 = vadd.f32 %v3362_v20, %v3412_v3 }
 0x2a1   :  { %v2481_v44 = vpop.eup %2480  ;;  %v1222_v38 = vsel %vm128_vm1, %v1130_v39, 0.0  ;;  %v1120_v33 = vmul.f32 %v2479_v28, %v3453_v15  ;;  %v532_v61 = vadd.f32 %v3412_v3, %v3368_v24  ;;  %v1011_v36 = vadd.f32 %v3418_v57, %v422_v12 }
 0x2a2   :  { %v2483_v32 = vpop.eup %2482  ;;  %2496 = vtanh.f32 %v3463_v45  ;;  %v1174_v30 = vsel %vm128_vm1, %v1114_v29, 0.0  ;;  %v1115_v22 = vmul.f32 %v2481_v44, %v3453_v15  ;;  %v1010_v43 = vadd.f32 %v3418_v57, %v417_v62 }
 0x2a3   :  { %1169 = vadd.xlane.f32.xlu0 %v1168_v23  ;;  %2498 = vtanh.f32 %v1005_v31  ;;  %v1192_v18 = vsel %vm128_vm1, %v1120_v33, 0.0  ;;  %v1131_v20 = vmul.f32 %v2483_v32, %v3453_v15  ;;  %v1039_v24 = vadd.f32 %v3424_v6, %v562_v37 }
 0x2a4   :  { %1190 = vadd.xlane.f32.xlu1 %v1189_v25  ;;  %v2485_v4 = vpop.eup %2484  ;;  %2500 = vtanh.f32 %v1020_v11  ;;  %v477_v45 = vadd.f32 %v3342_v47, %v3412_v3  ;;  %v1021_v53 = vadd.f32 %v3418_v57, %v472_v10  ;;  %v1032_v14 = vadd.f32 %v3424_v6, %v527_v7 }
 0x2a5   :  { %v2487_v34 = vpop.eup %2486  ;;  %2502 = vtanh.f32 %v1011_v36  ;;  %v1177_v23 = vsel %vm128_vm1, %v1115_v22, 0.0  ;;  %v1116_v63 = vmul.f32 %v2485_v4, %v3453_v15  ;;  %v1030_v0 = vadd.f32 %v3424_v6, %v517_v5 }
 0x2a6   :  { %2504 = vtanh.f32 %v1010_v43  ;;  %v2489_v26 = vpop.eup %2488  ;;  %v1225_v25 = vsel %vm128_vm1, %v1131_v20, 0.0  ;;  %v1121_v39 = vmul.f32 %v2487_v34, %v3453_v15  ;;  %v1033_v47 = vadd.f32 %v3424_v6, %v532_v61 }
 0x2a7   :  { %1172 = vadd.xlane.f32.xlu0 %v1171_v2  ;;  %2506 = vtanh.f32 %v1039_v24  ;;  %v1022_v28 = vadd.f32 %v3418_v57, %v477_v45  ;;  %v522_v46 = vadd.f32 %v3412_v3, %v3364_v21  ;;  %v482_v12 = vadd.f32 %v3412_v3, %v3348_v49 }
 0x2a8   :  { %1223 = vadd.xlane.f32.xlu1 %v1222_v38  ;;  %v2491_v55 = vpop.eup %2490  ;;  %2508 = vtanh.f32 %v1021_v53  ;;  %v1180_v37 = vsel %vm128_vm1, %v1116_v63, 0.0  ;;  %v1127_v2 = vmul.f32 %v2489_v26, %v3453_v15  ;;  %v1195_v31 = vsel %vm128_vm1, %v1121_v39, 0.0 }
 0x2a9   :  { %2510 = vtanh.f32 %v1032_v14  ;;  %v1132_v44 = vmul.f32 %v2491_v55, %v3453_v15  ;;  %v487_v21 = vadd.f32 %v3346_v48, %v3412_v3  ;;  %v592_v49 = vadd.f32 %v3412_v3, %v3393_v56 }
 0x2aa   :  { %2512 = vtanh.f32 %v1030_v0  ;;  %v2493_v29 = vpop.eup %2492  ;;  %v1031_v38 = vadd.f32 %v3424_v6, %v522_v46  ;;  %v1213_v11 = vsel %vm128_vm1, %v1127_v2, 0.0  ;;  %v1023_v62 = vadd.f32 %v3424_v6, %v482_v12 }
 0x2ab   :  { %1175 = vadd.xlane.f32.xlu0 %v1174_v30  ;;  %2514 = vtanh.f32 %v1033_v47  ;;  %v2495_v57 = vpop.eup %2494  ;;  %v1117_v32 = vmul.f32 %v2493_v29, %v3453_v15  ;;  %v1228_v48 = vsel %vm128_vm1, %v1132_v44, 0.0  ;;  %v492_v7 = vadd.f32 %v3412_v3, %v3352_v51 }
 0x2ac   :  { %1193 = vadd.xlane.f32.xlu1 %v1192_v18  ;;  %2516 = vtanh.f32 %v1022_v28  ;;  %v1122_v5 = vmul.f32 %v2495_v57, %v3453_v15  ;;  %v552_v36 = vadd.f32 %v3412_v3, %v3376_v59  ;;  %v1024_v51 = vadd.f32 %v3424_v6, %v487_v21 }
 0x2ad   :  { %2518 = vtanh.f32 %v3482_v40  ;;  %v1183_v30 = vsel %vm128_vm1, %v1117_v32, 0.0  ;;  %v497_v59 = vadd.f32 %v3350_v50, %v3412_v3  ;;  %v1025_v53 = vadd.f32 %v3424_v6, %v492_v7 }
 0x2ae   :  { %2520 = vtanh.f32 %v3485_v41  ;;  %v1045_v41 = vadd.f32 %v3424_v6, %v592_v49  ;;  %v1037_v45 = vadd.f32 %v3424_v6, %v552_v36  ;;  %v507_v21 = vadd.f32 %v3354_v52, %v3412_v3 }
 0x2af   :  { %1178 = vadd.xlane.f32.xlu0 %v1177_v23  ;;  %v2497_v33 = vpop.eup %2496  ;;  %2522 = vtanh.f32 %v3488_v27  ;;  %v1198_v27 = vsel %vm128_vm1, %v1122_v5, 0.0  ;;  %v1026_v46 = vadd.f32 %v3424_v6, %v497_v59  ;;  %v512_v52 = vadd.f32 %v3412_v3, %v3360_v19 }
 0x2b0   :  { %1226 = vadd.xlane.f32.xlu1 %v1225_v25  ;;  %v2499_v10 = vpop.eup %2498  ;;  %v3605_v56 = vmul.f32 %v2497_v33, %v3453_v15  ;;  %2524 = vtanh.f32 %v3493_v42  ;;  %v502_v25 = vadd.f32 %v3412_v3, %v3356_v17  ;;  %v1028_v36 = vadd.f32 %v3424_v6, %v507_v21 }
 0x2b1   :  { %v2501_v40 = vpop.eup %2500  ;;  %v1118_v22 = vmul.f32 %v2499_v10, %v3453_v15  ;;  %2526 = vtanh.f32 %v1031_v38  ;;  %v572_v59 = vadd.f32 %v3412_v3, %v3384_v1 }
 0x2b2   :  { %v2503_v61 = vpop.eup %2502  ;;  %v1133_v42 = vmul.f32 %v2501_v40, %v3453_v15  ;;  %2528 = vtanh.f32 %v1023_v62  ;;  %v1027_v10 = vadd.f32 %v3424_v6, %v502_v25 }
 0x2b3   :  { %1181 = vadd.xlane.f32.xlu0 %v1180_v37  ;;  %v2505_v43 = vpop.eup %2504  ;;  %2530 = vtanh.f32 %v1045_v41  ;;  %v1186_v24 = vsel %vm128_vm1, %v1118_v22, 0.0  ;;  %v1124_v34 = vmul.f32 %v2503_v61, %v3453_v15  ;;  %v567_v22 = vadd.f32 %v3378_v60, %v3412_v3 }
 0x2b4   :  { %1196 = vadd.xlane.f32.xlu1 %v1195_v31  ;;  %v2507_v4 = vpop.eup %2506  ;;  %v1231_v23 = vsel %vm128_vm1, %v1133_v42, 0.0  ;;  %v1123_v63 = vmul.f32 %v2505_v43, %v3453_v15  ;;  %2532 = vtanh.f32 %v1024_v51 }
 0x2b5   :  { %v2509_v18 = vpop.eup %2508  ;;  %v1204_v55 = vsel %vm128_vm1, %v1124_v34, 0.0  ;;  %v1152_v28 = vmul.f32 %v2507_v4, %v3453_v15  ;;  %2534 = vtanh.f32 %v1037_v45  ;;  %v1029_v4 = vadd.f32 %v3424_v6, %v512_v52 }
 0x2b6   :  { %v2511_v20 = vpop.eup %2510  ;;  %v1201_v37 = vsel %vm128_vm1, %v1123_v63, 0.0  ;;  %v1134_v2 = vmul.f32 %v2509_v18, %v3453_v15  ;;  %2536 = vtanh.f32 %v1025_v53  ;;  %v1040_v45 = vadd.f32 %v3424_v6, %v567_v22 }
 0x2b7   :  { %1214 = vadd.xlane.f32.xlu0 %v1213_v11  ;;  %v2513_v14 = vpop.eup %2512  ;;  %v3628_v0 = vmul.f32 %v2511_v20, %v3453_v15  ;;  %v1288_v49 = vsel %vm128_vm1, %v1152_v28, 0.0  ;;  %2538 = vtanh.f32 %v1026_v46 }
 0x2b8   :  { %1229 = vadd.xlane.f32.xlu1 %v1228_v48  ;;  %v2515_v50 = vpop.eup %2514  ;;  %v1143_v38 = vmul.f32 %v2513_v14, %v3453_v15  ;;  %v1234_v32 = vsel %vm128_vm1, %v1134_v2, 0.0  ;;  %2540 = vtanh.f32 %v1027_v10  ;;  %v4054_v14 = vld [vmem:[#allocation8_spill] sm:$0xff]  ;;  %v4055_v2 = vld [vmem:[#allocation10_spill] sm:$0xff] }
 0x2b9   :  { %v2517_v26 = vpop.eup %2516  ;;  %v3633_v39 = vmul.f32 %v2515_v50, %v3453_v15  ;;  %2542 = vtanh.f32 %v1028_v36  ;;  %v1267_v22 = vsel %vm128_vm1, %v3628_v0, 0.0 }
 0x2ba   :  { %v2519_v47 = vpop.eup %2518  ;;  %v1135_v62 = vmul.f32 %v2517_v26, %v3453_v15  ;;  %v1261_v40 = vsel %vm128_vm1, %v1143_v38, 0.0  ;;  %2544 = vtanh.f32 %v1029_v4  ;;  %v1041_v26 = vadd.f32 %v3424_v6, %v572_v59  ;;  %v3730_v59 = vpop.permute.xlu0 %1325 }
 0x2bb   :  { %1184 = vadd.xlane.f32.xlu0 %v1183_v30  ;;  %v2521_v12 = vpop.eup %2520  ;;  %v3641_v17 = vmul.f32 %v2519_v47, %v3453_v15  ;;  %2546 = vtanh.f32 %v1040_v45  ;;  %v1207_v47 = vsel %vm128_vm1, %v3605_v56, 0.0 }
 0x2bc   :  { %1199 = vadd.xlane.f32.xlu1 %v1198_v27  ;;  %v2523_v29 = vpop.eup %2522  ;;  %v3644_v31 = vmul.f32 %v2521_v12, %v3453_v15  ;;  %v1237_v41 = vsel %vm128_vm1, %v1135_v62, 0.0  ;;  %2548 = vtanh.f32 %v1041_v26 }
 0x2bd   :  { %v2525_v44 = vpop.eup %2524  ;;  %v3647_v57 = vmul.f32 %v2523_v29, %v3453_v15  ;;  %v582_v29 = vadd.f32 %v3412_v3, %v4055_v2  ;;  %v1273_v4 = vsel %vm128_vm1, %v3641_v17, 0.0  ;;  %v1315_v17 = vsel %vm128_vm1, %v3503_v35, 0.0 }
 0x2be   :  { %v3654_v33 = vmul.f32 %v2525_v44, %v3453_v15  ;;  %v2527_v11 = vpop.eup %2526  ;;  %v1276_v0 = vsel %vm128_vm1, %v3644_v31, 0.0 }
 0x2bf   :  { %1187 = vadd.xlane.f32.xlu0 %v1186_v24  ;;  %v2529_v48 = vpop.eup %2528  ;;  %v1144_v7 = vmul.f32 %v2527_v11, %v3453_v15  ;;  %v1043_v11 = vadd.f32 %v3424_v6, %v582_v29 }
 0x2c0   :  { %1232 = vadd.xlane.f32.xlu1 %v1231_v23  ;;  %v2531_v5 = vpop.eup %2530  ;;  %v1136_v61 = vmul.f32 %v2529_v48, %v3453_v15  ;;  %v577_v23 = vadd.f32 %v4054_v14, %v3412_v3  ;;  %v1285_v31 = vsel %vm128_vm1, %v3654_v33, 0.0  ;;  %v4057_v14 = vlaneseq }
 0x2c1   :  { %v2533_v30 = vpop.eup %2532  ;;  %v1264_v43 = vsel %vm128_vm1, %v1144_v7, 0.0  ;;  %v1158_v19 = vmul.f32 %v2531_v5, %v3453_v15 }
 0x2c2   :  { %v2535_v27 = vpop.eup %2534  ;;  %v1240_v42 = vsel %vm128_vm1, %v1136_v61, 0.0  ;;  %v1137_v51 = vmul.f32 %v2533_v30, %v3453_v15  ;;  %v1042_v46 = vadd.f32 %v3424_v6, %v577_v23  ;;  %v3737_v23 = vand.u32 127, %v4057_v14 }
 0x2c3   :  { %1205 = vadd.xlane.f32.xlu0 %v1204_v55  ;;  %v2537_v18 = vpop.eup %2536  ;;  %v1306_v60 = vsel %vm128_vm1, %v1158_v19, 0.0  ;;  %v1150_v20 = vmul.f32 %v2535_v27, %v3453_v15  ;;  %v1270_v27 = vsel %vm128_vm1, %v3633_v39, 0.0  ;;  %v1279_v39 = vsel %vm128_vm1, %v3647_v57, 0.0 }
 0x2c4   :  { %1202 = vadd.xlane.f32.xlu1 %v1201_v37  ;;  %v1243_v24 = vsel %vm128_vm1, %v1137_v51, 0.0  ;;  %v1138_v34 = vmul.f32 %v2537_v18, %v3453_v15  ;;  %v2539_v53 = vpop.eup %2538  ;;  %v1382_v37 = vsel %vm1381_vm2, %v3469_v8, 0.0  ;;  %2550 = vtanh.f32 %v1042_v46  ;;  %v4056_v8 = vld [vmem:[#allocation9_spill] sm:$0xff] }
 0x2c5   :  { %v1282_v63 = vsel %vm128_vm1, %v1150_v20, 0.0  ;;  %v1139_v50 = vmul.f32 %v2539_v53, %v3453_v15  ;;  %v2541_v25 = vpop.eup %2540  ;;  %v587_v62 = vadd.f32 %v4056_v8, %v3412_v3  ;;  %2552 = vtanh.f32 %v1043_v11 }
 0x2c6   :  { %v1246_v1 = vsel %vm128_vm1, %v1138_v34, 0.0  ;;  %v1140_v28 = vmul.f32 %v2541_v25, %v3453_v15  ;;  %v2543_v12 = vpop.eup %2542  ;;  %v1309_v18 = vsel %vm128_vm1, %v3498_v58, 0.0  ;;  %v1448_v33 = vadd.s32 4294967288, %v3737_v23 }
 0x2c7   :  { %1289 = vadd.xlane.f32.xlu0 %v1288_v49  ;;  %v1249_v55 = vsel %vm128_vm1, %v1139_v50, 0.0  ;;  %v1141_v44 = vmul.f32 %v2543_v12, %v3453_v15  ;;  %v2545_v21 = vpop.eup %2544  ;;  %v1044_v7 = vadd.f32 %v3424_v6, %v587_v62  ;;  %v1462_v50 = vadd.s32 4294967272, %v3737_v23 }
 0x2c8   :  { %1235 = vadd.xlane.f32.xlu1 %v1234_v32  ;;  %v1252_v56 = vsel %vm128_vm1, %v1140_v28, 0.0  ;;  %v1142_v38 = vmul.f32 %v2545_v21, %v3453_v15  ;;  %v2547_v32 = vpop.eup %2546  ;;  %v3746_v25 = vsub.s32 %v3737_v23, %v3391_v54  ;;  %v1511_v12 = vadd.s32 4294967216, %v3737_v23 }
 0x2c9   :  { %v1255_v49 = vsel %vm128_vm1, %v1141_v44, 0.0  ;;  %v1153_v48 = vmul.f32 %v2547_v32, %v3453_v15  ;;  %v2549_v5 = vpop.eup %2548  ;;  %2554 = vtanh.f32 %v1044_v7  ;;  %v1483_v2 = vadd.s32 4294967248, %v3737_v23 }
 0x2ca   :  { %v1258_v10 = vsel %vm128_vm1, %v1142_v38, 0.0  ;;  %v3757_v29 = vsub.s32 %v1448_v33, %v3391_v54  ;;  %v1490_v44 = vadd.s32 4294967240, %v3737_v23  ;;  %v1525_v21 = vadd.s32 4294967200, %v3737_v23 }
 0x2cb   :  { %1262 = vadd.xlane.f32.xlu0 %v1261_v40  ;;  %v1291_v52 = vsel %vm128_vm1, %v1153_v48, 0.0  ;;  %v1154_v40 = vmul.f32 %v2549_v5, %v3453_v15  ;;  %v1497_v11 = vadd.s32 4294967232, %v3737_v23  ;;  %v3784_v7 = vsub.s32 %v1483_v2, %v3391_v54 }
 0x2cc   :  { %1238 = vadd.xlane.f32.xlu1 %v1237_v41 }
 0x2cd   :  { %v1294_v61 = vsel %vm128_vm1, %v1154_v40, 0.0 }
 0x2cf   :  { %1265 = vadd.xlane.f32.xlu0 %v1264_v43 }
 0x2d0   :  { %1241 = vadd.xlane.f32.xlu1 %v1240_v42 }
 0x2d1   :  { %v2551_v41 = vpop.eup %2550 }
 0x2d2   :  { %v1155_v36 = vmul.f32 %v2551_v41, %v3453_v15  ;;  %v2553_v30 = vpop.eup %2552 }
 0x2d3   :  { %1307 = vadd.xlane.f32.xlu0 %v1306_v60  ;;  %v1156_v43 = vmul.f32 %v2553_v30, %v3453_v15 }
 0x2d4   :  { %1244 = vadd.xlane.f32.xlu1 %v1243_v24  ;;  %v1297_v3 = vsel %vm128_vm1, %v1155_v36, 0.0  ;;  %v3791_v36 = vsub.s32 %v1490_v44, %v3391_v54 }
 0x2d5   :  { %v1300_v6 = vsel %vm128_vm1, %v1156_v43, 0.0 }
 0x2d6   :  { %v2555_v19 = vpop.eup %2554 }
 0x2d7   :  { %1283 = vadd.xlane.f32.xlu0 %v1282_v63  ;;  %v1157_v42 = vmul.f32 %v2555_v19, %v3453_v15  ;;  %v1312_v15 = vsel %vm128_vm1, %v3507_v16, 0.0  ;;  %v3800_v19 = vsub.s32 %v1497_v11, %v3391_v54 }
 0x2d8   :  { %1247 = vadd.xlane.f32.xlu1 %v1246_v1  ;;  %v1455_v1 = vadd.s32 4294967280, %v3737_v23 }
 0x2d9   :  { %v1303_v51 = vsel %vm128_vm1, %v1157_v42, 0.0 }
 0x2da   :  { %v3751_v46 = vsub.s32 %v1455_v1, %v3391_v54 }
 0x2db   :  { %1208 = vadd.xlane.f32.xlu0 %v1207_v47  ;;  %v1504_v47 = vadd.s32 4294967224, %v3737_v23 }
 0x2dc   :  { %1250 = vadd.xlane.f32.xlu1 %v1249_v55  ;;  %v1469_v55 = vadd.s32 4294967264, %v3737_v23 }
 0x2dd   :  { %v3769_v62 = vsub.s32 %v1504_v47, %v3391_v54 }
 0x2df   :  { %1383 = vadd.xlane.f32.xlu0 %v1382_v37  ;;  %v1476_v37 = vadd.s32 4294967256, %v3737_v23 }
 0x2e0   :  { %1253 = vadd.xlane.f32.xlu1 %v1252_v56  ;;  %v1518_v56 = vadd.s32 4294967208, %v3737_v23 }
 0x2e1   :  { %v3781_v40 = vsub.s32 %v1476_v37, %v3391_v54 }
 0x2e4   :  { %1256 = vadd.xlane.f32.xlu1 %v1255_v49  ;;  %v3763_v49 = vsub.s32 %v1462_v50, %v3391_v54 }
 0x2e8   :  { %1259 = vadd.xlane.f32.xlu1 %v1258_v10  ;;  %v3772_v10 = vsub.s32 %v1469_v55, %v3391_v54 }
 0x2ec   :  { %1292 = vadd.xlane.f32.xlu1 %v1291_v52  ;;  %v3778_v52 = vsub.s32 %v1511_v12, %v3391_v54 }
 0x2f0   :  { %1295 = vadd.xlane.f32.xlu1 %v1294_v61  ;;  %v3788_v61 = vsub.s32 %v1518_v56, %v3391_v54 }
 0x2f4   :  { %1298 = vadd.xlane.f32.xlu1 %v1297_v3  ;;  %v3794_v3 = vsub.s32 %v1525_v21, %v3391_v54 }
 0x2f8   :  { %1268 = vadd.xlane.f32.xlu1 %v1267_v22 }
 0x2fc   :  { %1301 = vadd.xlane.f32.xlu1 %v1300_v6 }
 0x300   :  { %1271 = vadd.xlane.f32.xlu1 %v1270_v27 }
 0x304   :  { %1304 = vadd.xlane.f32.xlu1 %v1303_v51 }
 0x308   :  { %1274 = vadd.xlane.f32.xlu1 %v1273_v4 }
 0x30c   :  { %1277 = vadd.xlane.f32.xlu1 %v1276_v0 }
 0x310   :  { %1310 = vadd.xlane.f32.xlu1 %v1309_v18 }
 0x314   :  { %1280 = vadd.xlane.f32.xlu1 %v1279_v39 }
 0x318   :  { %1313 = vadd.xlane.f32.xlu1 %v1312_v15 }
 0x31c   :  { %1316 = vadd.xlane.f32.xlu1 %v1315_v17 }
 0x31f   :  { %v1212_v60 = vpop.xlane.xlu1 %1211 }
 0x320   :  { %1286 = vadd.xlane.f32.xlu1 %v1285_v31  ;;  %v1344_v32 = vadd.f32 %v3730_v59, %v1212_v60 }
 0x322   :  { %v1556_v27 = vrot.slane %v1344_v32, %v3746_v25 }
 0x324   :  { %v1164_v58 = vpop.xlane.xlu0 %1163 }
 0x325   :  { %v1218_v20 = vpop.xlane.xlu1 %1217  ;;  %v1328_v5 = vadd.f32 %v3730_v59, %v1164_v58 }
 0x326   :  { %v1346_v30 = vadd.f32 %v3730_v59, %v1218_v20 }
 0x327   :  { %v1447_v18 = vrot.slane %v1328_v5, %v3746_v25 }
 0x328   :  { %v1167_v24 = vpop.xlane.xlu0 %1166 }
 0x329   :  { %v1221_v57 = vpop.xlane.xlu1 %1220  ;;  %v1329_v8 = vadd.f32 %v3730_v59, %v1167_v24  ;;  %v1565_v24 = vrot.slane %v1346_v30, %v3751_v46 }
 0x32a   :  { %v1347_v22 = vadd.f32 %v3730_v59, %v1221_v57 }
 0x32b   :  { %v1452_v42 = vrot.slane %v1329_v8, %v3757_v29 }
 0x32c   :  { %v1170_v34 = vpop.xlane.xlu0 %1169  ;;  %v1570_v57 = vrot.slane %v1347_v22, %v3763_v49 }
 0x32d   :  { %v3734_v45 = vpop.xlane.xlu1 %1190  ;;  %v1330_v41 = vadd.f32 %v3730_v59, %v1170_v34  ;;  %v1454_v14 = vsel %vm1453_vm3, %v1452_v42, %v1447_v18 }
 0x32e   :  { %v1337_v44 = vadd.f32 %v3730_v59, %v3734_v45 }
 0x32f   :  { %v1459_v31 = vrot.slane %v1330_v41, %v3751_v46 }
 0x330   :  { %v1173_v16 = vpop.xlane.xlu0 %1172 }
 0x331   :  { %v1224_v53 = vpop.xlane.xlu1 %1223  ;;  %v1331_v43 = vadd.f32 %v3730_v59, %v1173_v16  ;;  %v1461_v12 = vsel %vm1460_vm4, %v1459_v31, %v1454_v14 }
 0x332   :  { %v1348_v39 = vadd.f32 %v3730_v59, %v1224_v53  ;;  %v1532_v53 = vadd.s32 4294967192, %v3737_v23 }
 0x333   :  { %v1466_v34 = vrot.slane %v1331_v43, %v3763_v49 }
 0x334   :  { %v1176_v35 = vpop.xlane.xlu0 %1175 }
 0x335   :  { %v3739_v63 = vpop.xlane.xlu1 %1193  ;;  %v1332_v51 = vadd.f32 %v3730_v59, %v1176_v35  ;;  %v1468_v21 = vsel %vm1467_vm5, %v1466_v34, %v1461_v12 }
 0x336   :  { %v1338_v5 = vadd.f32 %v3730_v59, %v3739_v63 }
 0x337   :  { %v1473_v35 = vrot.slane %v1332_v51, %v3772_v10 }
 0x338   :  { %v1179_v26 = vpop.xlane.xlu0 %1178 }
 0x339   :  { %v1227_v28 = vpop.xlane.xlu1 %1226  ;;  %v1333_v15 = vadd.f32 %v3730_v59, %v1179_v26  ;;  %v1575_v26 = vrot.slane %v1348_v39, %v3772_v10  ;;  %v1475_v8 = vsel %vm1474_vm6, %v1473_v35, %v1468_v21  ;;  %v3852_v39 = vsub.s32 %v1532_v53, %v3391_v54 }
 0x33a   :  { %v1349_v60 = vadd.f32 %v3730_v59, %v1227_v28 }
 0x33b   :  { %v1480_v47 = vrot.slane %v1333_v15, %v3781_v40 }
 0x33c   :  { %v1182_v38 = vpop.xlane.xlu0 %1181  ;;  %v1580_v37 = vrot.slane %v1349_v60, %v3781_v40 }
 0x33d   :  { %v3774_v48 = vpop.xlane.xlu1 %1196  ;;  %v1334_v58 = vadd.f32 %v3730_v59, %v1182_v38  ;;  %v1482_v43 = vsel %vm1481_vm7, %v1480_v47, %v1475_v8 }
 0x33e   :  { %v1339_v45 = vadd.f32 %v3730_v59, %v3774_v48  ;;  %v1515_v48 = vrot.slane %v1338_v5, %v3778_v52 }
 0x33f   :  { %v1487_v2 = vrot.slane %v1334_v58, %v3784_v7 }
 0x340   :  { %v1215_v6 = vpop.xlane.xlu0 %1214  ;;  %v1522_v31 = vrot.slane %v1339_v45, %v3788_v61 }
 0x341   :  { %v1345_v4 = vadd.f32 %v3730_v59, %v1215_v6  ;;  %v1230_v0 = vpop.xlane.xlu1 %1229  ;;  %v1489_v42 = vsel %vm1488_vm8, %v1487_v2, %v1482_v43 }
 0x342   :  { %v1350_v17 = vadd.f32 %v3730_v59, %v1230_v0 }
 0x343   :  { %v1560_v20 = vrot.slane %v1345_v4, %v3757_v29  ;;  %v1508_v4 = vrot.slane %v1337_v44, %v3769_v62 }
 0x344   :  { %v1185_v16 = vpop.xlane.xlu0 %1184  ;;  %v1585_v28 = vrot.slane %v1350_v17, %v3784_v7 }
 0x345   :  { %v1561_v1 = vsel %vm1453_vm3, %v1560_v20, %v1556_v27  ;;  %v1335_v33 = vadd.f32 %v3730_v59, %v1185_v16  ;;  %v1200_v50 = vpop.xlane.xlu1 %1199 }
 0x346   :  { %v1566_v55 = vsel %vm1460_vm4, %v1565_v24, %v1561_v1  ;;  %v1340_v51 = vadd.f32 %v3730_v59, %v1200_v50 }
 0x347   :  { %v1571_v56 = vsel %vm1467_vm5, %v1570_v57, %v1566_v55  ;;  %v1494_v11 = vrot.slane %v1335_v33, %v3791_v36 }
 0x348   :  { %v1576_v38 = vsel %vm1474_vm6, %v1575_v26, %v1571_v56  ;;  %v1188_v32 = vpop.xlane.xlu0 %1187  ;;  %v1529_v24 = vrot.slane %v1340_v51, %v3794_v3 }
 0x349   :  { %v1581_v41 = vsel %vm1481_vm7, %v1580_v37, %v1576_v38  ;;  %v1336_v30 = vadd.f32 %v3730_v59, %v1188_v32  ;;  %v1233_v22 = vpop.xlane.xlu1 %1232  ;;  %v1496_v0 = vsel %vm1495_vm9, %v1494_v11, %v1489_v42 }
 0x34a   :  { %v1586_v6 = vsel %vm1488_vm8, %v1585_v28, %v1581_v41  ;;  %v1351_v27 = vadd.f32 %v3730_v59, %v1233_v22 }
 0x34b   :  { %v1501_v63 = vrot.slane %v1336_v30, %v3800_v19 }
 0x34c   :  { %v1590_v18 = vrot.slane %v1351_v27, %v3791_v36  ;;  %v3876_v5 = vpop.xlane.xlu0 %1205 }
 0x34d   :  { %v1503_v15 = vsel %vm1502_vm10, %v1501_v63, %v1496_v0  ;;  %v1203_v17 = vpop.xlane.xlu1 %1202 }
 0x34e   :  { %v1510_v60 = vsel %vm1509_vm11, %v1508_v4, %v1503_v15  ;;  %v1591_v58 = vsel %vm1495_vm9, %v1590_v18, %v1586_v6  ;;  %v1341_v20 = vadd.f32 %v3730_v59, %v1203_v17 }
 0x34f   :  { %v1517_v57 = vsel %vm1516_vm12, %v1515_v48, %v1510_v60 }
 0x350   :  { %v1524_v34 = vsel %vm1523_vm13, %v1522_v31, %v1517_v57  ;;  %v1536_v16 = vrot.slane %v1341_v20, %v3852_v39  ;;  %v1290_v30 = vpop.xlane.xlu0 %1289 }
 0x351   :  { %v1531_v53 = vsel %vm1530_vm14, %v1529_v24, %v1524_v34  ;;  %v1236_v14 = vpop.xlane.xlu1 %1235 }
 0x352   :  { %v3866_v35 = vsel %vm1537_vm15, %v1536_v16, %v1531_v53  ;;  %v1352_v1 = vadd.f32 %v3730_v59, %v1236_v14  ;;  %v1539_v16 = vadd.s32 4294967184, %v3737_v23 }
 0x354   :  { %v1595_v33 = vrot.slane %v1352_v1, %v3800_v19  ;;  %v1263_v45 = vpop.xlane.xlu0 %1262 }
 0x355   :  { %v1239_v50 = vpop.xlane.xlu1 %1238 }
 0x356   :  { %v1596_v26 = vsel %vm1502_vm10, %v1595_v33, %v1591_v58  ;;  %v1353_v47 = vadd.f32 %v3730_v59, %v1239_v50  ;;  %v1370_v50 = vadd.f32 %v3730_v59, %v1290_v30 }
 0x358   :  { %v1600_v55 = vrot.slane %v1353_v47, %v3769_v62  ;;  %v1266_v27 = vpop.xlane.xlu0 %1265 }
 0x359   :  { %v1242_v28 = vpop.xlane.xlu1 %1241 }
 0x35a   :  { %v3874_v12 = vsel %vm1509_vm11, %v1600_v55, %v1596_v26  ;;  %v1354_v4 = vadd.f32 %v3730_v59, %v1242_v28  ;;  %v1361_v28 = vadd.f32 %v3730_v59, %v1263_v45 }
 0x35c   :  { %v1605_v58 = vrot.slane %v1354_v4, %v3746_v25  ;;  %v1308_v20 = vpop.xlane.xlu0 %1307  ;;  %v1362_v4 = vadd.f32 %v3730_v59, %v1266_v27 }
 0x35d   :  { %v1245_v37 = vpop.xlane.xlu1 %1244 }
 0x35e   :  { %v1355_v42 = vadd.f32 %v3730_v59, %v1245_v37 }
 0x360   :  { %v1609_v48 = vrot.slane %v1355_v42, %v3757_v29  ;;  %v1684_v42 = vrot.slane %v1370_v50, %v3746_v25 }
 0x361   :  { %v1248_v2 = vpop.xlane.xlu1 %1247 }
 0x362   :  { %v1356_v63 = vadd.f32 %v3730_v59, %v1248_v2  ;;  %v1610_v53 = vsel %vm1453_vm3, %v1609_v48, %v1605_v58 }
 0x364   :  { %v1614_v31 = vrot.slane %v1356_v63, %v3751_v46 }
 0x365   :  { %v1251_v56 = vpop.xlane.xlu1 %1250 }
 0x366   :  { %v1357_v0 = vadd.f32 %v3730_v59, %v1251_v56  ;;  %v1615_v26 = vsel %vm1460_vm4, %v1614_v31, %v1610_v53 }
 0x368   :  { %v1619_v24 = vrot.slane %v1357_v0, %v3763_v49 }
 0x369   :  { %v1254_v44 = vpop.xlane.xlu1 %1253 }
 0x36a   :  { %v1358_v18 = vadd.f32 %v3730_v59, %v1254_v44  ;;  %v1620_v37 = vsel %vm1467_vm5, %v1619_v24, %v1615_v26 }
 0x36c   :  { %v1624_v57 = vrot.slane %v1358_v18, %v3772_v10 }
 0x36d   :  { %v1257_v21 = vpop.xlane.xlu1 %1256 }
 0x36e   :  { %v1359_v15 = vadd.f32 %v3730_v59, %v1257_v21  ;;  %v1625_v56 = vsel %vm1474_vm6, %v1624_v57, %v1620_v37 }
 0x370   :  { %v1629_v14 = vrot.slane %v1359_v15, %v3781_v40 }
 0x371   :  { %v1260_v38 = vpop.xlane.xlu1 %1259 }
 0x372   :  { %v1360_v60 = vadd.f32 %v3730_v59, %v1260_v38  ;;  %v3906_v38 = vsub.s32 %v1539_v16, %v3391_v54 }
 0x374   :  { %v1634_v47 = vrot.slane %v1360_v60, %v3784_v7 }
 0x375   :  { %v1293_v11 = vpop.xlane.xlu1 %1292 }
 0x376   :  { %v1371_v34 = vadd.f32 %v3730_v59, %v1293_v11  ;;  %v1284_v11 = vpop.xlane.xlu0 %1283 }
 0x378   :  { %v1688_v44 = vrot.slane %v1371_v34, %v3757_v29 }
 0x379   :  { %v1296_v32 = vpop.xlane.xlu1 %1295 }
 0x37a   :  { %v1372_v1 = vadd.f32 %v3730_v59, %v1296_v32  ;;  %v1546_v32 = vadd.s32 4294967176, %v3737_v23  ;;  %v1689_v48 = vsel %vm1453_vm3, %v1688_v44, %v1684_v42  ;;  %vm1730_vm3 = vcmask 1041409  }
 0x37c   :  { %v1693_v30 = vrot.slane %v1372_v1, %v3751_v46  ;;  %v1549_v24 = vsub.s32 %v1546_v32, %v3391_v54 }
 0x37d   :  { %v1299_v8 = vpop.xlane.xlu1 %1298 }
 0x37e   :  { %v1373_v55 = vadd.f32 %v3730_v59, %v1299_v8  ;;  %v1630_v8 = vsel %vm1481_vm7, %v1629_v14, %v1625_v56  ;;  %v1694_v31 = vsel %vm1460_vm4, %v1693_v30, %v1689_v48  ;;  %v1389_v14 = vadd.s32 128, %v3737_v23  ;;  %v2566_v48 = vld [vmem:[#allocation2] ss:$0 sm:$0xff] }
 0x37f   :  { %v1342_v23 = vadd.f32 %v3730_v59, %v3876_v5 }
 0x380   :  { %v1698_v63 = vrot.slane %v1373_v55, %v3763_v49  ;;  %v1376_v49 = vadd.f32 %v3730_v59, %v1308_v20  ;;  %v1209_v20 = vpop.xlane.xlu0 %1208  ;;  %vm1391_vm4 = vcmp.lt.s32.totalorder %v1389_v14, 196 }
 0x381   :  { %v1269_v41 = vpop.xlane.xlu1 %1268  ;;  %v1343_v55 = vadd.f32 %v3730_v59, %v1209_v20 }
 0x382   :  { %v1363_v29 = vadd.f32 %v3730_v59, %v1269_v41  ;;  %v1713_v1 = vrot.slane %v1376_v49, %v3784_v7  ;;  %v1368_v7 = vadd.f32 %v3730_v59, %v1284_v11 }
 0x383   :  { %v1550_v5 = vrot.slane %v1343_v55, %v1549_v24 }
 0x384   :  { %v1674_v30 = vrot.slane %v1368_v7, %v3906_v38 }
 0x385   :  { %v1302_v22 = vpop.xlane.xlu1 %1301 }
 0x386   :  { %v1374_v2 = vadd.f32 %v3730_v59, %v1302_v22  ;;  %v1635_v22 = vsel %vm1488_vm8, %v1634_v47, %v1630_v8  ;;  %v1543_v8 = vrot.slane %v1342_v23, %v3906_v38 }
 0x388   :  { %v1703_v0 = vrot.slane %v1374_v2, %v3772_v10  ;;  %v1699_v10 = vsel %vm1467_vm5, %v1698_v63, %v1694_v31  ;;  %vm1544_vm5 = vcmask 982912  }
 0x389   :  { %v1272_v43 = vpop.xlane.xlu1 %1271  ;;  %v1545_v42 = vsel %vm1544_vm5, %v1543_v8, %v3866_v35 }
 0x38a   :  { %v1364_v18 = vadd.f32 %v3730_v59, %v1272_v43  ;;  %v1649_v43 = vrot.slane %v1363_v29, %v3769_v62  ;;  %v1704_v57 = vsel %vm1474_vm6, %v1703_v0, %v1699_v10  ;;  %vm1551_vm6 = vcmask 1048512  }
 0x38b   :  { %v1552_v29 = vsel %vm1551_vm6, %v1550_v5, %v1545_v42  ;;  %v4061_v42 = vld [vmem:[#allocation7_spill] sm:$0xff] }
 0x38c   :  { %v1654_v34 = vrot.slane %v1364_v18, %v3778_v52  ;;  %v1384_v18 = vpop.xlane.xlu0 %1383 }
 0x38d   :  { %v1305_v6 = vpop.xlane.xlu1 %1304 }
 0x38e   :  { %v1375_v21 = vadd.f32 %v3730_v59, %v1305_v6  ;;  %v1639_v6 = vrot.slane %v1361_v28, %v3791_v36 }
 0x390   :  { %v1708_v46 = vrot.slane %v1375_v21, %v3781_v40  ;;  %v1640_v41 = vsel %vm1495_vm9, %v1639_v6, %v1635_v22 }
 0x391   :  { %v1275_v51 = vpop.xlane.xlu1 %1274 }
 0x392   :  { %v1365_v25 = vadd.f32 %v3730_v59, %v1275_v51  ;;  %v1644_v51 = vrot.slane %v1362_v4, %v3800_v19 }
 0x394   :  { %v1659_v16 = vrot.slane %v1365_v25, %v3788_v61 }
 0x395   :  { %v1278_v17 = vpop.xlane.xlu1 %1277 }
 0x396   :  { %v1366_v27 = vadd.f32 %v3730_v59, %v1278_v17  ;;  %v1709_v17 = vsel %vm1481_vm7, %v1708_v46, %v1704_v57  ;;  %vm1737_vm7 = vcmask 1041408  }
 0x398   :  { %v1664_v50 = vrot.slane %v1366_v27, %v3794_v3  ;;  %v1714_v3 = vsel %vm1488_vm8, %v1713_v1, %v1709_v17  ;;  %vm1739_vm8 = vcmask 648192  }
 0x399   :  { %v1311_v33 = vpop.xlane.xlu1 %1310 }
 0x39a   :  { %v1377_v15 = vadd.f32 %v3730_v59, %v1311_v33  ;;  %v1645_v33 = vsel %vm1502_vm10, %v1644_v51, %v1640_v41 }
 0x39b   :  { %v1650_v52 = vsel %vm1509_vm11, %v1649_v43, %v1645_v33 }
 0x39c   :  { %v1718_v53 = vrot.slane %v1377_v15, %v3791_v36  ;;  %v1655_v36 = vsel %vm1516_vm12, %v1654_v34, %v1650_v52 }
 0x39d   :  { %v1281_v45 = vpop.xlane.xlu1 %1280 }
 0x39e   :  { %v1367_v58 = vadd.f32 %v3730_v59, %v1281_v45  ;;  %v1719_v37 = vsel %vm1495_vm9, %v1718_v53, %v1714_v3  ;;  %vm1809_vm9 = vcmask 654336   ;;  %v1979_v3 = vld [vmem:[%s4036_s15 + $0x18] sm:$0xff] }
 0x3a0   :  { %v1669_v28 = vrot.slane %v1367_v58, %v3852_v39 }
 0x3a1   :  { %v1314_v60 = vpop.xlane.xlu1 %1313 }
 0x3a2   :  { %v1378_v40 = vadd.f32 %v3730_v59, %v1314_v60 }
 0x3a4   :  { %v1723_v26 = vrot.slane %v1378_v40, %v3800_v19  ;;  %v1660_v19 = vsel %vm1523_vm13, %v1659_v16, %v1655_v36  ;;  %v1981_v36 = vld [vmem:[%s4036_s15 + $0x28] sm:$0xff] }
 0x3a5   :  { %v1317_v47 = vpop.xlane.xlu1 %1316  ;;  %v1665_v39 = vsel %vm1530_vm14, %v1664_v50, %v1660_v19  ;;  %v1806_v50 = vsub.s32 1, %v3391_v54  ;;  %v1982_v54 = vld [vmem:[%s4036_s15 + $0x30] sm:$0xff] }
 0x3a6   :  { %v1379_v61 = vadd.f32 %v3730_v59, %v1317_v47  ;;  %v1724_v56 = vsel %vm1502_vm10, %v1723_v26, %v1719_v37  ;;  %v1670_v21 = vsel %vm1537_vm15, %v1669_v28, %v1665_v39  ;;  %v1978_v19 = vld [vmem:[%s4036_s15 + $0x10] sm:$0xff]  ;;  %v1977_v37 = vld [vmem:[%s4036_s15 + $0x8] sm:$0xff] }
 0x3a7   :  { %v1675_v22 = vsel %vm1544_vm5, %v1674_v30, %v1670_v21 }
 0x3a8   :  { %v1728_v2 = vrot.slane %v1379_v61, %v3769_v62  ;;  %v1983_v61 = vld [vmem:[%s4036_s15 + $0x38] sm:$0xff] }
 0x3a9   :  { %v1287_v44 = vpop.xlane.xlu1 %1286 }
 0x3aa   :  { %v1369_v11 = vadd.f32 %v3730_v59, %v1287_v44  ;;  %v1729_v32 = vsel %vm1509_vm11, %v1728_v2, %v1724_v56  ;;  %v1976_v2 = vld [vmem:[%s4036_s15] sm:$0xff] }
 0x3ab   :  { %v1732_v62 = vsel %vm1730_vm3, %v1729_v32, %v3874_v12  ;;  %v1386_v12 = vadd.f32 %v2566_v48, %v1384_v18 }
 0x3ac   :  { %v1679_v45 = vrot.slane %v1369_v11, %v1549_v24  ;;  %v1736_v63 = vsel %vm1391_vm4, %v1732_v62, -1e+30  ;;  %v4059_v11 = vld [vmem:[#allocation6_spill] sm:$0xff] }
 0x3ad   :  { %v1740_v0 = vsel %vm1739_vm8, %v1736_v63, -inf  ;;  %v4060_v32 = vmax.f32 %v4059_v11, 0.0 }
 0x3ae   :  { %v1680_v6 = vsel %vm1551_vm6, %v1679_v45, %v1675_v22 }
 0x3af   :  { %v1731_v59 = vsel %vm1730_vm3, %v1680_v6, %v1552_v29 }
 0x3b0   :  { %v1738_v4 = vsel %vm1737_vm7, %v1731_v59, -inf }
 0x3b1   :  { %v1741_v38 = vmax.f32 %v1738_v4, %v1740_v0 }
 0x3b3   :  { %1742 = vmax.xlane.f32.xlu1 %v1741_v38 }
 0x43c   :  { %v1743_v46 = vpop.xlane.xlu1 %1742 }
 0x43d   :  { %v1744_v25 = vmax.f32 %v1743_v46, %v1386_v12 }
 0x43f   :  { %v1756_v15 = vsub.f32 %v1386_v12, %v1744_v25  ;;  %1747 = vperm.xlu0 %2446, %v1744_v25  }
 0x441   :  { %v1757_v51 = vmul.f32 1.442695, %v1756_v15 }
 0x4ba   :  { %v1748_v35 = vpop.permute.xlu0 %1747 }
 0x4bb   :  { %v1750_v49 = vsub.f32 %v1731_v59, %v1748_v35  ;;  %v1751_v41 = vsub.f32 %v1736_v63, %v1748_v35  ;;  %v2145_v63 = vld [vmem:[%s4037_s16] ss:$0 sm:$0xff] }
 0x4bd   :  { %v1752_v31 = vmul.f32 1.442695, %v1750_v49  ;;  %v1754_v27 = vmul.f32 1.442695, %v1751_v41 }
 0x4bf   :  { %2556 = vpow2.f32 %v1752_v31 }
 0x4c0   :  { %2558 = vpow2.f32 %v1754_v27 }
 0x4c1   :  { %2560 = vpow2.f32 %v1757_v51 }
 0x4cc   :  { %v2557_v60 = vpop.eup %2556 }
 0x4cd   :  { %v2559_v10 = vpop.eup %2558  ;;  %v1759_v43 = vsel %vm1737_vm7, %v2557_v60, 0.0 }
 0x4ce   :  { %v1760_v58 = vsel %vm1739_vm8, %v2559_v10, 0.0  ;;  %v2561_v24 = vpop.eup %2560 }
 0x4cf   :  { %v1761_v40 = vadd.f32 %v1760_v58, %v1759_v43 }
 0x4d1   :  { %1762 = vadd.xlane.f32.xlu1 %v1761_v40 }
 0x55a   :  { %v1763_v20 = vpop.xlane.xlu1 %1762 }
 0x55b   :  { %v1764_v57 = vadd.f32 %v2561_v24, %v1763_v20 }
 0x55d   :  { %2562 = vrcp.f32 %v1764_v57 }
 0x56a   :  { %v2563_v34 = vpop.eup %2562 }
 0x56b   :  { %1769 = vperm.xlu1 %2447, %v2563_v34   ;;  %v1774_v17 = vmul.f32 %v2563_v34, %v2561_v24 }
 0x56d   :  { %1965 = vperm.xlu0 %2446, %v1774_v17  }
 0x5e6   :  { %v1770_v16 = vpop.permute.xlu1 %1769 }
 0x5e7   :  { %v1772_v53 = vmul.f32 %v2557_v60, %v1770_v16  ;;  %v1773_v14 = vmul.f32 %v2559_v10, %v1770_v16 }
 0x5e8   :  { %v1966_v56 = vpop.permute.xlu0 %1965 }
 0x5e9   :  { %v1777_v1 = vcombine.low %v1772_v53, %v1773_v14  ;;  %v1968_v8 = vmul.f32 %v1966_v56, %v4060_v32 }
 0x5eb   :  { %v1784_v33 = vrot.slane %v1777_v1, %v3402_v9 }
 0x5ed   :  { %v1785_v26 = vcombine.high %v1784_v33, %v1784_v33  ;;  %v1792_v47 = vrot.slane %v1784_v33, %v3402_v9 }
 0x5ef   :  { %v1799_v55 = vrot.slane %v1785_v26, %v3402_v9  ;;  %v1807_v52 = vrot.slane %v1792_v47, %v1806_v50  ;;  %v1803_v28 = vrot.slane %v1792_v47, %v3407_v13  ;;  %v4058_v9 = vmov 0.0  }
 0x5f1   :  { %v1885_v23 = vrot.slane %v1799_v55, %v3407_v13  ;;  %2143 = vmatprep.mubr.msk.f32.mxu1 %vm1809_vm9, %v1807_v52  ;;  %v1889_v7 = vrot.slane %v1799_v55, %v1806_v50  ;;  %v1980_v13 = vld [vmem:[%s4036_s15 + $0x20] sm:$0xff] }
 0x5f2   :  { %1877 = vmatmul.mubr.f32.vlgmr.msra.gmra.mxu1 %v1803_v28 }
 0x5f3   :  { %2144 = vmatprep.mubr.msk.f32.mxu0 %vm1809_vm9, %v1889_v7  ;;  %2423 = vmatpush3.msra.mxu1 %v1983_v61 }
 0x5f4   :  { %1958 = vmatmul.mubr.f32.vlgmr.msra.gmra.mxu0 %v1885_v23  ;;  %2424 = vmatprep.subr.mxu1 %v4058_v9 }
 0x5f5   :  { %2425 = vmatpush3.msra.mxu1 %v1982_v54  ;;  %2438 = vmatprep.mubr.msk.f32.mxu1 %vm2590_vm0, %v4058_v9 }
 0x5f6   :  { %2426 = vmatprep.subr.mxu1 %v4058_v9 }
 0x5f7   :  { %2427 = vmatpush3.msra.mxu1 %v1981_v36 }
 0x5f8   :  { %2428 = vmatprep.subr.mxu1 %v4058_v9 }
 0x5f9   :  { %2429 = vmatpush3.msra.mxu1 %v1980_v13 }
 0x5fa   :  { %2430 = vmatprep.subr.mxu1 %v4058_v9 }
 0x5fb   :  { %2431 = vmatpush3.msra.mxu1 %v1979_v3 }
 0x5fc   :  { %2432 = vmatprep.subr.mxu1 %v4058_v9 }
 0x5fd   :  { %2433 = vmatpush3.msra.mxu1 %v1978_v19 }
 0x5fe   :  { %2434 = vmatprep.subr.mxu1 %v4058_v9 }
 0x5ff   :  { %2435 = vmatpush3.msra.mxu1 %v1977_v37 }
 0x600   :  { %2436 = vmatprep.subr.mxu1 %v4058_v9 }
 0x601   :  { %2437 = vmatpush3.msra.mxu1 %v1976_v2 }
 0x6b2   :  { %v1878_v39 = vpop.f32.mrf.mxu1 }
 0x6b4   :  { %v1880_v44 = vpop.f32.mrf.mxu1  ;;  %v1959_v5 = vpop.f32.mrf.mxu0 }
 0x6b5   :  { %v1971_v21 = vrot.slane %v1959_v5, 7 }
 0x6b6   :  { %v1961_v30 = vpop.f32.mrf.mxu0 }
 0x6b7   :  { %v1972_v62 = vsel %vm1730_vm3, %v1971_v21, %v1878_v39 }
 0x6b8   :  { %v1974_v45 = vadd.f32 %v1972_v62, %v1968_v8 }
 0x6ba   :  { %v1975_v22 = vadd.f32 %v4061_v42, %v1974_v45 }
 0x6bc   :  { %2439 = vmatmul.mubr.msk.f32.vlgmr.msra.gmra.mxu1 %vm128_vm1, %v1975_v22 }
 0x77c   :  { %v2060_v29 = vpop.f32.mrf.mxu1 }
 0x77d   :  { %v2061_v6 = vadd.f32 %v2145_v63, %v2060_v29 }
 0x77e   :  { %v2440_v59 = vpop.f32.mrf.mxu1 }
 0x77f   :  { %2564 = vtanh.f32 %v2061_v6 }
 0x78c   :  { %v2565_v4 = vpop.eup %2564 }
 0x78d   :  { %2065 = vst.msk [vmem:[#allocation3] sm:$0x3] %vm1381_vm2, %v2565_v4 }
 0x78e   :  { %2578 = shalt.err (!%p2575_p4)
}
 0x78f   :  { %2075 = dma.vmem_to_hbm [thread:$0]  %s2073_s2, 32, %s4038_s17, [#allocation4]  }
 0x790   :  { %2587 = dma.done.wait [#allocation4], 32  }
 0x791   :  { %2588 = vsyncadd [#allocation4], 4294967264 }
 0x792   :  { %2079 = vsyncpa [#allocation4], 1 }

</bundles_post_ra>
